<compile_context>
chip_gen: v6e
topology: v6e:2x2x1
jax: 0.10.0
libtpu: 0.0.40
codegen_flags: <defaults>
</compile_context>

<pallas_src>
import jax
import jax.numpy as jnp
from jax.experimental import pallas as pl
from jax.experimental.pallas import tpu as pltpu

L = 171      # sequence length (fixed by Linear(171, 3))
H = 1280     # hidden size    (fixed by Linear(1280, 1))
OUT = 3
CK = 256                 # lanes of the H contraction processed per loop step
N_CHUNKS = H // CK       # 5


def pred_head_kernel(x_ref, w1_ref, b1_ref, w2_ref, b2_ref, o_ref):
    """One batch tile: (TB, L, H) -> (TB, OUT).

    x_ref:  (TB, L, H) VMEM  activation tile (f32 or bf16)
    w1_ref: (1, 1, H)  VMEM  lane-dense Linear(1280,1) weight (f32)
    b1_ref: (1, 1)     SMEM  Linear(1280,1) bias (scalar)
    w2_ref: (L, OUT)   VMEM  Linear(171,3) weight
    b2_ref: (1, OUT)   VMEM  Linear(171,3) bias
    o_ref:  (TB, OUT)  VMEM  output tile
    """
    tb = x_ref.shape[0]

    # Linear(1280 -> 1) as a chunked VPU multiply + lane reduce over H.
    # Chunking bounds the per-step live set to O(TB*L*CK) so Mosaic never has to
    # materialize a (TB, L, H) f32 product/upcast temporary in VMEM.
    def h_chunk(c, acc):
        off = pl.multiple_of(c * CK, CK)
        xc = x_ref[:, :, pl.ds(off, CK)].astype(jnp.float32)   # (TB, L, CK)
        wc = w1_ref[:, :, pl.ds(off, CK)]                      # (1, 1, CK)
        return acc + jnp.sum(xc * wc, axis=-1)                 # (TB, L), lane-dense

    h = jax.lax.fori_loop(0, N_CHUNKS, h_chunk,
                          jnp.zeros((tb, L), jnp.float32), unroll=True)
    h = jnp.maximum(h + b1_ref[0, 0], 0.0)                     # bias + ReLU

    # Linear(171 -> 3): one tiny MXU matmul amortized over the TB rows,
    # with b2 folded in so no post-kernel XLA op is needed.
    out = jnp.dot(h, w2_ref[...], preferred_element_type=jnp.float32)  # (TB, OUT)
    o_ref[...] = (out + b2_ref[...]).astype(o_ref.dtype)


def _pick_tiling(batch, x_itemsize, block_b=None):
    """Pick (tb, vmem_limit_bytes) from the chip's VMEM capacity."""
    row_bytes = L * H * x_itemsize                 # one batch row of x in VMEM
    try:
        vmem_cap = pltpu.get_tpu_info().vmem_capacity_bytes
    except Exception:
        vmem_cap = 64 << 20                        # conservative: v7x per-core VMEM
    vmem_limit = int(min((vmem_cap * 3) // 4, 100 << 20))
    # Double-buffered x tile must fit; leave ~4 MiB for weights/output/scratch.
    tb = int(max(1, (vmem_limit - (4 << 20)) // (2 * row_bytes)))
    tb = min(tb, 48)                               # diminishing returns past ~48 rows
    if block_b is not None:
        tb = max(1, min(tb, block_b))
    if tb >= batch:
        return batch, vmem_limit                   # one full-dim block, never ragged
    return max(8, (tb // 8) * 8), vmem_limit       # sublane-aligned for partial blocks


def pred_head_esm2(x, w1, b1, w2, b2, *, block_b=None):
    """x: (B, L, H) f32/bf16; w1: (H,1) or (1,H); b1: (1,); w2: (L,OUT); b2: (OUT,)."""
    B = x.shape[0]
    assert x.shape == (B, L, H), x.shape

    # Canonical, lane-dense parameter layouts (all tiny).
    w1 = jnp.asarray(w1, jnp.float32).reshape(1, 1, H)
    b1 = jnp.asarray(b1, jnp.float32).reshape(1, 1)
    w2 = jnp.asarray(w2, jnp.float32).reshape(L, OUT)
    b2 = jnp.asarray(b2, jnp.float32).reshape(1, OUT)

    tb, vmem_limit = _pick_tiling(B, x.dtype.itemsize, block_b)
    # Ragged tail (B % tb != 0) is handled by Pallas boundary blocks: the last
    # block's out-of-range rows are read as garbage but never written back, and
    # rows are independent, so no jnp.pad (extra HBM pass) is needed.
    num_blocks = pl.cdiv(B, tb)

    cost = pl.CostEstimate(
        flops=2 * B * L * (H + OUT),
        transcendentals=0,
        bytes_accessed=B * L * H * x.dtype.itemsize
        + (w1.size + b1.size + w2.size + b2.size) * 4
        + B * OUT * 4,
    )

    return pl.pallas_call(
        pred_head_kernel,
        out_shape=jax.ShapeDtypeStruct((B, OUT), jnp.float32),
        grid_spec=pltpu.PrefetchScalarGridSpec(
            num_scalar_prefetch=0,
            grid=(num_blocks,),
            in_specs=[
                pl.BlockSpec((tb, L, H), lambda i: (i, 0, 0)),       # x batch tile
                pl.BlockSpec((1, 1, H), lambda i: (0, 0, 0)),        # w1 lane-dense
                pl.BlockSpec(memory_space=pltpu.MemorySpace.SMEM),   # b1 scalar
                pl.BlockSpec((L, OUT), lambda i: (0, 0)),            # w2
                pl.BlockSpec((1, OUT), lambda i: (0, 0)),            # b2
            ],
            out_specs=pl.BlockSpec((tb, OUT), lambda i: (i, 0)),
        ),
        compiler_params=pltpu.CompilerParams(
            # Independent batch blocks; "parallel" lets multi-TensorCore parts
            # (v7x) shard the batch grid across cores; no-op on v5e/v6e.
            dimension_semantics=("parallel",),
            vmem_limit_bytes=vmem_limit,
        ),
        cost_estimate=cost,
    )(x, w1, b1, w2, b2)


def reference(x, w1, b1, w2, b2):
    h = jnp.einsum("blh,ho->blo", x.astype(jnp.float32),
                   w1.reshape(H, 1)) + b1.reshape(1, 1, 1)            # (B, L, 1)
    h = jnp.maximum(h, 0.0)
    flat = h.reshape(x.shape[0], L)                                   # (B, L)
    return flat @ w2.reshape(L, OUT) + b2.reshape(1, OUT)             # (B, 3)


if __name__ == "__main__":
    key = jax.random.PRNGKey(0)
    kx, k1, k2, k3, k4 = jax.random.split(key, 5)

    B = 2
    x = jax.random.normal(kx, (B, L, H), dtype=jnp.float32)

    # Deterministic parameter init (shapes from the module's __init__).
    # nn.Linear(1280, 1): weight (1, 1280), bias (1,) -> stored as (H, 1), (1,)
    w1 = (jax.random.uniform(k1, (H, 1), dtype=jnp.float32) - 0.5) * (2.0 / jnp.sqrt(H))
    b1 = (jax.random.uniform(k2, (1,), dtype=jnp.float32) - 0.5) * (2.0 / jnp.sqrt(H))
    # nn.Linear(171, 3): weight (3, 171), bias (3,)   -> stored as (L, 3), (3,)
    w2 = (jax.random.uniform(k3, (L, OUT), dtype=jnp.float32) - 0.5) * (2.0 / jnp.sqrt(L))
    b2 = (jax.random.uniform(k4, (OUT,), dtype=jnp.float32) - 0.5) * (2.0 / jnp.sqrt(L))

    out = jax.block_until_ready(pred_head_esm2(x, w1, b1, w2, b2))
    ref = reference(x, w1, b1, w2, b2)
    assert out.shape == (B, OUT), out.shape
    assert jnp.allclose(out, ref, atol=1e-3, rtol=1e-3), (out, ref)

    # The kernel also consumes bf16 activations directly (no wrapper-side cast);
    # the per-chunk f32 upcast happens inside the kernel. This stands in for a
    # caller whose activations already live in bf16.
    x_bf16 = x.astype(jnp.bfloat16)
    out_bf16 = jax.block_until_ready(pred_head_esm2(x_bf16, w1, b1, w2, b2))
    assert jnp.allclose(out_bf16, ref, atol=5e-2, rtol=5e-2), (out_bf16, ref)

    print("KERNEL_OK")
</pallas_src>

<mosaic_0001>
module attributes {stable_mosaic.version = 11 : i64} {
  func.func @pred_head_kernel(%arg0: i32, %arg1: memref<2x171x1280xf32, #tpu.memory_space<vmem>>, %arg2: memref<1x1x1280xf32, #tpu.memory_space<vmem>>, %arg3: memref<1x1xf32, #tpu.memory_space<smem>>, %arg4: memref<171x3xf32, #tpu.memory_space<vmem>>, %arg5: memref<1x3xf32, #tpu.memory_space<vmem>>, %arg6: memref<2x3xf32, #tpu.memory_space<vmem>>) attributes {dimension_semantics = [#tpu.dimension_semantics<parallel>], iteration_bounds = array<i64: 1>, scalar_prefetch = 0 : i64, scratch_operands = 0 : i64, tpu.core_type = #tpu.core_type<tc>, window_params = [{transform_indices = @transform_0, window_bounds = array<i64: 2, 171, 1280>}, {pipeline_mode = #tpu.pipeline_mode<synchronous>, transform_indices = @transform_1, window_bounds = array<i64: 1, 1, 1280>}, {transform_indices = @transform_2, window_bounds = array<i64: 1, 1>}, {pipeline_mode = #tpu.pipeline_mode<synchronous>, transform_indices = @transform_3, window_bounds = array<i64: 171, 3>}, {pipeline_mode = #tpu.pipeline_mode<synchronous>, transform_indices = @transform_4, window_bounds = array<i64: 1, 3>}, {transform_indices = @transform_5, window_bounds = array<i64: 2, 3>}]} {
    %cst = arith.constant 0.000000e+00 : f32
    %0 = vector.broadcast %cst : f32 to vector<2x171xf32>
    %c0_i32 = arith.constant 0 : i32
    %c256_i32 = arith.constant 256 : i32
    %1 = arith.muli %c0_i32, %c256_i32 : i32
    %2 = tpu.assume_multiple %1, 256 : i32
    %c0 = arith.constant 0 : index
    %c0_0 = arith.constant 0 : index
    %3 = arith.index_cast %2 : i32 to index
    %4 = vector.load %arg1[%c0, %c0_0, %3] : memref<2x171x1280xf32, #tpu.memory_space<vmem>>, vector<2x171x256xf32>
    %c0_1 = arith.constant 0 : index
    %c0_2 = arith.constant 0 : index
    %5 = arith.index_cast %2 : i32 to index
    %6 = vector.load %arg2[%c0_1, %c0_2, %5] : memref<1x1x1280xf32, #tpu.memory_space<vmem>>, vector<1x1x256xf32>
    %7 = vector.broadcast %6 : vector<1x1x256xf32> to vector<2x171x256xf32>
    %8 = arith.mulf %4, %7 : vector<2x171x256xf32>
    %cst_3 = arith.constant dense<0.000000e+00> : vector<2x171xf32>
    %9 = vector.multi_reduction <add>, %8, %cst_3 [2] : vector<2x171x256xf32> to vector<2x171xf32>
    %10 = arith.addf %0, %9 : vector<2x171xf32>
    %c1_i32 = arith.constant 1 : i32
    %c256_i32_4 = arith.constant 256 : i32
    %11 = arith.muli %c1_i32, %c256_i32_4 : i32
    %12 = tpu.assume_multiple %11, 256 : i32
    %c0_5 = arith.constant 0 : index
    %c0_6 = arith.constant 0 : index
    %13 = arith.index_cast %12 : i32 to index
    %14 = vector.load %arg1[%c0_5, %c0_6, %13] : memref<2x171x1280xf32, #tpu.memory_space<vmem>>, vector<2x171x256xf32>
    %c0_7 = arith.constant 0 : index
    %c0_8 = arith.constant 0 : index
    %15 = arith.index_cast %12 : i32 to index
    %16 = vector.load %arg2[%c0_7, %c0_8, %15] : memref<1x1x1280xf32, #tpu.memory_space<vmem>>, vector<1x1x256xf32>
    %17 = vector.broadcast %16 : vector<1x1x256xf32> to vector<2x171x256xf32>
    %18 = arith.mulf %14, %17 : vector<2x171x256xf32>
    %cst_9 = arith.constant dense<0.000000e+00> : vector<2x171xf32>
    %19 = vector.multi_reduction <add>, %18, %cst_9 [2] : vector<2x171x256xf32> to vector<2x171xf32>
    %20 = arith.addf %10, %19 : vector<2x171xf32>
    %c2_i32 = arith.constant 2 : i32
    %c256_i32_10 = arith.constant 256 : i32
    %21 = arith.muli %c2_i32, %c256_i32_10 : i32
    %22 = tpu.assume_multiple %21, 256 : i32
    %c0_11 = arith.constant 0 : index
    %c0_12 = arith.constant 0 : index
    %23 = arith.index_cast %22 : i32 to index
    %24 = vector.load %arg1[%c0_11, %c0_12, %23] : memref<2x171x1280xf32, #tpu.memory_space<vmem>>, vector<2x171x256xf32>
    %c0_13 = arith.constant 0 : index
    %c0_14 = arith.constant 0 : index
    %25 = arith.index_cast %22 : i32 to index
    %26 = vector.load %arg2[%c0_13, %c0_14, %25] : memref<1x1x1280xf32, #tpu.memory_space<vmem>>, vector<1x1x256xf32>
    %27 = vector.broadcast %26 : vector<1x1x256xf32> to vector<2x171x256xf32>
    %28 = arith.mulf %24, %27 : vector<2x171x256xf32>
    %cst_15 = arith.constant dense<0.000000e+00> : vector<2x171xf32>
    %29 = vector.multi_reduction <add>, %28, %cst_15 [2] : vector<2x171x256xf32> to vector<2x171xf32>
    %30 = arith.addf %20, %29 : vector<2x171xf32>
    %c3_i32 = arith.constant 3 : i32
    %c256_i32_16 = arith.constant 256 : i32
    %31 = arith.muli %c3_i32, %c256_i32_16 : i32
    %32 = tpu.assume_multiple %31, 256 : i32
    %c0_17 = arith.constant 0 : index
    %c0_18 = arith.constant 0 : index
    %33 = arith.index_cast %32 : i32 to index
    %34 = vector.load %arg1[%c0_17, %c0_18, %33] : memref<2x171x1280xf32, #tpu.memory_space<vmem>>, vector<2x171x256xf32>
    %c0_19 = arith.constant 0 : index
    %c0_20 = arith.constant 0 : index
    %35 = arith.index_cast %32 : i32 to index
    %36 = vector.load %arg2[%c0_19, %c0_20, %35] : memref<1x1x1280xf32, #tpu.memory_space<vmem>>, vector<1x1x256xf32>
    %37 = vector.broadcast %36 : vector<1x1x256xf32> to vector<2x171x256xf32>
    %38 = arith.mulf %34, %37 : vector<2x171x256xf32>
    %cst_21 = arith.constant dense<0.000000e+00> : vector<2x171xf32>
    %39 = vector.multi_reduction <add>, %38, %cst_21 [2] : vector<2x171x256xf32> to vector<2x171xf32>
    %40 = arith.addf %30, %39 : vector<2x171xf32>
    %c4_i32 = arith.constant 4 : i32
    %c256_i32_22 = arith.constant 256 : i32
    %41 = arith.muli %c4_i32, %c256_i32_22 : i32
    %42 = tpu.assume_multiple %41, 256 : i32
    %c0_23 = arith.constant 0 : index
    %c0_24 = arith.constant 0 : index
    %43 = arith.index_cast %42 : i32 to index
    %44 = vector.load %arg1[%c0_23, %c0_24, %43] : memref<2x171x1280xf32, #tpu.memory_space<vmem>>, vector<2x171x256xf32>
    %c0_25 = arith.constant 0 : index
    %c0_26 = arith.constant 0 : index
    %45 = arith.index_cast %42 : i32 to index
    %46 = vector.load %arg2[%c0_25, %c0_26, %45] : memref<1x1x1280xf32, #tpu.memory_space<vmem>>, vector<1x1x256xf32>
    %47 = vector.broadcast %46 : vector<1x1x256xf32> to vector<2x171x256xf32>
    %48 = arith.mulf %44, %47 : vector<2x171x256xf32>
    %cst_27 = arith.constant dense<0.000000e+00> : vector<2x171xf32>
    %49 = vector.multi_reduction <add>, %48, %cst_27 [2] : vector<2x171x256xf32> to vector<2x171xf32>
    %50 = arith.addf %40, %49 : vector<2x171xf32>
    %c5_i32 = arith.constant 5 : i32
    %c0_28 = arith.constant 0 : index
    %c0_29 = arith.constant 0 : index
    %51 = memref.load %arg3[%c0_28, %c0_29] : memref<1x1xf32, #tpu.memory_space<smem>>
    %52 = vector.broadcast %51 : f32 to vector<2x171xf32>
    %53 = arith.addf %50, %52 : vector<2x171xf32>
    %cst_30 = arith.constant 0.000000e+00 : f32
    %54 = vector.broadcast %cst_30 : f32 to vector<2x171xf32>
    %55 = arith.maximumf %53, %54 : vector<2x171xf32>
    %c0_31 = arith.constant 0 : index
    %c0_32 = arith.constant 0 : index
    %56 = vector.load %arg4[%c0_31, %c0_32] : memref<171x3xf32, #tpu.memory_space<vmem>>, vector<171x3xf32>
    %cst_33 = arith.constant dense<0.000000e+00> : vector<2x3xf32>
    %57 = tpu.matmul %55, %56, %cst_33 {dimension_numbers = #tpu.dot_dimension_numbers<[1], [0], [0], [1], [0, 0, 1, 1], [], []>} : vector<2x171xf32>, vector<171x3xf32>, vector<2x3xf32> -> vector<2x3xf32>
    %c0_34 = arith.constant 0 : index
    %c0_35 = arith.constant 0 : index
    %58 = vector.load %arg5[%c0_34, %c0_35] : memref<1x3xf32, #tpu.memory_space<vmem>>, vector<1x3xf32>
    %59 = vector.broadcast %58 : vector<1x3xf32> to vector<2x3xf32>
    %60 = arith.addf %57, %59 : vector<2x3xf32>
    %c0_36 = arith.constant 0 : index
    %c0_37 = arith.constant 0 : index
    %61 = vector.load %arg6[%c0_36, %c0_37] : memref<2x3xf32, #tpu.memory_space<vmem>>, vector<2x3xf32>
    tpu.vector_store %arg6[%c0_36, %c0_37], %60 {strides = array<i32>} : memref<2x3xf32, #tpu.memory_space<vmem>>, vector<2x3xf32>,
    return
  }
  func.func @transform_0(%arg0: i32) -> (i32, i32, i32) {
    %c0_i32 = arith.constant 0 : i32
    %c0_i32_0 = arith.constant 0 : i32
    %c0_i32_1 = arith.constant 0 : i32
    return %arg0, %c0_i32, %c0_i32_0 : i32, i32, i32
  }
  func.func @transform_1(%arg0: i32) -> (i32, i32, i32) {
    %c0_i32 = arith.constant 0 : i32
    %c0_i32_0 = arith.constant 0 : i32
    %c0_i32_1 = arith.constant 0 : i32
    %c0_i32_2 = arith.constant 0 : i32
    return %c0_i32, %c0_i32_0, %c0_i32_1 : i32, i32, i32
  }
  func.func @transform_2(%arg0: i32) -> (i32, i32) {
    %c0_i32 = arith.constant 0 : i32
    %c0_i32_0 = arith.constant 0 : i32
    %c0_i32_1 = arith.constant 0 : i32
    return %c0_i32, %c0_i32_0 : i32, i32
  }
  func.func @transform_3(%arg0: i32) -> (i32, i32) {
    %c0_i32 = arith.constant 0 : i32
    %c0_i32_0 = arith.constant 0 : i32
    %c0_i32_1 = arith.constant 0 : i32
    return %c0_i32, %c0_i32_0 : i32, i32
  }
  func.func @transform_4(%arg0: i32) -> (i32, i32) {
    %c0_i32 = arith.constant 0 : i32
    %c0_i32_0 = arith.constant 0 : i32
    %c0_i32_1 = arith.constant 0 : i32
    return %c0_i32, %c0_i32_0 : i32, i32
  }
  func.func @transform_5(%arg0: i32) -> (i32, i32) {
    %c0_i32 = arith.constant 0 : i32
    %c0_i32_0 = arith.constant 0 : i32
    return %arg0, %c0_i32 : i32, i32
  }
}

</mosaic_0001>

<bundles_post_ra>
// kernel: tpu_custom_call.1
= control target key start
LH: loop header
LB: loop body
LE: loop exit
PB: predicated region body
PF: predicated region fallthrough
CT: control target
= control target key end

     0   :  { %v5488_v0 = vlaneseq  ;;  %vm273_vm0 = vcmask 1042432   ;;  %s5482_s0 = inlined_call_operand.vmem [shape: f32[2,171,1280], index: 0, kind: input, shape index: {}]   ;;  %s5483_s1 = inlined_call_operand.vmem [shape: f32[1,1,1280], index: 1, kind: input, shape index: {}]   ;;  %s5484_s2 = inlined_call_operand.<no memory space> [shape: f32[1,1], index: 2, kind: input, shape index: {}]   ;;  %s5485_s3 = inlined_call_operand.vmem [shape: f32[171,3], index: 3, kind: input, shape index: {}]   ;;  %s5486_s4 = inlined_call_operand.vmem [shape: f32[1,3], index: 4, kind: input, shape index: {}]   ;;  %s5487_s5 = inlined_call_operand.hbm [shape: f32[2,3], index: 5, kind: output, shape index: {}]  }
   0x1   :  { %v110_v2 = vld [vmem:[%s5483_s1] sm:$0x3]  ;;  %v27_v4 = vld [vmem:[%s5482_s0 + $0xa8] sm:$0xff]  ;;  %v28_v9 = vld [vmem:[%s5482_s0 + $0xf0] sm:$0xff] }
   0x2   :  { %v2794_v1 = vshrl.u32 %v5488_v0, 7  ;;  %v26_v3 = vld [vmem:[%s5482_s0 + $0xa0] sm:$0xff]  ;;  %v23_v8 = vld [vmem:[%s5482_s0 + $0x8] sm:$0xff]  ;;  %v29_v12 = vld [vmem:[%s5482_s0 + $0xf8] sm:$0xff] }
   0x3   :  { %v22_v7 = vld [vmem:[%s5482_s0] sm:$0xff]  ;;  %v24_v13 = vld [vmem:[%s5482_s0 + $0x50] sm:$0xff]  ;;  %v25_v14 = vld [vmem:[%s5482_s0 + $0x58] sm:$0xff] }
   0x4   :  { %v2806_v5 = vsub.s32 0, %v2794_v1  ;;  %v2809_v6 = vsub.s32 1, %v2794_v1  ;;  %v32_v19 = vld [vmem:[%s5482_s0 + $0x190] sm:$0xff]  ;;  %v33_v20 = vld [vmem:[%s5482_s0 + $0x198] sm:$0xff]  ;;  %v30_v25 = vld [vmem:[%s5482_s0 + $0x140] sm:$0xff] }
   0x5   :  { %v31_v26 = vld [vmem:[%s5482_s0 + $0x148] sm:$0xff]  ;;  %v36_v35 = vld [vmem:[%s5482_s0 + $0x230] sm:$0xff]  ;;  %v37_v36 = vld [vmem:[%s5482_s0 + $0x238] sm:$0xff] }
   0x6   :  { %v2821_v10 = vrot.slane %v110_v2, %v2806_v5  ;;  %v2824_v11 = vrot.slane %v110_v2, %v2809_v6  ;;  %v34_v37 = vld [vmem:[%s5482_s0 + $0x1e0] sm:$0xff]  ;;  %v35_v38 = vld [vmem:[%s5482_s0 + $0x1e8] sm:$0xff]  ;;  %v40_v45 = vld [vmem:[%s5482_s0 + $0x2d0] sm:$0xff] }
   0x7   :  { %v41_v46 = vld [vmem:[%s5482_s0 + $0x2d8] sm:$0xff]  ;;  %v38_v47 = vld [vmem:[%s5482_s0 + $0x280] sm:$0xff]  ;;  %v39_v48 = vld [vmem:[%s5482_s0 + $0x288] sm:$0xff] }
   0x8   :  { %v126_v15 = vmul.f32 %v2821_v10, %v26_v3  ;;  %v127_v16 = vmul.f32 %v2824_v11, %v27_v4  ;;  %v122_v17 = vmul.f32 %v2821_v10, %v22_v7  ;;  %v123_v18 = vmul.f32 %v2824_v11, %v23_v8  ;;  %v44_v49 = vld [vmem:[%s5482_s0 + $0x370] sm:$0xff]  ;;  %v45_v50 = vld [vmem:[%s5482_s0 + $0x378] sm:$0xff]  ;;  %v42_v57 = vld [vmem:[%s5482_s0 + $0x320] sm:$0xff] }
   0x9   :  { %v128_v21 = vmul.f32 %v2821_v10, %v28_v9  ;;  %v129_v22 = vmul.f32 %v2824_v11, %v29_v12  ;;  %v124_v23 = vmul.f32 %v2821_v10, %v24_v13  ;;  %v125_v24 = vmul.f32 %v2824_v11, %v25_v14  ;;  %v43_v60 = vld [vmem:[%s5482_s0 + $0x328] sm:$0xff]  ;;  %v48_v61 = vld [vmem:[%s5482_s0 + $0x410] sm:$0xff]  ;;  %v49_v62 = vld [vmem:[%s5482_s0 + $0x418] sm:$0xff] }
   0xa   :  { %v216_v27 = vadd.f32 %v127_v16, %v126_v15  ;;  %v210_v28 = vadd.f32 %v123_v18, %v122_v17  ;;  %v132_v30 = vmul.f32 %v2821_v10, %v32_v19  ;;  %v133_v31 = vmul.f32 %v2824_v11, %v33_v20  ;;  %v46_v63 = vld [vmem:[%s5482_s0 + $0x3c0] sm:$0xff]  ;;  %v47_v2 = vld [vmem:[%s5482_s0 + $0x3c8] sm:$0xff]  ;;  %v52_v4 = vld [vmem:[%s5482_s0 + $0x4b0] sm:$0xff] }
   0xb   :  { %v219_v29 = vadd.f32 %v129_v22, %v128_v21  ;;  %v213_v32 = vadd.f32 %v125_v24, %v124_v23  ;;  %v130_v33 = vmul.f32 %v2821_v10, %v30_v25  ;;  %v131_v34 = vmul.f32 %v2824_v11, %v31_v26  ;;  %v53_v7 = vld [vmem:[%s5482_s0 + $0x4b8] sm:$0xff]  ;;  %v50_v8 = vld [vmem:[%s5482_s0 + $0x460] sm:$0xff]  ;;  %v51_v14 = vld [vmem:[%s5482_s0 + $0x468] sm:$0xff] }
   0xc   :  { %217 = vadd.xlane.f32.xlu1 %v216_v27  ;;  %211 = vadd.xlane.f32.xlu0 %v210_v28  ;;  %v225_v39 = vadd.f32 %v133_v31, %v132_v30  ;;  %v136_v40 = vmul.f32 %v2821_v10, %v36_v35  ;;  %v137_v41 = vmul.f32 %v2824_v11, %v37_v36  ;;  %v56_v15 = vld [vmem:[%s5482_s0 + $0x550] sm:$0xff]  ;;  %v57_v16 = vld [vmem:[%s5482_s0 + $0x558] sm:$0xff]  ;;  %v54_v20 = vld [vmem:[%s5482_s0 + $0x500] sm:$0xff] }
   0xd   :  { %v222_v42 = vadd.f32 %v131_v34, %v130_v33  ;;  %v134_v43 = vmul.f32 %v2821_v10, %v34_v37  ;;  %v135_v44 = vmul.f32 %v2824_v11, %v35_v38  ;;  %v140_v52 = vmul.f32 %v2821_v10, %v40_v45  ;;  %v55_v21 = vld [vmem:[%s5482_s0 + $0x508] sm:$0xff]  ;;  %v60_v33 = vld [vmem:[%s5482_s0 + $0x5f0] sm:$0xff]  ;;  %v61_v34 = vld [vmem:[%s5482_s0 + $0x5f8] sm:$0xff] }
   0xe   :  { %v231_v51 = vadd.f32 %v137_v41, %v136_v40  ;;  %v141_v53 = vmul.f32 %v2824_v11, %v41_v46  ;;  %v138_v55 = vmul.f32 %v2821_v10, %v38_v47  ;;  %v139_v56 = vmul.f32 %v2824_v11, %v39_v48  ;;  %v58_v35 = vld [vmem:[%s5482_s0 + $0x5a0] sm:$0xff]  ;;  %v59_v36 = vld [vmem:[%s5482_s0 + $0x5a8] sm:$0xff]  ;;  %v64_v37 = vld [vmem:[%s5482_s0 + $0x690] sm:$0x7] }
   0xf   :  { %v228_v54 = vadd.f32 %v135_v44, %v134_v43  ;;  %v144_v58 = vmul.f32 %v2821_v10, %v44_v49  ;;  %v145_v59 = vmul.f32 %v2824_v11, %v45_v50  ;;  %v142_v3 = vmul.f32 %v2821_v10, %v42_v57  ;;  %v65_v38 = vld [vmem:[%s5482_s0 + $0x698] sm:$0x7]  ;;  %v88_v43 = vld [vmem:[%s5482_s0 + $0xa50] sm:$0xff]  ;;  %v86_v49 = vld [vmem:[%s5482_s0 + $0xa00] sm:$0xff] }
  0x10   :  { %220 = vadd.xlane.f32.xlu1 %v219_v29  ;;  %214 = vadd.xlane.f32.xlu0 %v213_v32  ;;  %v237_v9 = vadd.f32 %v141_v53, %v140_v52  ;;  %v234_v12 = vadd.f32 %v139_v56, %v138_v55  ;;  %v143_v13 = vmul.f32 %v2824_v11, %v43_v60  ;;  %v89_v44 = vld [vmem:[%s5482_s0 + $0xa58] sm:$0xff]  ;;  %v87_v50 = vld [vmem:[%s5482_s0 + $0xa08] sm:$0xff]  ;;  %v90_v56 = vld [vmem:[%s5482_s0 + $0xaa0] sm:$0xff] }
  0x11   :  { %v243_v17 = vadd.f32 %v145_v59, %v144_v58  ;;  %v148_v18 = vmul.f32 %v2821_v10, %v48_v61  ;;  %v149_v19 = vmul.f32 %v2824_v11, %v49_v62  ;;  %v146_v22 = vmul.f32 %v2821_v10, %v46_v63  ;;  %v93_v55 = vld [vmem:[%s5482_s0 + $0xaf8] sm:$0xff]  ;;  %v91_v61 = vld [vmem:[%s5482_s0 + $0xaa8] sm:$0xff]  ;;  %v96_v62 = vld [vmem:[%s5482_s0 + $0xb90] sm:$0xff] }
  0x12   :  { %v147_v23 = vmul.f32 %v2824_v11, %v47_v2  ;;  %v152_v24 = vmul.f32 %v2821_v10, %v52_v4  ;;  %v153_v25 = vmul.f32 %v2824_v11, %v53_v7  ;;  %v150_v26 = vmul.f32 %v2821_v10, %v50_v8  ;;  %v97_v7 = vld [vmem:[%s5482_s0 + $0xb98] sm:$0xff]  ;;  %v94_v8 = vld [vmem:[%s5482_s0 + $0xb40] sm:$0xff] }
  0x13   :  { %v151_v27 = vmul.f32 %v2824_v11, %v51_v14  ;;  %v156_v28 = vmul.f32 %v2821_v10, %v56_v15  ;;  %v157_v29 = vmul.f32 %v2824_v11, %v57_v16  ;;  %v240_v30 = vadd.f32 %v143_v13, %v142_v3  ;;  %v100_v16 = vld [vmem:[%s5482_s0 + $0xc30] sm:$0xff] }
  0x14   :  { %226 = vadd.xlane.f32.xlu1 %v225_v39  ;;  %223 = vadd.xlane.f32.xlu0 %v222_v42  ;;  %v154_v31 = vmul.f32 %v2821_v10, %v54_v20  ;;  %v155_v32 = vmul.f32 %v2824_v11, %v55_v21  ;;  %v249_v39 = vadd.f32 %v149_v19, %v148_v18  ;;  %v62_v42 = vld [vmem:[%s5482_s0 + $0x640] sm:$0xff] }
  0x15   :  { %v246_v40 = vadd.f32 %v147_v23, %v146_v22  ;;  %v2973_v41 = vadd.f32 %v153_v25, %v152_v24  ;;  %v252_v45 = vadd.f32 %v151_v27, %v150_v26  ;;  %v2984_v46 = vadd.f32 %v157_v29, %v156_v28  ;;  %v98_v18 = vld [vmem:[%s5482_s0 + $0xbe0] sm:$0xff]  ;;  %v99_v22 = vld [vmem:[%s5482_s0 + $0xbe8] sm:$0xff]  ;;  %v104_v23 = vld [vmem:[%s5482_s0 + $0xcd0] sm:$0xff] }
  0x16   :  { %v160_v47 = vmul.f32 %v2821_v10, %v60_v33  ;;  %v161_v48 = vmul.f32 %v2824_v11, %v61_v34  ;;  %v2997_v52 = vadd.f32 %v155_v32, %v154_v31  ;;  %v158_v53 = vmul.f32 %v2821_v10, %v58_v35  ;;  %v105_v28 = vld [vmem:[%s5482_s0 + $0xcd8] sm:$0xff]  ;;  %v102_v29 = vld [vmem:[%s5482_s0 + $0xc80] sm:$0xff]  ;;  %v103_v34 = vld [vmem:[%s5482_s0 + $0xc88] sm:$0xff] }
  0x17   :  { %v3008_v57 = vmul.f32 %v2821_v10, %v64_v37  ;;  %v3011_v58 = vmul.f32 %v2824_v11, %v65_v38  ;;  %v188_v59 = vmul.f32 %v2821_v10, %v88_v43  ;;  %v189_v60 = vmul.f32 %v2824_v11, %v89_v44  ;;  %v108_v35 = vld [vmem:[%s5482_s0 + $0xd70] sm:$0x7]  ;;  %v107_v43 = vld [vmem:[%s5482_s0 + $0xd28] sm:$0xff] }
  0x18   :  { %232 = vadd.xlane.f32.xlu1 %v231_v51  ;;  %229 = vadd.xlane.f32.xlu0 %v228_v54  ;;  %v92_v51 = vld [vmem:[%s5482_s0 + $0xaf0] sm:$0xff]  ;;  %v159_v54 = vmul.f32 %v2824_v11, %v59_v36  ;;  %v3022_v63 = vmul.f32 %v2821_v10, %v62_v42  ;;  %v186_v2 = vmul.f32 %v2821_v10, %v86_v49  ;;  %v109_v36 = vld [vmem:[%s5482_s0 + $0xd78] sm:$0x7]  ;;  %v106_v42 = vld [vmem:[%s5482_s0 + $0xd20] sm:$0xff] }
  0x19   :  { %v187_v3 = vmul.f32 %v2824_v11, %v87_v50  ;;  %v192_v4 = vmul.f32 %v2821_v10, %v92_v51  ;;  %v3038_v13 = vadd.f32 %v189_v60, %v188_v59  ;;  %v193_v14 = vmul.f32 %v2824_v11, %v93_v55  ;;  %v63_v44 = vld [vmem:[%s5482_s0 + $0x648] sm:$0xff] }
  0x1a   :  { %v190_v15 = vmul.f32 %v2821_v10, %v90_v56  ;;  %v191_v20 = vmul.f32 %v2824_v11, %v91_v61  ;;  %v196_v21 = vmul.f32 %v2821_v10, %v96_v62  ;;  %v197_v25 = vmul.f32 %v2824_v11, %v97_v7  ;;  %v69_v7 = vld [vmem:[%s5482_s0 + $0x738] sm:$0xff] }
  0x1b   :  { %v3051_v19 = vadd.f32 %v187_v3, %v186_v2  ;;  %v3061_v24 = vadd.f32 %v193_v14, %v192_v4  ;;  %v194_v26 = vmul.f32 %v2821_v10, %v94_v8  ;;  %v200_v31 = vmul.f32 %v2821_v10, %v100_v16  ;;  %v68_v4 = vld [vmem:[%s5482_s0 + $0x730] sm:$0xff] }
  0x1c   :  { %238 = vadd.xlane.f32.xlu1 %v237_v9  ;;  %235 = vadd.xlane.f32.xlu0 %v234_v12  ;;  %v95_v9 = vld [vmem:[%s5482_s0 + $0xb48] sm:$0xff]  ;;  %v3036_v12 = vadd.f32 %v161_v48, %v160_v47  ;;  %v198_v33 = vmul.f32 %v2821_v10, %v98_v18  ;;  %v3086_v37 = vadd.f32 %v197_v25, %v196_v21  ;;  %v72_v18 = vld [vmem:[%s5482_s0 + $0x7d0] sm:$0xff]  ;;  %v70_v21 = vld [vmem:[%s5482_s0 + $0x780] sm:$0xff] }
  0x1d   :  { %v195_v27 = vmul.f32 %v2824_v11, %v95_v9  ;;  %v205_v48 = vmul.f32 %v2824_v11, %v105_v28  ;;  %v202_v49 = vmul.f32 %v2821_v10, %v102_v29  ;;  %v203_v51 = vmul.f32 %v2824_v11, %v103_v34  ;;  %v76_v28 = vld [vmem:[%s5482_s0 + $0x870] sm:$0xff]  ;;  %v77_v29 = vld [vmem:[%s5482_s0 + $0x878] sm:$0xff] }
  0x1e   :  { %v208_v55 = vmul.f32 %v2821_v10, %v108_v35  ;;  %v206_v59 = vmul.f32 %v2821_v10, %v106_v42  ;;  %v207_v60 = vmul.f32 %v2824_v11, %v107_v43  ;;  %v163_v61 = vmul.f32 %v2824_v11, %v63_v44  ;;  %v80_v42 = vld [vmem:[%s5482_s0 + $0x910] sm:$0xff]  ;;  %v81_v43 = vld [vmem:[%s5482_s0 + $0x918] sm:$0xff]  ;;  %v78_v44 = vld [vmem:[%s5482_s0 + $0x8c0] sm:$0xff] }
  0x1f   :  { %v3088_v38 = vadd.f32 %v195_v27, %v194_v26  ;;  %v3116_v62 = vadd.f32 %v203_v51, %v202_v49  ;;  %v169_v14 = vmul.f32 %v2824_v11, %v69_v7  ;;  %v170_v26 = vmul.f32 %v2821_v10, %v70_v21 }
  0x20   :  { %244 = vadd.xlane.f32.xlu1 %v243_v17  ;;  %241 = vadd.xlane.f32.xlu0 %v240_v30  ;;  %v101_v17 = vld [vmem:[%s5482_s0 + $0xc38] sm:$0xff]  ;;  %v3072_v30 = vadd.f32 %v191_v20, %v190_v15  ;;  %v342_v2 = vsel %vm273_vm0, %v208_v55, 0.0  ;;  %v3134_v9 = vadd.f32 %v207_v60, %v206_v59  ;;  %v270_v15 = vadd.f32 %v163_v61, %v3022_v63  ;;  %v71_v63 = vld [vmem:[%s5482_s0 + $0x788] sm:$0xff]  ;;  %v84_v60 = vld [vmem:[%s5482_s0 + $0x9b0] sm:$0xff] }
  0x21   :  { %v201_v32 = vmul.f32 %v2824_v11, %v101_v17  ;;  %v73_v20 = vld [vmem:[%s5482_s0 + $0x7d8] sm:$0xff]  ;;  %v171_v27 = vmul.f32 %v2824_v11, %v71_v63  ;;  %v176_v34 = vmul.f32 %v2821_v10, %v76_v28  ;;  %v177_v35 = vmul.f32 %v2824_v11, %v77_v29 }
  0x22   :  { %v180_v49 = vmul.f32 %v2821_v10, %v80_v42  ;;  %v181_v51 = vmul.f32 %v2824_v11, %v81_v43  ;;  %v178_v55 = vmul.f32 %v2821_v10, %v78_v44  ;;  %v85_v61 = vld [vmem:[%s5482_s0 + $0x9b8] sm:$0xff] }
  0x23   :  { %v3102_v47 = vadd.f32 %v201_v32, %v200_v31  ;;  %v74_v31 = vld [vmem:[%s5482_s0 + $0x820] sm:$0xff]  ;;  %v75_v32 = vld [vmem:[%s5482_s0 + $0x828] sm:$0xff] }
  0x24   :  { %250 = vadd.xlane.f32.xlu1 %v249_v39  ;;  %247 = vadd.xlane.f32.xlu0 %v246_v40  ;;  %v199_v39 = vmul.f32 %v2824_v11, %v99_v22  ;;  %v204_v40 = vmul.f32 %v2821_v10, %v104_v23  ;;  %v172_v22 = vmul.f32 %v2821_v10, %v72_v18 }
  0x25   :  { %v173_v23 = vmul.f32 %v2824_v11, %v73_v20 }
  0x26   :  { %v3106_v50 = vadd.f32 %v199_v39, %v198_v33  ;;  %v3111_v56 = vadd.f32 %v205_v48, %v204_v40  ;;  %v174_v39 = vmul.f32 %v2821_v10, %v74_v31  ;;  %v175_v40 = vmul.f32 %v2824_v11, %v75_v32  ;;  %v79_v48 = vld [vmem:[%s5482_s0 + $0x8c8] sm:$0xff] }
  0x27   :  { %v288_v33 = vadd.f32 %v173_v23, %v172_v22  ;;  %v179_v59 = vmul.f32 %v2824_v11, %v79_v48 }
  0x28   :  { %256 = vadd.xlane.f32.xlu1 %v2973_v41  ;;  %253 = vadd.xlane.f32.xlu0 %v252_v45  ;;  %v209_v41 = vmul.f32 %v2824_v11, %v109_v36  ;;  %v264_v45 = vadd.f32 %v159_v54, %v158_v53  ;;  %v274_v53 = vsel %vm273_vm0, %v3008_v57, 0.0  ;;  %v275_v54 = vsel %vm273_vm0, %v3011_v58, 0.0 }
  0x29   :  { %v276_v57 = vadd.f32 %v275_v54, %v274_v53  ;;  %v168_v58 = vmul.f32 %v2821_v10, %v68_v4  ;;  %v285_v36 = vadd.f32 %v171_v27, %v170_v26 }
  0x2a   :  { %v343_v3 = vsel %vm273_vm0, %v209_v41, 0.0  ;;  %v294_v41 = vadd.f32 %v177_v35, %v176_v34 }
  0x2b   :  { %v3132_v8 = vadd.f32 %v343_v3, %v342_v2  ;;  %v82_v2 = vld [vmem:[%s5482_s0 + $0x960] sm:$0xff]  ;;  %v83_v3 = vld [vmem:[%s5482_s0 + $0x968] sm:$0xff] }
  0x2c   :  { %262 = vadd.xlane.f32.xlu1 %v2984_v46  ;;  %259 = vadd.xlane.f32.xlu0 %v2997_v52  ;;  %v66_v46 = vld [vmem:[%s5482_s0 + $0x6e0] sm:$0xff]  ;;  %v67_v52 = vld [vmem:[%s5482_s0 + $0x6e8] sm:$0xff] }
  0x2d   :  { %v166_v16 = vmul.f32 %v2821_v10, %v66_v46  ;;  %v167_v17 = vmul.f32 %v2824_v11, %v67_v52 }
  0x2f   :  { %v279_v25 = vadd.f32 %v167_v17, %v166_v16 }
  0x30   :  { %268 = vadd.xlane.f32.xlu1 %v3036_v12  ;;  %265 = vadd.xlane.f32.xlu0 %v264_v45  ;;  %v282_v12 = vadd.f32 %v169_v14, %v168_v58  ;;  %v291_v45 = vadd.f32 %v175_v40, %v174_v39 }
  0x34   :  { %277 = vadd.xlane.f32.xlu1 %v276_v57  ;;  %271 = vadd.xlane.f32.xlu0 %v270_v15 }
  0x38   :  { %283 = vadd.xlane.f32.xlu1 %v282_v12  ;;  %280 = vadd.xlane.f32.xlu0 %v279_v25 }
  0x3c   :  { %289 = vadd.xlane.f32.xlu1 %v288_v33  ;;  %286 = vadd.xlane.f32.xlu0 %v285_v36 }
  0x3d   :  { %11 = vsyncpa [#allocation4], 0  ;;  %v300_v53 = vadd.f32 %v181_v51, %v180_v49  ;;  %v184_v54 = vmul.f32 %v2821_v10, %v84_v60  ;;  %v185_v4 = vmul.f32 %v2824_v11, %v85_v61  ;;  %v297_v7 = vadd.f32 %v179_v59, %v178_v55  ;;  %v2384_v15 = vld [vmem:[%s5482_s0 + $0x100] sm:$0xff]  ;;  %v2385_v16 = vld [vmem:[%s5482_s0 + $0x108] sm:$0xff] }
  0x3e   :  { %v182_v46 = vmul.f32 %v2821_v10, %v82_v2  ;;  %v183_v52 = vmul.f32 %v2824_v11, %v83_v3  ;;  %v2466_v10 = vld [vmem:[%s5483_s1 + $0x2] sm:$0x3]  ;;  %v2389_v23 = vld [vmem:[%s5482_s0 + $0x1a8] sm:$0xff]  ;;  %v2386_v25 = vld [vmem:[%s5482_s0 + $0x150] sm:$0xff]  ;;  %vm2045_vm1 = vcmask 130112   ;;  %vm2052_vm2 = vcmask 195712  }
  0x3f   :  { %v306_v57 = vadd.f32 %v185_v4, %v184_v54  ;;  %v3222_v11 = vrot.slane %v2466_v10, %v2806_v5  ;;  %v2388_v22 = vld [vmem:[%s5482_s0 + $0x1a0] sm:$0xff]  ;;  %v2393_v33 = vld [vmem:[%s5482_s0 + $0x248] sm:$0xff]  ;;  %v2390_v34 = vld [vmem:[%s5482_s0 + $0x1f0] sm:$0xff]  ;;  %vm2059_vm3 = vcmask 261312   ;;  %vm2066_vm4 = vcmask 326912  }
  0x40   :  { %295 = vadd.xlane.f32.xlu1 %v294_v41  ;;  %292 = vadd.xlane.f32.xlu0 %v291_v45  ;;  %v303_v58 = vadd.f32 %v183_v52, %v182_v46  ;;  %v2392_v32 = vld [vmem:[%s5482_s0 + $0x240] sm:$0xff]  ;;  %v2391_v35 = vld [vmem:[%s5482_s0 + $0x1f8] sm:$0xff]  ;;  %v2397_v49 = vld [vmem:[%s5482_s0 + $0x2e8] sm:$0xff]  ;;  %vm2073_vm5 = vcmask 392512   ;;  %vm2080_vm6 = vcmask 458112   ;;  %vm2087_vm7 = vcmask 523712  }
  0x41   :  { %v499_v17 = vmul.f32 %v2384_v15, %v3222_v11  ;;  %v501_v27 = vmul.f32 %v2386_v25, %v3222_v11  ;;  %v507_v39 = vmul.f32 %v2392_v32, %v3222_v11  ;;  %v505_v43 = vmul.f32 %v2390_v34, %v3222_v11  ;;  %v2396_v48 = vld [vmem:[%s5482_s0 + $0x2e0] sm:$0xff]  ;;  %v2394_v51 = vld [vmem:[%s5482_s0 + $0x290] sm:$0xff]  ;;  %v2395_v55 = vld [vmem:[%s5482_s0 + $0x298] sm:$0xff] }
  0x42   :  { %v511_v45 = vmul.f32 %v2396_v48, %v3222_v11  ;;  %v509_v61 = vmul.f32 %v2394_v51, %v3222_v11  ;;  %v2400_v3 = vld [vmem:[%s5482_s0 + $0x380] sm:$0xff]  ;;  %v2398_v54 = vld [vmem:[%s5482_s0 + $0x330] sm:$0xff]  ;;  %v2399_v4 = vld [vmem:[%s5482_s0 + $0x338] sm:$0xff]  ;;  %vm2094_vm8 = vcmask 589312   ;;  %vm2101_vm9 = vcmask 654912  }
  0x43   :  { %v515_v46 = vmul.f32 %v2400_v3, %v3222_v11  ;;  %v2412_v25 = vld [vmem:[%s5482_s0 + $0x560] sm:$0xff]  ;;  %vm2108_vm10 = vcmask 720512   ;;  %vm2115_vm11 = vcmask 786112   ;;  %vm2122_vm12 = vcmask 851712  }
  0x44   :  { %301 = vadd.xlane.f32.xlu1 %v300_v53  ;;  %298 = vadd.xlane.f32.xlu0 %v297_v7  ;;  %v2401_v53 = vld [vmem:[%s5482_s0 + $0x388] sm:$0xff]  ;;  %v2416_v34 = vld [vmem:[%s5482_s0 + $0x600] sm:$0xff]  ;;  %vm2129_vm13 = vcmask 917312   ;;  %vm2136_vm14 = vcmask 982912   ;;  %vm2282_vm15 = vcmask 1041409  }
  0x48   :  { %307 = vadd.xlane.f32.xlu1 %v306_v57  ;;  %304 = vadd.xlane.f32.xlu0 %v303_v58  ;;  %v513_v58 = vmul.f32 %v2398_v54, %v3222_v11  ;;  %v2424_v54 = vld [vmem:[%s5482_s0 + $0x740] sm:$0xff] }
  0x4c   :  { %313 = vadd.xlane.f32.xlu1 %v3038_v13  ;;  %310 = vadd.xlane.f32.xlu0 %v3051_v19  ;;  %v2380_v13 = vld [vmem:[%s5482_s0 + $0x60] sm:$0xff]  ;;  %v3230_v19 = vrot.slane %v2466_v10, %v2809_v6 }
  0x4e   :  { %v500_v18 = vmul.f32 %v2385_v16, %v3230_v19  ;;  %v504_v26 = vmul.f32 %v2389_v23, %v3230_v19  ;;  %v508_v40 = vmul.f32 %v2393_v33, %v3230_v19  ;;  %v506_v44 = vmul.f32 %v2391_v35, %v3230_v19  ;;  %v2417_v35 = vld [vmem:[%s5482_s0 + $0x608] sm:$0xff] }
  0x4f   :  { %v512_v59 = vmul.f32 %v2397_v49, %v3230_v19  ;;  %v510_v2 = vmul.f32 %v2395_v55, %v3230_v19  ;;  %v516_v52 = vmul.f32 %v2401_v53, %v3230_v19  ;;  %v514_v10 = vmul.f32 %v2399_v4, %v3230_v19  ;;  %v2425_v4 = vld [vmem:[%s5482_s0 + $0x748] sm:$0xff] }
  0x50   :  { %319 = vadd.xlane.f32.xlu1 %v3061_v24  ;;  %316 = vadd.xlane.f32.xlu0 %v3072_v30  ;;  %v2381_v24 = vld [vmem:[%s5482_s0 + $0x68] sm:$0xff]  ;;  %v2378_v30 = vld [vmem:[%s5482_s0 + $0x10] sm:$0xff]  ;;  %v590_v28 = vadd.f32 %v500_v18, %v499_v17  ;;  %v602_v41 = vadd.f32 %v508_v40, %v507_v39  ;;  %v599_v60 = vadd.f32 %v506_v44, %v505_v43  ;;  %v2407_v18 = vld [vmem:[%s5482_s0 + $0x478] sm:$0xff] }
  0x51   :  { %v608_v7 = vadd.f32 %v512_v59, %v511_v45  ;;  %v605_v57 = vadd.f32 %v510_v2, %v509_v61  ;;  %v2406_v17 = vld [vmem:[%s5482_s0 + $0x470] sm:$0xff]  ;;  %v522_v23 = vmul.f32 %v2407_v18, %v3230_v19  ;;  %v2415_v39 = vld [vmem:[%s5482_s0 + $0x5b8] sm:$0xff]  ;;  %v2420_v40 = vld [vmem:[%s5482_s0 + $0x6a0] sm:$0x7]  ;;  %v531_v44 = vmul.f32 %v2416_v34, %v3222_v11 }
  0x52   :  { %v532_v48 = vmul.f32 %v2417_v35, %v3230_v19  ;;  %v530_v55 = vmul.f32 %v2415_v39, %v3230_v19  ;;  %v2418_v59 = vld [vmem:[%s5482_s0 + $0x650] sm:$0xff]  ;;  %v2435_v34 = vld [vmem:[%s5482_s0 + $0x8d8] sm:$0xff] }
  0x53   :  { %v533_v3 = vmul.f32 %v2418_v59, %v3222_v11 }
  0x54   :  { %325 = vadd.xlane.f32.xlu1 %v3086_v37  ;;  %322 = vadd.xlane.f32.xlu0 %v3088_v38  ;;  %v2379_v37 = vld [vmem:[%s5482_s0 + $0x18] sm:$0xff]  ;;  %v495_v38 = vmul.f32 %v2380_v13, %v3222_v11  ;;  %v2404_v13 = vld [vmem:[%s5482_s0 + $0x420] sm:$0xff]  ;;  %v638_v61 = vadd.f32 %v532_v48, %v531_v44  ;;  %v2512_v48 = vld [vmem:[%s5482_s0 + $0x708] sm:$0xff] }
  0x55   :  { %v494_v14 = vmul.f32 %v2379_v37, %v3230_v19  ;;  %v2403_v37 = vld [vmem:[%s5482_s0 + $0x3d8] sm:$0xff]  ;;  %v2511_v44 = vld [vmem:[%s5482_s0 + $0x700] sm:$0xff] }
  0x56   :  { %v518_v16 = vmul.f32 %v2403_v37, %v3230_v19 }
  0x58   :  { %331 = vadd.xlane.f32.xlu1 %v3102_v47  ;;  %328 = vadd.xlane.f32.xlu0 %v3106_v50  ;;  %v496_v47 = vmul.f32 %v2381_v24, %v3230_v19  ;;  %v493_v50 = vmul.f32 %v2378_v30, %v3222_v11  ;;  %v2405_v24 = vld [vmem:[%s5482_s0 + $0x428] sm:$0xff]  ;;  %v2402_v30 = vld [vmem:[%s5482_s0 + $0x3d0] sm:$0xff] }
  0x59   :  { %v517_v15 = vmul.f32 %v2402_v30, %v3222_v11 }
  0x5a   :  { %v584_v21 = vadd.f32 %v496_v47, %v495_v38  ;;  %v581_v63 = vadd.f32 %v494_v14, %v493_v50  ;;  %v614_v38 = vadd.f32 %v516_v52, %v515_v46  ;;  %v519_v47 = vmul.f32 %v2404_v13, %v3222_v11 }
  0x5b   :  { %v520_v50 = vmul.f32 %v2405_v24, %v3230_v19  ;;  %v611_v14 = vadd.f32 %v514_v10, %v513_v58  ;;  %v539_v58 = vmul.f32 %v2424_v54, %v3222_v11  ;;  %v540_v10 = vmul.f32 %v2425_v4, %v3230_v19  ;;  %v2513_v4 = vld [vmem:[%s5482_s0 + $0x750] sm:$0xff] }
  0x5c   :  { %337 = vadd.xlane.f32.xlu1 %v3111_v56  ;;  %334 = vadd.xlane.f32.xlu0 %v3116_v62  ;;  %v2382_v56 = vld [vmem:[%s5482_s0 + $0xb0] sm:$0xff]  ;;  %v2383_v62 = vld [vmem:[%s5482_s0 + $0xb8] sm:$0xff] }
  0x5d   :  { %v497_v20 = vmul.f32 %v2382_v56, %v3222_v11  ;;  %v498_v12 = vmul.f32 %v2383_v62, %v3230_v19  ;;  %v2408_v56 = vld [vmem:[%s5482_s0 + $0x4c0] sm:$0xff]  ;;  %v2409_v62 = vld [vmem:[%s5482_s0 + $0x4c8] sm:$0xff] }
  0x5f   :  { %v587_v29 = vadd.f32 %v498_v12, %v497_v20  ;;  %v523_v20 = vmul.f32 %v2408_v56, %v3222_v11  ;;  %v620_v12 = vadd.f32 %v520_v50, %v519_v47  ;;  %v2429_v47 = vld [vmem:[%s5482_s0 + $0x7e8] sm:$0xff]  ;;  %v2426_v50 = vld [vmem:[%s5482_s0 + $0x790] sm:$0xff] }
  0x60   :  { %345 = vadd.xlane.f32.xlu1 %v3132_v8  ;;  %340 = vadd.xlane.f32.xlu0 %v3134_v9  ;;  %v2387_v8 = vld [vmem:[%s5482_s0 + $0x158] sm:$0xff]  ;;  %v503_v9 = vmul.f32 %v2388_v22, %v3222_v11  ;;  %v617_v22 = vadd.f32 %v518_v16, %v517_v15  ;;  %v652_v15 = vadd.f32 %v540_v10, %v539_v58 }
  0x61   :  { %v502_v31 = vmul.f32 %v2387_v8, %v3230_v19  ;;  %v2413_v8 = vld [vmem:[%s5482_s0 + $0x568] sm:$0xff]  ;;  %v544_v56 = vmul.f32 %v2429_v47, %v3230_v19  ;;  %v541_v18 = vmul.f32 %v2426_v50, %v3222_v11  ;;  %v2515_v47 = vld [vmem:[%s5482_s0 + $0x7a0] sm:$0xff] }
  0x62   :  { %v596_v36 = vadd.f32 %v504_v26, %v503_v9  ;;  %v2410_v9 = vld [vmem:[%s5482_s0 + $0x510] sm:$0xff]  ;;  %v2411_v26 = vld [vmem:[%s5482_s0 + $0x518] sm:$0xff] }
  0x63   :  { %v593_v42 = vadd.f32 %v502_v31, %v501_v27  ;;  %v525_v32 = vmul.f32 %v2410_v9, %v3222_v11  ;;  %v526_v33 = vmul.f32 %v2411_v26, %v3230_v19 }
  0x64   :  { %585 = vadd.xlane.f32.xlu1 %v584_v21  ;;  %582 = vadd.xlane.f32.xlu0 %v581_v63  ;;  %v524_v21 = vmul.f32 %v2409_v62, %v3230_v19  ;;  %v521_v63 = vmul.f32 %v2406_v17, %v3222_v11  ;;  %v2432_v62 = vld [vmem:[%s5482_s0 + $0x880] sm:$0xff] }
  0x65   :  { %v629_v49 = vadd.f32 %v526_v33, %v525_v32  ;;  %v2467_v32 = vld [vmem:[%s5482_s0 + $0x20] sm:$0xff]  ;;  %v2468_v33 = vld [vmem:[%s5482_s0 + $0x28] sm:$0xff] }
  0x66   :  { %v626_v27 = vadd.f32 %v524_v21, %v523_v20  ;;  %v623_v31 = vadd.f32 %v522_v23, %v521_v63  ;;  %v2433_v21 = vld [vmem:[%s5482_s0 + $0x888] sm:$0xff]  ;;  %v2430_v63 = vld [vmem:[%s5482_s0 + $0x830] sm:$0xff]  ;;  %v547_v23 = vmul.f32 %v2432_v62, %v3222_v11 }
  0x67   :  { %v545_v9 = vmul.f32 %v2430_v63, %v3222_v11 }
  0x68   :  { %591 = vadd.xlane.f32.xlu1 %v590_v28  ;;  %588 = vadd.xlane.f32.xlu0 %v587_v29  ;;  %v527_v28 = vmul.f32 %v2412_v25, %v3222_v11  ;;  %v528_v29 = vmul.f32 %v2413_v8, %v3230_v19  ;;  %v548_v8 = vmul.f32 %v2433_v21, %v3230_v19 }
  0x6a   :  { %v632_v43 = vadd.f32 %v528_v29, %v527_v28  ;;  %v664_v35 = vadd.f32 %v548_v8, %v547_v23  ;;  %v2518_v23 = vld [vmem:[%s5482_s0 + $0x7f8] sm:$0xff] }
  0x6c   :  { %597 = vadd.xlane.f32.xlu1 %v596_v36  ;;  %594 = vadd.xlane.f32.xlu0 %v593_v42  ;;  %v2414_v36 = vld [vmem:[%s5482_s0 + $0x5b0] sm:$0xff]  ;;  %v2421_v42 = vld [vmem:[%s5482_s0 + $0x6a8] sm:$0x7] }
  0x6d   :  { %v529_v51 = vmul.f32 %v2414_v36, %v3222_v11  ;;  %v536_v45 = vmul.f32 %v2421_v42, %v3230_v19 }
  0x6f   :  { %v635_v2 = vadd.f32 %v530_v55, %v529_v51  ;;  %v645_v52 = vsel %vm273_vm0, %v536_v45, 0.0 }
  0x70   :  { %603 = vadd.xlane.f32.xlu1 %v602_v41  ;;  %600 = vadd.xlane.f32.xlu0 %v599_v60  ;;  %v535_v41 = vmul.f32 %v2420_v40, %v3222_v11  ;;  %v2419_v60 = vld [vmem:[%s5482_s0 + $0x658] sm:$0xff] }
  0x71   :  { %v534_v53 = vmul.f32 %v2419_v60, %v3230_v19 }
  0x72   :  { %v644_v46 = vsel %vm273_vm0, %v535_v41, 0.0  ;;  %v2470_v41 = vld [vmem:[%s5482_s0 + $0x78] sm:$0xff] }
  0x73   :  { %v646_v24 = vadd.f32 %v645_v52, %v644_v46  ;;  %v641_v30 = vadd.f32 %v534_v53, %v533_v3 }
  0x74   :  { %609 = vadd.xlane.f32.xlu1 %v608_v7  ;;  %606 = vadd.xlane.f32.xlu0 %v605_v57  ;;  %v2422_v7 = vld [vmem:[%s5482_s0 + $0x6f0] sm:$0xff]  ;;  %v2423_v57 = vld [vmem:[%s5482_s0 + $0x6f8] sm:$0xff] }
  0x75   :  { %v537_v13 = vmul.f32 %v2422_v7, %v3222_v11  ;;  %v538_v37 = vmul.f32 %v2423_v57, %v3230_v19  ;;  %v2514_v7 = vld [vmem:[%s5482_s0 + $0x758] sm:$0xff] }
  0x77   :  { %v649_v17 = vadd.f32 %v538_v37, %v537_v13  ;;  %v2473_v37 = vld [vmem:[%s5482_s0 + $0x110] sm:$0xff] }
  0x78   :  { %615 = vadd.xlane.f32.xlu1 %v614_v38  ;;  %612 = vadd.xlane.f32.xlu0 %v611_v14  ;;  %v2428_v38 = vld [vmem:[%s5482_s0 + $0x7e0] sm:$0xff]  ;;  %v2427_v14 = vld [vmem:[%s5482_s0 + $0x798] sm:$0xff] }
  0x79   :  { %v543_v16 = vmul.f32 %v2428_v38, %v3222_v11  ;;  %v542_v20 = vmul.f32 %v2427_v14, %v3230_v19  ;;  %v2474_v38 = vld [vmem:[%s5482_s0 + $0x118] sm:$0xff] }
  0x7b   :  { %v658_v25 = vadd.f32 %v544_v56, %v543_v16  ;;  %v2644_v16 = vld [vmem:[%s5483_s1 + $0x6] sm:$0x3] }
  0x7c   :  { %621 = vadd.xlane.f32.xlu1 %v620_v12  ;;  %618 = vadd.xlane.f32.xlu0 %v617_v22  ;;  %v2431_v12 = vld [vmem:[%s5482_s0 + $0x838] sm:$0xff]  ;;  %v2555_v22 = vld [vmem:[%s5483_s1 + $0x4] sm:$0x3]  ;;  %v3548_v63 = vrot.slane %v2644_v16, %v2806_v5 }
  0x7d   :  { %v546_v26 = vmul.f32 %v2431_v12, %v3230_v19  ;;  %v3463_v28 = vrot.slane %v2555_v22, %v2806_v5  ;;  %v3466_v29 = vrot.slane %v2555_v22, %v2809_v6  ;;  %v3551_v12 = vrot.slane %v2644_v16, %v2809_v6  ;;  %v2517_v22 = vld [vmem:[%s5482_s0 + $0x7f0] sm:$0xff]  ;;  %v2520_v16 = vld [vmem:[%s5482_s0 + $0x848] sm:$0xff] }
  0x7f   :  { %v661_v36 = vadd.f32 %v546_v26, %v545_v9  ;;  %v863_v40 = vmul.f32 %v2467_v32, %v3463_v28  ;;  %v864_v42 = vmul.f32 %v2468_v33, %v3466_v29  ;;  %v907_v45 = vmul.f32 %v2511_v44, %v3463_v28  ;;  %v2556_v9 = vld [vmem:[%s5482_s0 + $0x30] sm:$0xff]  ;;  %v2557_v26 = vld [vmem:[%s5482_s0 + $0x38] sm:$0xff]  ;;  %v2559_v44 = vld [vmem:[%s5482_s0 + $0x88] sm:$0xff] }
  0x80   :  { %627 = vadd.xlane.f32.xlu1 %v626_v27  ;;  %624 = vadd.xlane.f32.xlu0 %v623_v31  ;;  %v655_v27 = vadd.f32 %v542_v20, %v541_v18  ;;  %v2434_v31 = vld [vmem:[%s5482_s0 + $0x8d0] sm:$0xff]  ;;  %v908_v59 = vmul.f32 %v2512_v48, %v3466_v29  ;;  %v866_v54 = vmul.f32 %v2470_v41, %v3466_v29 }
  0x81   :  { %v549_v39 = vmul.f32 %v2434_v31, %v3222_v11  ;;  %v951_v3 = vadd.f32 %v864_v42, %v863_v40  ;;  %v909_v10 = vmul.f32 %v2513_v4, %v3463_v28  ;;  %v910_v13 = vmul.f32 %v2514_v7, %v3466_v29  ;;  %v2603_v4 = vld [vmem:[%s5482_s0 + $0x768] sm:$0xff] }
  0x82   :  { %v870_v18 = vmul.f32 %v2474_v38, %v3466_v29  ;;  %v911_v20 = vmul.f32 %v2515_v47, %v3463_v28  ;;  %v913_v31 = vmul.f32 %v2517_v22, %v3463_v28  ;;  %v914_v32 = vmul.f32 %v2518_v23, %v3466_v29  ;;  %v2436_v22 = vld [vmem:[%s5482_s0 + $0x920] sm:$0xff]  ;;  %v2437_v23 = vld [vmem:[%s5482_s0 + $0x928] sm:$0xff] }
  0x83   :  { %v1022_v62 = vadd.f32 %v910_v13, %v909_v10 }
  0x84   :  { %633 = vadd.xlane.f32.xlu1 %v632_v43  ;;  %630 = vadd.xlane.f32.xlu0 %v629_v49  ;;  %v550_v43 = vmul.f32 %v2435_v34, %v3230_v19  ;;  %v2469_v49 = vld [vmem:[%s5482_s0 + $0x70] sm:$0xff]  ;;  %v1233_v34 = vmul.f32 %v2556_v9, %v3548_v63  ;;  %v1028_v48 = vadd.f32 %v914_v32, %v913_v31  ;;  %v2605_v31 = vld [vmem:[%s5482_s0 + $0x7b8] sm:$0xff] }
  0x85   :  { %v865_v60 = vmul.f32 %v2469_v49, %v3463_v28 }
  0x86   :  { %v667_v53 = vadd.f32 %v550_v43, %v549_v39  ;;  %v2601_v39 = vld [vmem:[%s5482_s0 + $0x718] sm:$0xff]  ;;  %v2558_v43 = vld [vmem:[%s5482_s0 + $0x80] sm:$0xff] }
  0x87   :  { %v1278_v41 = vmul.f32 %v2601_v39, %v3551_v12  ;;  %v1282_v39 = vmul.f32 %v2605_v31, %v3551_v12  ;;  %v2646_v31 = vld [vmem:[%s5482_s0 + $0x48] sm:$0xff] }
  0x88   :  { %639 = vadd.xlane.f32.xlu1 %v638_v61  ;;  %636 = vadd.xlane.f32.xlu0 %v635_v2  ;;  %v2471_v61 = vld [vmem:[%s5482_s0 + $0xc0] sm:$0xff]  ;;  %v2472_v2 = vld [vmem:[%s5482_s0 + $0xc8] sm:$0xff] }
  0x89   :  { %v867_v57 = vmul.f32 %v2471_v61, %v3463_v28  ;;  %v868_v58 = vmul.f32 %v2472_v2, %v3466_v29  ;;  %v2475_v61 = vld [vmem:[%s5482_s0 + $0x160] sm:$0xff]  ;;  %v2476_v2 = vld [vmem:[%s5482_s0 + $0x168] sm:$0xff] }
  0x8a   :  { %v871_v7 = vmul.f32 %v2475_v61, %v3463_v28 }
  0x8b   :  { %v957_v56 = vadd.f32 %v868_v58, %v867_v57  ;;  %v872_v57 = vmul.f32 %v2476_v2, %v3466_v29  ;;  %v2606_v2 = vld [vmem:[%s5482_s0 + $0x800] sm:$0xff] }
  0x8c   :  { %647 = vadd.xlane.f32.xlu1 %v646_v24  ;;  %642 = vadd.xlane.f32.xlu0 %v641_v30  ;;  %v1019_v24 = vadd.f32 %v908_v59, %v907_v45  ;;  %v954_v30 = vadd.f32 %v866_v54, %v865_v60  ;;  %v1235_v59 = vmul.f32 %v2558_v43, %v3548_v63  ;;  %v2521_v43 = vld [vmem:[%s5482_s0 + $0x890] sm:$0xff] }
  0x8d   :  { %v1236_v60 = vmul.f32 %v2559_v44, %v3551_v12  ;;  %v2522_v44 = vld [vmem:[%s5482_s0 + $0x898] sm:$0xff] }
  0x8e   :  { %v918_v61 = vmul.f32 %v2522_v44, %v3466_v29  ;;  %v2689_v44 = vld [vmem:[%s5482_s0 + $0x720] sm:$0xff] }
  0x8f   :  { %v1324_v13 = vadd.f32 %v1236_v60, %v1235_v59  ;;  %v917_v60 = vmul.f32 %v2521_v43, %v3463_v28  ;;  %v2692_v43 = vld [vmem:[%s5482_s0 + $0x778] sm:$0xff] }
  0x90   :  { %653 = vadd.xlane.f32.xlu1 %v652_v15  ;;  %650 = vadd.xlane.f32.xlu0 %v649_v17  ;;  %v2516_v15 = vld [vmem:[%s5482_s0 + $0x7a8] sm:$0xff]  ;;  %v869_v17 = vmul.f32 %v2473_v37, %v3463_v28  ;;  %v2561_v37 = vld [vmem:[%s5482_s0 + $0xd8] sm:$0xff] }
  0x91   :  { %v912_v21 = vmul.f32 %v2516_v15, %v3466_v29  ;;  %v2519_v15 = vld [vmem:[%s5482_s0 + $0x840] sm:$0xff] }
  0x93   :  { %v1025_v33 = vadd.f32 %v912_v21, %v911_v20  ;;  %v915_v20 = vmul.f32 %v2519_v15, %v3463_v28  ;;  %v916_v21 = vmul.f32 %v2520_v16, %v3466_v29 }
  0x94   :  { %659 = vadd.xlane.f32.xlu1 %v658_v25  ;;  %656 = vadd.xlane.f32.xlu0 %v655_v27  ;;  %v960_v27 = vadd.f32 %v870_v18, %v869_v17  ;;  %v1238_v17 = vmul.f32 %v2561_v37, %v3551_v12  ;;  %v1283_v37 = vmul.f32 %v2606_v2, %v3548_v63 }
  0x95   :  { %v3493_v51 = vpop.xlane.xlu1 %217  ;;  %v3495_v55 = vpop.xlane.xlu0 %211 }
  0x98   :  { %665 = vadd.xlane.f32.xlu1 %v664_v35  ;;  %662 = vadd.xlane.f32.xlu0 %v661_v36  ;;  %v1234_v35 = vmul.f32 %v2557_v26, %v3551_v12  ;;  %v2600_v36 = vld [vmem:[%s5482_s0 + $0x710] sm:$0xff] }
  0x99   :  { %v3516_v46 = vpop.xlane.xlu1 %220  ;;  %v3518_v52 = vpop.xlane.xlu0 %214  ;;  %v1277_v49 = vmul.f32 %v2600_v36, %v3548_v63 }
  0x9a   :  { %v1321_v45 = vadd.f32 %v1234_v35, %v1233_v34  ;;  %v552_v34 = vmul.f32 %v2437_v23, %v3230_v19  ;;  %v1031_v35 = vadd.f32 %v916_v21, %v915_v20  ;;  %v2647_v20 = vld [vmem:[%s5482_s0 + $0x90] sm:$0xff] }
  0x9b   :  { %v1389_v10 = vadd.f32 %v1278_v41, %v1277_v49  ;;  %v2477_v41 = vld [vmem:[%s5482_s0 + $0x1b0] sm:$0xff] }
  0x9c   :  { %952 = vadd.xlane.f32.xlu1 %v951_v3  ;;  %668 = vadd.xlane.f32.xlu0 %v667_v53  ;;  %v2602_v3 = vld [vmem:[%s5482_s0 + $0x760] sm:$0xff] }
  0x9d   :  { %v3533_v50 = vpop.xlane.xlu1 %226  ;;  %v3535_v14 = vpop.xlane.xlu0 %223  ;;  %v1279_v58 = vmul.f32 %v2602_v3, %v3548_v63  ;;  %v2607_v3 = vld [vmem:[%s5482_s0 + $0x808] sm:$0xff] }
  0x9e   :  { %v1284_v15 = vmul.f32 %v2607_v3, %v3551_v12 }
  0xa0   :  { %1020 = vadd.xlane.f32.xlu1 %v1019_v24  ;;  %955 = vadd.xlane.f32.xlu0 %v954_v30  ;;  %v1280_v24 = vmul.f32 %v2603_v4, %v3551_v12  ;;  %v2560_v30 = vld [vmem:[%s5482_s0 + $0xd0] sm:$0xff] }
  0xa1   :  { %v3559_v25 = vpop.xlane.xlu1 %232  ;;  %v3561_v8 = vpop.xlane.xlu0 %229 }
  0xa2   :  { %v1392_v18 = vadd.f32 %v1280_v24, %v1279_v58  ;;  %v2562_v58 = vld [vmem:[%s5482_s0 + $0x120] sm:$0xff] }
  0xa3   :  { %v1239_v16 = vmul.f32 %v2562_v58, %v3548_v63  ;;  %v2480_v58 = vld [vmem:[%s5482_s0 + $0x208] sm:$0xff] }
  0xa4   :  { %958 = vadd.xlane.f32.xlu1 %v957_v56  ;;  %1023 = vadd.xlane.f32.xlu0 %v1022_v62  ;;  %v963_v56 = vadd.f32 %v872_v57, %v871_v7  ;;  %v1237_v62 = vmul.f32 %v2560_v30, %v3548_v63  ;;  %v873_v7 = vmul.f32 %v2477_v41, %v3463_v28 }
  0xa5   :  { %v3579_v40 = vpop.xlane.xlu1 %238  ;;  %v3581_v42 = vpop.xlane.xlu0 %235 }
  0xa6   :  { %5489 = vst [vmem:[#allocation6_spill] sm:$0xff] %v3579_v40  ;;  %v1327_v32 = vadd.f32 %v1238_v17, %v1237_v62  ;;  %v1034_v17 = vadd.f32 %v918_v61, %v917_v60 }
  0xa8   :  { %961 = vadd.xlane.f32.xlu1 %v960_v27  ;;  %1026 = vadd.xlane.f32.xlu0 %v1025_v33  ;;  %v2604_v27 = vld [vmem:[%s5482_s0 + $0x7b0] sm:$0xff]  ;;  %v551_v33 = vmul.f32 %v2436_v22, %v3222_v11 }
  0xa9   :  { %v3602_v53 = vpop.xlane.xlu1 %244  ;;  %v3604_v54 = vpop.xlane.xlu0 %241  ;;  %v1281_v36 = vmul.f32 %v2604_v27, %v3548_v63  ;;  %v2645_v27 = vld [vmem:[%s5482_s0 + $0x40] sm:$0xff] }
  0xaa   :  { %5490 = vst [vmem:[#allocation7_spill] sm:$0xff] %v3602_v53  ;;  %5491 = vst [vmem:[#allocation8_spill] sm:$0xff] %v3604_v54  ;;  %v670_v59 = vadd.f32 %v552_v34, %v551_v33  ;;  %v2487_v53 = vld [vmem:[%s5482_s0 + $0x340] sm:$0xff] }
  0xab   :  { %v1395_v4 = vadd.f32 %v1282_v39, %v1281_v36  ;;  %v2691_v39 = vld [vmem:[%s5482_s0 + $0x770] sm:$0xff] }
  0xac   :  { %1322 = vadd.xlane.f32.xlu1 %v1321_v45  ;;  %1029 = vadd.xlane.f32.xlu0 %v1028_v48  ;;  %v2478_v45 = vld [vmem:[%s5482_s0 + $0x1b8] sm:$0xff] }
  0xad   :  { %v3619_v38 = vpop.xlane.xlu1 %250  ;;  %v3621_v47 = vpop.xlane.xlu0 %247  ;;  %v874_v57 = vmul.f32 %v2478_v45, %v3466_v29 }
  0xae   :  { %5492 = vst [vmem:[#allocation9_spill] sm:$0xff] %v3619_v38  ;;  %5493 = vst [vmem:[#allocation10_spill] sm:$0xff] %v3621_v47  ;;  %v2655_v47 = vld [vmem:[%s5482_s0 + $0x1d0] sm:$0xff] }
  0xb0   :  { %1390 = vadd.xlane.f32.xlu1 %v1389_v10  ;;  %1325 = vadd.xlane.f32.xlu0 %v1324_v13  ;;  %v2563_v10 = vld [vmem:[%s5482_s0 + $0x128] sm:$0xff] }
  0xb1   :  { %v3639_v9 = vpop.xlane.xlu1 %256  ;;  %v3641_v26 = vpop.xlane.xlu0 %253  ;;  %v2733_v13 = vld [vmem:[%s5483_s1 + $0x8] sm:$0x3] }
  0xb2   :  { %5494 = vst [vmem:[#allocation11_spill] sm:$0xff] %v3639_v9  ;;  %5495 = vst [vmem:[#allocation12_spill] sm:$0xff] %v3641_v26  ;;  %v3697_v62 = vrot.slane %v2733_v13, %v2806_v5  ;;  %v3703_v21 = vrot.slane %v2733_v13, %v2809_v6  ;;  %v2648_v5 = vld [vmem:[%s5482_s0 + $0x98] sm:$0xff]  ;;  %v2483_v9 = vld [vmem:[%s5482_s0 + $0x2a0] sm:$0xff] }
  0xb4   :  { %964 = vadd.xlane.f32.xlu1 %v963_v56  ;;  %1393 = vadd.xlane.f32.xlu0 %v1392_v18  ;;  %v1240_v56 = vmul.f32 %v2563_v10, %v3551_v12  ;;  %v966_v18 = vadd.f32 %v874_v57, %v873_v7  ;;  %v1605_v6 = vmul.f32 %v2647_v20, %v3697_v62  ;;  %v2479_v57 = vld [vmem:[%s5482_s0 + $0x200] sm:$0xff]  ;;  %v2438_v10 = vld [vmem:[%s5482_s0 + $0x970] sm:$0xff] }
  0xb5   :  { %v3659_v48 = vpop.xlane.xlu1 %262  ;;  %v3661_v49 = vpop.xlane.xlu0 %259  ;;  %v1606_v34 = vmul.f32 %v2648_v5, %v3703_v21  ;;  %v1604_v36 = vmul.f32 %v2646_v31, %v3703_v21  ;;  %v1649_v60 = vmul.f32 %v2691_v39, %v3697_v62  ;;  %v1650_v61 = vmul.f32 %v2692_v43, %v3703_v21  ;;  %v2565_v31 = vld [vmem:[%s5482_s0 + $0x178] sm:$0xff] }
  0xb6   :  { %5496 = vst [vmem:[#allocation13_spill] sm:$0xff] %v3659_v48  ;;  %5497 = vst [vmem:[#allocation14_spill] sm:$0xff] %v3661_v49  ;;  %v1330_v33 = vadd.f32 %v1240_v56, %v1239_v16  ;;  %v1647_v2 = vmul.f32 %v2689_v44, %v3697_v62  ;;  %v875_v16 = vmul.f32 %v2479_v57, %v3463_v28 }
  0xb7   :  { %v1694_v3 = vadd.f32 %v1606_v34, %v1605_v6  ;;  %v876_v56 = vmul.f32 %v2480_v58, %v3466_v29  ;;  %v2523_v6 = vld [vmem:[%s5482_s0 + $0x8e0] sm:$0xff]  ;;  %v2524_v34 = vld [vmem:[%s5482_s0 + $0x8e8] sm:$0xff]  ;;  %v1242_v39 = vmul.f32 %v2565_v31, %v3551_v12 }
  0xb8   :  { %1328 = vadd.xlane.f32.xlu1 %v1327_v32  ;;  %1032 = vadd.xlane.f32.xlu0 %v1031_v35  ;;  %v1398_v32 = vadd.f32 %v1284_v15, %v1283_v37  ;;  %v1603_v35 = vmul.f32 %v2645_v27, %v3697_v62  ;;  %v2439_v15 = vld [vmem:[%s5482_s0 + $0x978] sm:$0xff]  ;;  %v2564_v27 = vld [vmem:[%s5482_s0 + $0x170] sm:$0xff]  ;;  %v919_v44 = vmul.f32 %v2523_v6, %v3463_v28  ;;  %v2694_v31 = vld [vmem:[%s5482_s0 + $0x7c8] sm:$0xff] }
  0xb9   :  { %v3688_v24 = vpop.xlane.xlu1 %268  ;;  %v3690_v30 = vpop.xlane.xlu0 %265  ;;  %v554_v5 = vmul.f32 %v2439_v15, %v3230_v19 }
  0xba   :  { %5498 = vst [vmem:[#allocation15_spill] sm:$0xff] %v3688_v24  ;;  %5499 = vst [vmem:[#allocation16_spill] sm:$0xff] %v3690_v30  ;;  %v2571_v24 = vld [vmem:[%s5482_s0 + $0x268] sm:$0xff]  ;;  %v2447_v30 = vld [vmem:[%s5482_s0 + $0xab8] sm:$0xff] }
  0xbc   :  { %671 = vadd.xlane.f32.xlu1 %v670_v59  ;;  %1396 = vadd.xlane.f32.xlu0 %v1395_v4  ;;  %v2690_v59 = vld [vmem:[%s5482_s0 + $0x728] sm:$0xff]  ;;  %v1691_v4 = vadd.f32 %v1604_v36, %v1603_v35  ;;  %v969_v35 = vadd.f32 %v876_v56, %v875_v16  ;;  %v1241_v36 = vmul.f32 %v2564_v27, %v3548_v63 }
  0xbd   :  { %v3705_v22 = vpop.xlane.xlu1 %277  ;;  %v3707_v23 = vpop.xlane.xlu0 %271  ;;  %v1648_v7 = vmul.f32 %v2690_v59, %v3703_v21  ;;  %v920_v59 = vmul.f32 %v2524_v34, %v3466_v29 }
  0xbe   :  { %5500 = vst [vmem:[#allocation17_spill] sm:$0xff] %v3705_v22  ;;  %5501 = vst [vmem:[#allocation18_spill] sm:$0xff] %v3707_v23  ;;  %v1333_v57 = vadd.f32 %v1242_v39, %v1241_v36  ;;  %v2569_v22 = vld [vmem:[%s5482_s0 + $0x218] sm:$0xff]  ;;  %v2485_v23 = vld [vmem:[%s5482_s0 + $0x2f0] sm:$0xff] }
  0xbf   :  { %v1759_v20 = vadd.f32 %v1648_v7, %v1647_v2  ;;  %v2609_v7 = vld [vmem:[%s5482_s0 + $0x858] sm:$0xff]  ;;  %v1037_v15 = vadd.f32 %v920_v59, %v919_v44  ;;  %v2525_v44 = vld [vmem:[%s5482_s0 + $0x930] sm:$0xff] }
  0xc0   :  { %1035 = vadd.xlane.f32.xlu1 %v1034_v17  ;;  %967 = vadd.xlane.f32.xlu0 %v966_v18  ;;  %v553_v17 = vmul.f32 %v2438_v10, %v3222_v11  ;;  %v1762_v18 = vadd.f32 %v1650_v61, %v1649_v60  ;;  %v2649_v60 = vld [vmem:[%s5482_s0 + $0xe0] sm:$0xff]  ;;  %v2650_v61 = vld [vmem:[%s5482_s0 + $0xe8] sm:$0xff]  ;;  %v1286_v56 = vmul.f32 %v2609_v7, %v3551_v12  ;;  %v2526_v59 = vld [vmem:[%s5482_s0 + $0x938] sm:$0xff] }
  0xc1   :  { %v3731_v41 = vpop.xlane.xlu1 %283  ;;  %v3733_v45 = vpop.xlane.xlu0 %280  ;;  %v1607_v58 = vmul.f32 %v2649_v60, %v3697_v62  ;;  %v1608_v10 = vmul.f32 %v2650_v61, %v3703_v21  ;;  %v2482_v7 = vld [vmem:[%s5482_s0 + $0x258] sm:$0xff] }
  0xc2   :  { %v673_v43 = vadd.f32 %v554_v5, %v553_v17  ;;  %v2440_v17 = vld [vmem:[%s5482_s0 + $0x9c0] sm:$0xff] }
  0xc3   :  { %v555_v6 = vmul.f32 %v2440_v17, %v3222_v11  ;;  %v1697_v36 = vadd.f32 %v1608_v10, %v1607_v58  ;;  %v921_v58 = vmul.f32 %v2525_v44, %v3463_v28  ;;  %v922_v10 = vmul.f32 %v2526_v59, %v3466_v29 }
  0xc4   :  { %1399 = vadd.xlane.f32.xlu1 %v1398_v32  ;;  %1331 = vadd.xlane.f32.xlu0 %v1330_v33  ;;  %v878_v17 = vmul.f32 %v2482_v7, %v3466_v29 }
  0xc5   :  { %v3751_v13 = vpop.xlane.xlu1 %289  ;;  %v3753_v37 = vpop.xlane.xlu0 %286  ;;  %v1040_v44 = vadd.f32 %v922_v10, %v921_v58 }
  0xc8   :  { %1695 = vadd.xlane.f32.xlu1 %v1694_v3  ;;  %1692 = vadd.xlane.f32.xlu0 %v1691_v4  ;;  %v2608_v4 = vld [vmem:[%s5482_s0 + $0x850] sm:$0xff] }
  0xc9   :  { %v3768_v32 = vpop.xlane.xlu1 %295  ;;  %v3770_v33 = vpop.xlane.xlu0 %292  ;;  %v1285_v16 = vmul.f32 %v2608_v4, %v3548_v63  ;;  %v2481_v4 = vld [vmem:[%s5482_s0 + $0x250] sm:$0xff] }
  0xcb   :  { %v1401_v39 = vadd.f32 %v1286_v56, %v1285_v16  ;;  %v877_v56 = vmul.f32 %v2481_v4, %v3463_v28  ;;  %v2695_v4 = vld [vmem:[%s5482_s0 + $0x810] sm:$0xff] }
  0xcc   :  { %1763 = vadd.xlane.f32.xlu1 %v1762_v18  ;;  %1760 = vadd.xlane.f32.xlu0 %v1759_v20  ;;  %v2441_v18 = vld [vmem:[%s5482_s0 + $0x9c8] sm:$0xff]  ;;  %v2693_v20 = vld [vmem:[%s5482_s0 + $0x7c0] sm:$0xff] }
  0xcd   :  { %v3788_v2 = vpop.xlane.xlu1 %301  ;;  %v3790_v3 = vpop.xlane.xlu0 %298  ;;  %v556_v34 = vmul.f32 %v2441_v18, %v3230_v19  ;;  %v2611_v18 = vld [vmem:[%s5482_s0 + $0x8a8] sm:$0xff]  ;;  %v972_v59 = vadd.f32 %v878_v17, %v877_v56  ;;  %v2454_v56 = vld [vmem:[%s5482_s0 + $0xbf0] sm:$0xff] }
  0xd0   :  { %970 = vadd.xlane.f32.xlu1 %v969_v35  ;;  %674 = vadd.xlane.f32.xlu0 %v673_v43  ;;  %v1651_v35 = vmul.f32 %v2693_v20, %v3697_v62  ;;  %v1652_v43 = vmul.f32 %v2694_v31, %v3703_v21  ;;  %v2566_v20 = vld [vmem:[%s5482_s0 + $0x1c0] sm:$0xff]  ;;  %v2567_v31 = vld [vmem:[%s5482_s0 + $0x1c8] sm:$0xff] }
  0xd1   :  { %v3811_v5 = vpop.xlane.xlu1 %307  ;;  %v3813_v27 = vpop.xlane.xlu0 %304 }
  0xd2   :  { %5502 = vst [vmem:[#allocation19_spill] sm:$0xff] %v3811_v5  ;;  %v1765_v16 = vadd.f32 %v1652_v43, %v1651_v35  ;;  %v1244_v43 = vmul.f32 %v2567_v31, %v3551_v12 }
  0xd4   :  { %1334 = vadd.xlane.f32.xlu1 %v1333_v57  ;;  %1038 = vadd.xlane.f32.xlu0 %v1037_v15  ;;  %v676_v57 = vadd.f32 %v556_v34, %v555_v6  ;;  %v2610_v15 = vld [vmem:[%s5482_s0 + $0x8a0] sm:$0xff] }
  0xd5   :  { %v3828_v60 = vpop.xlane.xlu1 %313  ;;  %v3830_v61 = vpop.xlane.xlu0 %310  ;;  %v1287_v35 = vmul.f32 %v2610_v15, %v3548_v63  ;;  %v2696_v15 = vld [vmem:[%s5482_s0 + $0x818] sm:$0xff] }
  0xd6   :  { %5503 = vst [vmem:[#allocation20_spill] sm:$0xff] %v3828_v60  ;;  %5504 = vst [vmem:[#allocation21_spill] sm:$0xff] %v3830_v61  ;;  %v1654_v17 = vmul.f32 %v2696_v15, %v3703_v21 }
  0xd8   :  { %1698 = vadd.xlane.f32.xlu1 %v1697_v36  ;;  %1402 = vadd.xlane.f32.xlu0 %v1401_v39  ;;  %v1288_v36 = vmul.f32 %v2611_v18, %v3551_v12  ;;  %v1243_v39 = vmul.f32 %v2566_v20, %v3548_v63  ;;  %v2651_v18 = vld [vmem:[%s5482_s0 + $0x130] sm:$0xff] }
  0xd9   :  { %v3854_v6 = vpop.xlane.xlu1 %319  ;;  %v3856_v34 = vpop.xlane.xlu0 %316  ;;  %v1609_v20 = vmul.f32 %v2651_v18, %v3697_v62 }
  0xda   :  { %5505 = vst [vmem:[#allocation22_spill] sm:$0xff] %v3854_v6  ;;  %5506 = vst [vmem:[#allocation23_spill] sm:$0xff] %v3856_v34  ;;  %v1404_v58 = vadd.f32 %v1288_v36, %v1287_v35  ;;  %v1336_v10 = vadd.f32 %v1244_v43, %v1243_v39  ;;  %v2442_v35 = vld [vmem:[%s5482_s0 + $0xa10] sm:$0xff]  ;;  %v2443_v36 = vld [vmem:[%s5482_s0 + $0xa18] sm:$0xff] }
  0xdb   :  { %v558_v15 = vmul.f32 %v2443_v36, %v3230_v19  ;;  %v2653_v6 = vld [vmem:[%s5482_s0 + $0x180] sm:$0xff] }
  0xdc   :  { %677 = vadd.xlane.f32.xlu1 %v676_v57  ;;  %1766 = vadd.xlane.f32.xlu0 %v1765_v16  ;;  %v2652_v57 = vld [vmem:[%s5482_s0 + $0x138] sm:$0xff]  ;;  %v1653_v16 = vmul.f32 %v2695_v4, %v3697_v62  ;;  %v557_v4 = vmul.f32 %v2442_v35, %v3222_v11 }
  0xdd   :  { %v3865_v7 = vpop.xlane.xlu1 %325  ;;  %v3867_v0 = vpop.xlane.xlu0 %322  ;;  %v1610_v31 = vmul.f32 %v2652_v57, %v3703_v21 }
  0xde   :  { %5507 = vst [vmem:[#allocation24_spill] sm:$0xff] %v3865_v7  ;;  %5508 = vst [vmem:[#allocation25_spill] sm:$0xff] %v3867_v0  ;;  %v2455_v7 = vld [vmem:[%s5482_s0 + $0xbf8] sm:$0xff]  ;;  %v1768_v18 = vadd.f32 %v1654_v17, %v1653_v16  ;;  %v679_v16 = vadd.f32 %v558_v15, %v557_v4  ;;  %v879_v17 = vmul.f32 %v2483_v9, %v3463_v28  ;;  %v2527_v9 = vld [vmem:[%s5482_s0 + $0x980] sm:$0xff] }
  0xdf   :  { %v1700_v57 = vadd.f32 %v1610_v31, %v1609_v20  ;;  %v2568_v20 = vld [vmem:[%s5482_s0 + $0x210] sm:$0xff] }
  0xe0   :  { %1041 = vadd.xlane.f32.xlu1 %v1040_v44  ;;  %973 = vadd.xlane.f32.xlu0 %v972_v59  ;;  %v569_v44 = vmul.f32 %v2454_v56, %v3222_v11  ;;  %v570_v59 = vmul.f32 %v2455_v7, %v3230_v19  ;;  %v2484_v7 = vld [vmem:[%s5482_s0 + $0x2a8] sm:$0xff]  ;;  %v2456_v56 = vld [vmem:[%s5482_s0 + $0xc40] sm:$0xff]  ;;  %v1245_v15 = vmul.f32 %v2568_v20, %v3548_v63  ;;  %v2612_v20 = vld [vmem:[%s5482_s0 + $0x8f0] sm:$0xff] }
  0xe1   :  { %v3894_v39 = vpop.xlane.xlu1 %331  ;;  %v3896_v43 = vpop.xlane.xlu0 %328  ;;  %v880_v31 = vmul.f32 %v2484_v7, %v3466_v29  ;;  %v571_v35 = vmul.f32 %v2456_v56, %v3222_v11 }
  0xe2   :  { %5509 = vst [vmem:[#allocation26_spill] sm:$0xff] %v3894_v39  ;;  %5510 = vst [vmem:[#allocation27_spill] sm:$0xff] %v3896_v43  ;;  %v2657_v43 = vld [vmem:[%s5482_s0 + $0x220] sm:$0xff] }
  0xe3   :  { %v975_v56 = vadd.f32 %v880_v31, %v879_v17  ;;  %v1611_v31 = vmul.f32 %v2653_v6, %v3697_v62  ;;  %v2697_v6 = vld [vmem:[%s5482_s0 + $0x860] sm:$0xff] }
  0xe4   :  { %1405 = vadd.xlane.f32.xlu1 %v1404_v58  ;;  %1337 = vadd.xlane.f32.xlu0 %v1336_v10  ;;  %v2457_v58 = vld [vmem:[%s5482_s0 + $0xc48] sm:$0xff]  ;;  %v697_v10 = vadd.f32 %v570_v59, %v569_v44 }
  0xe5   :  { %v3905_v0 = vpop.xlane.xlu1 %337  ;;  %v3907_v26 = vpop.xlane.xlu0 %334  ;;  %v572_v36 = vmul.f32 %v2457_v58, %v3230_v19  ;;  %v2528_v44 = vld [vmem:[%s5482_s0 + $0x988] sm:$0xff] }
  0xe6   :  { %5511 = vst [vmem:[#allocation28_spill] sm:$0xff] %v3905_v0  ;;  %5512 = vst [vmem:[#allocation29_spill] sm:$0xff] %v3907_v26  ;;  %v924_v7 = vmul.f32 %v2528_v44, %v3466_v29 }
  0xe7   :  { %v700_v58 = vadd.f32 %v572_v36, %v571_v35  ;;  %v2444_v35 = vld [vmem:[%s5482_s0 + $0xa60] sm:$0xff] }
  0xe8   :  { %1769 = vadd.xlane.f32.xlu1 %v1768_v18  ;;  %1701 = vadd.xlane.f32.xlu0 %v1700_v57  ;;  %v1246_v18 = vmul.f32 %v2569_v22, %v3551_v12  ;;  %v923_v57 = vmul.f32 %v2527_v9, %v3463_v28  ;;  %v2654_v22 = vld [vmem:[%s5482_s0 + $0x188] sm:$0xff]  ;;  %v1289_v9 = vmul.f32 %v2612_v20, %v3548_v63 }
  0xe9   :  { %v3934_v59 = vpop.xlane.xlu1 %345  ;;  %v3936_v4 = vpop.xlane.xlu0 %340  ;;  %v1612_v36 = vmul.f32 %v2654_v22, %v3703_v21 }
  0xea   :  { %5513 = vst [vmem:[#allocation30_spill] sm:$0xff] %v3934_v59  ;;  %5514 = vst [vmem:[#allocation31_spill] sm:$0xff] %v3936_v4  ;;  %v1043_v17 = vadd.f32 %v924_v7, %v923_v57  ;;  %v2445_v4 = vld [vmem:[%s5482_s0 + $0xa68] sm:$0xff]  ;;  %v559_v7 = vmul.f32 %v2444_v35, %v3222_v11  ;;  %v2458_v35 = vld [vmem:[%s5482_s0 + $0xc90] sm:$0xff] }
  0xeb   :  { %v1703_v20 = vadd.f32 %v1612_v36, %v1611_v31  ;;  %v881_v36 = vmul.f32 %v2485_v23, %v3463_v28  ;;  %v2529_v23 = vld [vmem:[%s5482_s0 + $0x9d0] sm:$0xff] }
  0xec   :  { %698 = vadd.xlane.f32.xlu1 %v697_v10  ;;  %680 = vadd.xlane.f32.xlu0 %v679_v16  ;;  %v2613_v10 = vld [vmem:[%s5482_s0 + $0x8f8] sm:$0xff]  ;;  %v1339_v16 = vadd.f32 %v1246_v18, %v1245_v15  ;;  %v2698_v15 = vld [vmem:[%s5482_s0 + $0x868] sm:$0xff] }
  0xed   :  { %v3945_v38 = vpop.xlane.xlu1 %585  ;;  %v3947_v59 = vpop.xlane.xlu0 %582  ;;  %v1290_v44 = vmul.f32 %v2613_v10, %v3551_v12  ;;  %v1656_v22 = vmul.f32 %v2698_v15, %v3703_v21 }
  0xef   :  { %v1407_v10 = vadd.f32 %v1290_v44, %v1289_v9  ;;  %v2570_v9 = vld [vmem:[%s5482_s0 + $0x260] sm:$0xff] }
  0xf0   :  { %976 = vadd.xlane.f32.xlu1 %v975_v56  ;;  %701 = vadd.xlane.f32.xlu0 %v700_v58  ;;  %v560_v56 = vmul.f32 %v2445_v4, %v3230_v19  ;;  %v1655_v58 = vmul.f32 %v2697_v6, %v3697_v62  ;;  %v2486_v4 = vld [vmem:[%s5482_s0 + $0x2f8] sm:$0xff]  ;;  %v573_v6 = vmul.f32 %v2458_v35, %v3222_v11 }
  0xf1   :  { %v3974_v18 = vpop.xlane.xlu1 %591  ;;  %v3976_v57 = vpop.xlane.xlu0 %588  ;;  %v882_v44 = vmul.f32 %v2486_v4, %v3466_v29 }
  0xf2   :  { %v1771_v31 = vadd.f32 %v1656_v22, %v1655_v58  ;;  %v1247_v22 = vmul.f32 %v2570_v9, %v3548_v63  ;;  %v2614_v9 = vld [vmem:[%s5482_s0 + $0x940] sm:$0xff] }
  0xf3   :  { %v978_v35 = vadd.f32 %v882_v44, %v881_v36  ;;  %v1613_v44 = vmul.f32 %v2655_v47, %v3697_v62  ;;  %v2699_v47 = vld [vmem:[%s5482_s0 + $0x8b0] sm:$0xff] }
  0xf4   :  { %1340 = vadd.xlane.f32.xlu1 %v1339_v16  ;;  %1044 = vadd.xlane.f32.xlu0 %v1043_v17  ;;  %v2459_v16 = vld [vmem:[%s5482_s0 + $0xc98] sm:$0xff]  ;;  %v682_v17 = vadd.f32 %v560_v56, %v559_v7 }
  0xf5   :  { %v3985_v0 = vpop.xlane.xlu1 %597  ;;  %v3987_v34 = vpop.xlane.xlu0 %594  ;;  %v574_v15 = vmul.f32 %v2459_v16, %v3230_v19  ;;  %v2530_v7 = vld [vmem:[%s5482_s0 + $0x9d8] sm:$0xff] }
  0xf6   :  { %v926_v4 = vmul.f32 %v2530_v7, %v3466_v29 }
  0xf7   :  { %v703_v16 = vadd.f32 %v574_v15, %v573_v6  ;;  %v2446_v6 = vld [vmem:[%s5482_s0 + $0xab0] sm:$0xff] }
  0xf8   :  { %1704 = vadd.xlane.f32.xlu1 %v1703_v20  ;;  %1408 = vadd.xlane.f32.xlu0 %v1407_v10  ;;  %v1248_v20 = vmul.f32 %v2571_v24, %v3551_v12  ;;  %v925_v10 = vmul.f32 %v2529_v23, %v3463_v28  ;;  %v2656_v24 = vld [vmem:[%s5482_s0 + $0x1d8] sm:$0xff]  ;;  %v1291_v23 = vmul.f32 %v2614_v9, %v3548_v63 }
  0xf9   :  { %v4014_v56 = vpop.xlane.xlu1 %603  ;;  %v4016_v58 = vpop.xlane.xlu0 %600  ;;  %v1614_v15 = vmul.f32 %v2656_v24, %v3703_v21 }
  0xfa   :  { %v1046_v36 = vadd.f32 %v926_v4, %v925_v10  ;;  %v561_v4 = vmul.f32 %v2446_v6, %v3222_v11  ;;  %v2460_v6 = vld [vmem:[%s5482_s0 + $0xce0] sm:$0xff] }
  0xfb   :  { %v1706_v9 = vadd.f32 %v1614_v15, %v1613_v44  ;;  %v883_v15 = vmul.f32 %v2487_v53, %v3463_v28  ;;  %v2499_v53 = vld [vmem:[%s5482_s0 + $0x520] sm:$0xff] }
  0xfc   :  { %683 = vadd.xlane.f32.xlu1 %v682_v17  ;;  %1772 = vadd.xlane.f32.xlu0 %v1771_v31  ;;  %v2615_v17 = vld [vmem:[%s5482_s0 + $0x948] sm:$0xff]  ;;  %v1342_v31 = vadd.f32 %v1248_v20, %v1247_v22  ;;  %v2700_v22 = vld [vmem:[%s5482_s0 + $0x8b8] sm:$0xff] }
  0xfd   :  { %v4025_v26 = vpop.xlane.xlu1 %609  ;;  %v4027_v60 = vpop.xlane.xlu0 %606  ;;  %v1292_v7 = vmul.f32 %v2615_v17, %v3551_v12  ;;  %v1658_v24 = vmul.f32 %v2700_v22, %v3703_v21 }
  0xfe   :  { %5515 = vst [vmem:[#allocation32_spill] sm:$0xff] %v4025_v26 }
  0xff   :  { %v1410_v17 = vadd.f32 %v1292_v7, %v1291_v23  ;;  %v2501_v23 = vld [vmem:[%s5482_s0 + $0x570] sm:$0xff] }
 0x100   :  { %979 = vadd.xlane.f32.xlu1 %v978_v35  ;;  %704 = vadd.xlane.f32.xlu0 %v703_v16  ;;  %v562_v35 = vmul.f32 %v2447_v30, %v3230_v19  ;;  %v1657_v16 = vmul.f32 %v2699_v47, %v3697_v62  ;;  %v2488_v30 = vld [vmem:[%s5482_s0 + $0x348] sm:$0xff]  ;;  %v575_v47 = vmul.f32 %v2460_v6, %v3222_v11 }
 0x101   :  { %v4054_v20 = vpop.xlane.xlu1 %615  ;;  %v4056_v10 = vpop.xlane.xlu0 %612  ;;  %v884_v7 = vmul.f32 %v2488_v30, %v3466_v29 }
 0x102   :  { %5516 = vst [vmem:[#allocation33_spill] sm:$0xff] %v4054_v20  ;;  %5517 = vst [vmem:[#allocation34_spill] sm:$0xff] %v4056_v10  ;;  %v1774_v44 = vadd.f32 %v1658_v24, %v1657_v16  ;;  %v897_v24 = vmul.f32 %v2501_v23, %v3463_v28  ;;  %v2531_v23 = vld [vmem:[%s5482_s0 + $0xa20] sm:$0xff] }
 0x103   :  { %v981_v6 = vadd.f32 %v884_v7, %v883_v15  ;;  %v2574_v10 = vld [vmem:[%s5482_s0 + $0x300] sm:$0xff] }
 0x104   :  { %1343 = vadd.xlane.f32.xlu1 %v1342_v31  ;;  %1047 = vadd.xlane.f32.xlu0 %v1046_v36  ;;  %v2461_v31 = vld [vmem:[%s5482_s0 + $0xce8] sm:$0xff]  ;;  %v685_v36 = vadd.f32 %v562_v35, %v561_v4 }
 0x105   :  { %v4065_v39 = vpop.xlane.xlu1 %621  ;;  %v4067_v20 = vpop.xlane.xlu0 %618  ;;  %v576_v22 = vmul.f32 %v2461_v31, %v3230_v19  ;;  %v2500_v4 = vld [vmem:[%s5482_s0 + $0x528] sm:$0xff] }
 0x106   :  { %5518 = vst [vmem:[#allocation35_spill] sm:$0xff] %v4065_v39  ;;  %5519 = vst [vmem:[#allocation36_spill] sm:$0xff] %v4067_v20  ;;  %v2502_v39 = vld [vmem:[%s5482_s0 + $0x578] sm:$0xff]  ;;  %v896_v30 = vmul.f32 %v2500_v4, %v3466_v29  ;;  %v2543_v20 = vld [vmem:[%s5482_s0 + $0xc00] sm:$0xff] }
 0x107   :  { %v706_v31 = vadd.f32 %v576_v22, %v575_v47  ;;  %v939_v7 = vmul.f32 %v2543_v20, %v3463_v28  ;;  %v2572_v47 = vld [vmem:[%s5482_s0 + $0x2b0] sm:$0xff] }
 0x108   :  { %1707 = vadd.xlane.f32.xlu1 %v1706_v9  ;;  %1411 = vadd.xlane.f32.xlu0 %v1410_v17  ;;  %v898_v9 = vmul.f32 %v2502_v39, %v3466_v29  ;;  %v895_v17 = vmul.f32 %v2499_v53, %v3463_v28  ;;  %v2544_v39 = vld [vmem:[%s5482_s0 + $0xc08] sm:$0xff]  ;;  %v927_v53 = vmul.f32 %v2531_v23, %v3463_v28  ;;  %v2545_v20 = vld [vmem:[%s5482_s0 + $0xc50] sm:$0xff] }
 0x109   :  { %v4094_v35 = vpop.xlane.xlu1 %627  ;;  %v4096_v16 = vpop.xlane.xlu0 %624  ;;  %v940_v22 = vmul.f32 %v2544_v39, %v3466_v29 }
 0x10a   :  { %5520 = vst [vmem:[#allocation37_spill] sm:$0xff] %v4094_v35  ;;  %5521 = vst [vmem:[#allocation38_spill] sm:$0xff] %v4096_v16  ;;  %v999_v15 = vadd.f32 %v896_v30, %v895_v17  ;;  %v2573_v16 = vld [vmem:[%s5482_s0 + $0x2b8] sm:$0xff]  ;;  %v1249_v30 = vmul.f32 %v2572_v47, %v3548_v63  ;;  %v2616_v47 = vld [vmem:[%s5482_s0 + $0x990] sm:$0xff] }
 0x10b   :  { %v1067_v23 = vadd.f32 %v940_v22, %v939_v7  ;;  %v1615_v22 = vmul.f32 %v2657_v43, %v3697_v62  ;;  %v2701_v43 = vld [vmem:[%s5482_s0 + $0x900] sm:$0xff] }
 0x10c   :  { %686 = vadd.xlane.f32.xlu1 %v685_v36  ;;  %1775 = vadd.xlane.f32.xlu0 %v1774_v44  ;;  %v2532_v36 = vld [vmem:[%s5482_s0 + $0xa28] sm:$0xff]  ;;  %v1002_v44 = vadd.f32 %v898_v9, %v897_v24  ;;  %v2546_v24 = vld [vmem:[%s5482_s0 + $0xc58] sm:$0xff] }
 0x10d   :  { %v4105_v61 = vpop.xlane.xlu1 %633  ;;  %v4107_v35 = vpop.xlane.xlu0 %630  ;;  %v928_v4 = vmul.f32 %v2532_v36, %v3466_v29  ;;  %v942_v39 = vmul.f32 %v2546_v24, %v3466_v29 }
 0x10e   :  { %5522 = vst [vmem:[#allocation39_spill] sm:$0xff] %v4105_v61  ;;  %5523 = vst [vmem:[#allocation40_spill] sm:$0xff] %v4107_v35 }
 0x10f   :  { %v1049_v36 = vadd.f32 %v928_v4, %v927_v53  ;;  %v2448_v53 = vld [vmem:[%s5482_s0 + $0xb00] sm:$0xff] }
 0x110   :  { %982 = vadd.xlane.f32.xlu1 %v981_v6  ;;  %707 = vadd.xlane.f32.xlu0 %v706_v31  ;;  %v1250_v6 = vmul.f32 %v2573_v16, %v3551_v12  ;;  %v941_v31 = vmul.f32 %v2545_v20, %v3463_v28  ;;  %v2658_v16 = vld [vmem:[%s5482_s0 + $0x228] sm:$0xff]  ;;  %v1293_v20 = vmul.f32 %v2616_v47, %v3548_v63 }
 0x111   :  { %v4134_v9 = vpop.xlane.xlu1 %639  ;;  %v4136_v17 = vpop.xlane.xlu0 %636  ;;  %v1616_v4 = vmul.f32 %v2658_v16, %v3703_v21 }
 0x112   :  { %5524 = vst [vmem:[#allocation41_spill] sm:$0xff] %v4134_v9  ;;  %5525 = vst [vmem:[#allocation42_spill] sm:$0xff] %v4136_v17  ;;  %v1070_v7 = vadd.f32 %v942_v39, %v941_v31  ;;  %v563_v39 = vmul.f32 %v2448_v53, %v3222_v11  ;;  %v2462_v53 = vld [vmem:[%s5482_s0 + $0xd30] sm:$0xff] }
 0x113   :  { %v1709_v47 = vadd.f32 %v1616_v4, %v1615_v22 }
 0x114   :  { %1003 = vadd.xlane.f32.xlu1 %v1002_v44  ;;  %1000 = vadd.xlane.f32.xlu0 %v999_v15  ;;  %v2617_v44 = vld [vmem:[%s5482_s0 + $0x998] sm:$0xff]  ;;  %v1345_v15 = vadd.f32 %v1250_v6, %v1249_v30  ;;  %v2702_v30 = vld [vmem:[%s5482_s0 + $0x908] sm:$0xff] }
 0x115   :  { %v4145_v35 = vpop.xlane.xlu1 %647  ;;  %v4147_v9 = vpop.xlane.xlu0 %642  ;;  %v1294_v24 = vmul.f32 %v2617_v44, %v3551_v12  ;;  %v1660_v16 = vmul.f32 %v2702_v30, %v3703_v21  ;;  %v577_v30 = vmul.f32 %v2462_v53, %v3222_v11  ;;  %v717_v53 = vadd.f32 %v3947_v59, %v3495_v55  ;;  %v2548_v55 = vld [vmem:[%s5482_s0 + $0xca8] sm:$0xff] }
 0x116   :  { %5526 = vst [vmem:[#allocation43_spill] sm:$0xff] %v4145_v35  ;;  %5527 = vst [vmem:[#allocation44_spill] sm:$0xff] %v4147_v9  ;;  %v2449_v35 = vld [vmem:[%s5482_s0 + $0xb08] sm:$0xff]  ;;  %v2489_v9 = vld [vmem:[%s5482_s0 + $0x390] sm:$0xff] }
 0x117   :  { %v1413_v44 = vadd.f32 %v1294_v24, %v1293_v20  ;;  %v885_v4 = vmul.f32 %v2489_v9, %v3463_v28  ;;  %v2533_v20 = vld [vmem:[%s5482_s0 + $0xa70] sm:$0xff]  ;;  %v2534_v24 = vld [vmem:[%s5482_s0 + $0xa78] sm:$0xff]  ;;  %v2503_v9 = vld [vmem:[%s5482_s0 + $0x5c0] sm:$0xff] }
 0x118   :  { %1068 = vadd.xlane.f32.xlu1 %v1067_v23  ;;  %1050 = vadd.xlane.f32.xlu0 %v1049_v36  ;;  %v564_v23 = vmul.f32 %v2449_v35, %v3230_v19  ;;  %v1659_v36 = vmul.f32 %v2701_v43, %v3697_v62  ;;  %v2490_v35 = vld [vmem:[%s5482_s0 + $0x398] sm:$0xff] }
 0x119   :  { %v4174_v6 = vpop.xlane.xlu1 %653  ;;  %v651_v31 = vpop.xlane.xlu0 %650  ;;  %v886_v43 = vmul.f32 %v2490_v35, %v3466_v29 }
 0x11a   :  { %v1777_v22 = vadd.f32 %v1660_v16, %v1659_v36  ;;  %v929_v16 = vmul.f32 %v2533_v20, %v3463_v28  ;;  %v2575_v20 = vld [vmem:[%s5482_s0 + $0x308] sm:$0xff] }
 0x11c   :  { %1346 = vadd.xlane.f32.xlu1 %v1345_v15  ;;  %1071 = vadd.xlane.f32.xlu0 %v1070_v7  ;;  %v2463_v15 = vld [vmem:[%s5482_s0 + $0xd38] sm:$0xff]  ;;  %v688_v7 = vadd.f32 %v564_v23, %v563_v39  ;;  %v2504_v39 = vld [vmem:[%s5482_s0 + $0x5c8] sm:$0xff] }
 0x11d   :  { %v4183_v17 = vpop.xlane.xlu1 %659  ;;  %v4185_v49 = vpop.xlane.xlu0 %656  ;;  %v578_v61 = vmul.f32 %v2463_v15, %v3230_v19  ;;  %v900_v35 = vmul.f32 %v2504_v39, %v3466_v29  ;;  %v984_v15 = vadd.f32 %v886_v43, %v885_v4  ;;  %v1251_v43 = vmul.f32 %v2574_v10, %v3548_v63 }
 0x11e   :  { %v944_v10 = vmul.f32 %v2548_v55, %v3466_v29 }
 0x11f   :  { %v709_v48 = vadd.f32 %v578_v61, %v577_v30  ;;  %v1252_v30 = vmul.f32 %v2575_v20, %v3551_v12 }
 0x120   :  { %1710 = vadd.xlane.f32.xlu1 %v1709_v47  ;;  %1414 = vadd.xlane.f32.xlu0 %v1413_v44  ;;  %v930_v47 = vmul.f32 %v2534_v24, %v3466_v29  ;;  %v899_v44 = vmul.f32 %v2503_v9, %v3463_v28  ;;  %v2547_v24 = vld [vmem:[%s5482_s0 + $0xca0] sm:$0xff] }
 0x121   :  { %v4212_v23 = vpop.xlane.xlu1 %665  ;;  %v4214_v36 = vpop.xlane.xlu0 %662  ;;  %v943_v54 = vmul.f32 %v2547_v24, %v3463_v28 }
 0x122   :  { %v1052_v59 = vadd.f32 %v930_v47, %v929_v16  ;;  %v1005_v4 = vadd.f32 %v900_v35, %v899_v44  ;;  %v2619_v16 = vld [vmem:[%s5482_s0 + $0x9e8] sm:$0xff]  ;;  %v718_v47 = vadd.f32 %v3945_v38, %v3518_v52  ;;  %v1348_v38 = vadd.f32 %v1252_v30, %v1251_v43  ;;  %v2464_v43 = vld [vmem:[%s5482_s0 + $0xd80] sm:$0x7] }
 0x123   :  { %v1296_v52 = vmul.f32 %v2619_v16, %v3551_v12  ;;  %v1073_v55 = vadd.f32 %v944_v10, %v943_v54  ;;  %v720_v10 = vadd.f32 %v3974_v18, %v3516_v46 }
 0x124   :  { %689 = vadd.xlane.f32.xlu1 %v688_v7  ;;  %1778 = vadd.xlane.f32.xlu0 %v1777_v22  ;;  %v2659_v7 = vld [vmem:[%s5482_s0 + $0x270] sm:$0xff]  ;;  %v2660_v22 = vld [vmem:[%s5482_s0 + $0x278] sm:$0xff] }
 0x125   :  { %v953_v9 = vpop.xlane.xlu1 %952  ;;  %v4231_v39 = vpop.xlane.xlu0 %668  ;;  %v1617_v20 = vmul.f32 %v2659_v7, %v3697_v62  ;;  %v1618_v24 = vmul.f32 %v2660_v22, %v3703_v21  ;;  %v2703_v7 = vld [vmem:[%s5482_s0 + $0x950] sm:$0xff]  ;;  %v2704_v22 = vld [vmem:[%s5482_s0 + $0x958] sm:$0xff] }
 0x126   :  { %v4236_v61 = vadd.f32 %v953_v9, %v717_v53  ;;  %v2618_v53 = vld [vmem:[%s5482_s0 + $0x9e0] sm:$0xff]  ;;  %v739_v9 = vadd.f32 %v651_v31, %v3733_v45  ;;  %v2451_v45 = vld [vmem:[%s5482_s0 + $0xb58] sm:$0xff]  ;;  %v719_v31 = vadd.f32 %v3976_v57, %v3493_v51  ;;  %v1661_v16 = vmul.f32 %v2703_v7, %v3697_v62 }
 0x127   :  { %v1295_v40 = vmul.f32 %v2618_v53, %v3548_v63  ;;  %v1712_v57 = vadd.f32 %v1618_v24, %v1617_v20  ;;  %v566_v53 = vmul.f32 %v2451_v45, %v3230_v19 }
 0x128   :  { %985 = vadd.xlane.f32.xlu1 %v984_v15  ;;  %710 = vadd.xlane.f32.xlu0 %v709_v48  ;;  %v2450_v48 = vld [vmem:[%s5482_s0 + $0xb50] sm:$0xff]  ;;  %v740_v15 = vadd.f32 %v4174_v6, %v3731_v41  ;;  %v2465_v41 = vld [vmem:[%s5482_s0 + $0xd88] sm:$0x7] }
 0x129   :  { %v1021_v44 = vpop.xlane.xlu1 %1020  ;;  %v956_v35 = vpop.xlane.xlu0 %955  ;;  %v580_v20 = vmul.f32 %v2465_v41, %v3230_v19 }
 0x12a   :  { %v4259_v5 = vadd.f32 %v1021_v44, %v739_v9  ;;  %v4261_v26 = vadd.f32 %v956_v35, %v718_v47  ;;  %v1662_v47 = vmul.f32 %v2704_v22, %v3703_v21  ;;  %v579_v9 = vmul.f32 %v2464_v43, %v3222_v11  ;;  %v2492_v35 = vld [vmem:[%s5482_s0 + $0x3e8] sm:$0xff] }
 0x12b   :  { %v741_v44 = vadd.f32 %v4185_v49, %v3753_v37  ;;  %v888_v37 = vmul.f32 %v2492_v35, %v3466_v29  ;;  %v2536_v43 = vld [vmem:[%s5482_s0 + $0xac8] sm:$0xff] }
 0x12c   :  { %1053 = vadd.xlane.f32.xlu1 %v1052_v59  ;;  %1006 = vadd.xlane.f32.xlu0 %v1005_v4  ;;  %v1416_v59 = vadd.f32 %v1296_v52, %v1295_v40  ;;  %v565_v4 = vmul.f32 %v2450_v48, %v3222_v11  ;;  %v2491_v40 = vld [vmem:[%s5482_s0 + $0x3e0] sm:$0xff]  ;;  %v1780_v45 = vadd.f32 %v1662_v47, %v1661_v16 }
 0x12d   :  { %v959_v30 = vpop.xlane.xlu1 %958  ;;  %v1024_v51 = vpop.xlane.xlu0 %1023  ;;  %v887_v49 = vmul.f32 %v2491_v40, %v3463_v28 }
 0x12e   :  { %v4287_v54 = vadd.f32 %v959_v30, %v719_v31  ;;  %v4289_v6 = vadd.f32 %v1024_v51, %v740_v15  ;;  %v691_v18 = vadd.f32 %v566_v53, %v565_v4  ;;  %v712_v31 = vsel %vm273_vm0, %v579_v9, 0.0  ;;  %v2576_v4 = vld [vmem:[%s5482_s0 + $0x350] sm:$0xff] }
 0x12f   :  { %v713_v15 = vsel %vm273_vm0, %v580_v20, 0.0  ;;  %v932_v53 = vmul.f32 %v2536_v43, %v3466_v29  ;;  %v2549_v9 = vld [vmem:[%s5482_s0 + $0xcf0] sm:$0xff] }
 0x130   :  { %1349 = vadd.xlane.f32.xlu1 %v1348_v38  ;;  %1074 = vadd.xlane.f32.xlu0 %v1073_v55  ;;  %v742_v38 = vadd.f32 %v4183_v17, %v3751_v13  ;;  %v2535_v55 = vld [vmem:[%s5482_s0 + $0xac0] sm:$0xff]  ;;  %v2505_v13 = vld [vmem:[%s5482_s0 + $0x610] sm:$0xff]  ;;  %v2506_v17 = vld [vmem:[%s5482_s0 + $0x618] sm:$0xff]  ;;  %v714_v41 = vadd.f32 %v713_v15, %v712_v31 }
 0x131   :  { %v962_v24 = vpop.xlane.xlu1 %961  ;;  %v1027_v52 = vpop.xlane.xlu0 %1026  ;;  %v901_v16 = vmul.f32 %v2505_v13, %v3463_v28  ;;  %v902_v47 = vmul.f32 %v2506_v17, %v3466_v29 }
 0x132   :  { %v4307_v48 = vadd.f32 %v962_v24, %v720_v10  ;;  %v4309_v46 = vadd.f32 %v1027_v52, %v741_v44  ;;  %v2550_v10 = vld [vmem:[%s5482_s0 + $0xcf8] sm:$0xff]  ;;  %v1253_v24 = vmul.f32 %v2576_v4, %v3548_v63 }
 0x134   :  { %1713 = vadd.xlane.f32.xlu1 %v1712_v57  ;;  %1417 = vadd.xlane.f32.xlu0 %v1416_v59  ;;  %v987_v57 = vadd.f32 %v888_v37, %v887_v49  ;;  %v931_v59 = vmul.f32 %v2535_v55, %v3463_v28  ;;  %v946_v49 = vmul.f32 %v2550_v10, %v3466_v29  ;;  %v2588_v55 = vld [vmem:[%s5482_s0 + $0x530] sm:$0xff] }
 0x135   :  { %v1323_v7 = vpop.xlane.xlu1 %1322  ;;  %v1030_v22 = vpop.xlane.xlu0 %1029  ;;  %v721_v37 = vadd.f32 %v3987_v34, %v3535_v14  ;;  %v2589_v14 = vld [vmem:[%s5482_s0 + $0x538] sm:$0xff] }
 0x136   :  { %v4330_v30 = vadd.f32 %v1323_v7, %v4236_v61  ;;  %v4332_v51 = vadd.f32 %v1030_v22, %v742_v38  ;;  %v2577_v61 = vld [vmem:[%s5482_s0 + $0x358] sm:$0xff]  ;;  %v1055_v38 = vadd.f32 %v932_v53, %v931_v59  ;;  %v743_v59 = vadd.f32 %v4214_v36, %v3770_v33  ;;  %v2620_v53 = vld [vmem:[%s5482_s0 + $0xa30] sm:$0xff] }
 0x137   :  { %v1254_v52 = vmul.f32 %v2577_v61, %v3551_v12  ;;  %v1266_v4 = vmul.f32 %v2589_v14, %v3551_v12 }
 0x138   :  { %692 = vadd.xlane.f32.xlu1 %v691_v18  ;;  %1781 = vadd.xlane.f32.xlu0 %v1780_v45  ;;  %v945_v18 = vmul.f32 %v2549_v9, %v3463_v28  ;;  %v1008_v45 = vadd.f32 %v902_v47, %v901_v16  ;;  %v2621_v16 = vld [vmem:[%s5482_s0 + $0xa38] sm:$0xff] }
 0x139   :  { %v1391_v44 = vpop.xlane.xlu1 %1390  ;;  %v1326_v40 = vpop.xlane.xlu0 %1325  ;;  %v1351_v22 = vadd.f32 %v1254_v52, %v1253_v24 }
 0x13a   :  { %v4351_v35 = vadd.f32 %v1391_v44, %v4259_v5  ;;  %v4354_v20 = vadd.f32 %v1326_v40, %v4261_v26  ;;  %v2590_v26 = vld [vmem:[%s5482_s0 + $0x580] sm:$0xff]  ;;  %v2591_v5 = vld [vmem:[%s5482_s0 + $0x588] sm:$0xff]  ;;  %v1076_v43 = vadd.f32 %v946_v49, %v945_v18  ;;  %v1297_v44 = vmul.f32 %v2620_v53, %v3548_v63 }
 0x13b   :  { %v1267_v13 = vmul.f32 %v2590_v26, %v3548_v63  ;;  %v1268_v17 = vmul.f32 %v2591_v5, %v3551_v12  ;;  %v1298_v40 = vmul.f32 %v2621_v16, %v3551_v12  ;;  %v2661_v18 = vld [vmem:[%s5482_s0 + $0x2c0] sm:$0xff] }
 0x13c   :  { %988 = vadd.xlane.f32.xlu1 %v987_v57  ;;  %715 = vadd.xlane.f32.xlu0 %v714_v41  ;;  %v2632_v57 = vld [vmem:[%s5482_s0 + $0xc10] sm:$0xff]  ;;  %v2633_v41 = vld [vmem:[%s5482_s0 + $0xc18] sm:$0xff]  ;;  %v2634_v49 = vld [vmem:[%s5482_s0 + $0xc60] sm:$0xff] }
 0x13d   :  { %v965_v31 = vpop.xlane.xlu1 %964  ;;  %v1394_v15 = vpop.xlane.xlu0 %1393  ;;  %v1309_v36 = vmul.f32 %v2632_v57, %v3548_v63  ;;  %v1310_v10 = vmul.f32 %v2633_v41, %v3551_v12  ;;  %v1372_v24 = vadd.f32 %v1268_v17, %v1267_v13  ;;  %v1311_v14 = vmul.f32 %v2634_v49, %v3548_v63  ;;  %v2453_v17 = vld [vmem:[%s5482_s0 + $0xba8] sm:$0xff] }
 0x13e   :  { %v4374_v34 = vadd.f32 %v965_v31, %v721_v37  ;;  %v4377_v7 = vadd.f32 %v1394_v15, %v4289_v6  ;;  %v1265_v6 = vmul.f32 %v2588_v55, %v3548_v63  ;;  %v1419_v31 = vadd.f32 %v1298_v40, %v1297_v44  ;;  %v2507_v40 = vld [vmem:[%s5482_s0 + $0x660] sm:$0xff] }
 0x13f   :  { %v1437_v5 = vadd.f32 %v1310_v10, %v1309_v36  ;;  %v1619_v15 = vmul.f32 %v2661_v18, %v3697_v62  ;;  %v568_v16 = vmul.f32 %v2453_v17, %v3230_v19  ;;  %v2494_v18 = vld [vmem:[%s5482_s0 + $0x438] sm:$0xff] }
 0x140   :  { %1056 = vadd.xlane.f32.xlu1 %v1055_v38  ;;  %1009 = vadd.xlane.f32.xlu0 %v1008_v45  ;;  %v1369_v52 = vadd.f32 %v1266_v4, %v1265_v6  ;;  %v2635_v45 = vld [vmem:[%s5482_s0 + $0xc68] sm:$0xff]  ;;  %v5528_v6 = vlaneseq  ;;  %v2538_v17 = vld [vmem:[%s5482_s0 + $0xb18] sm:$0xff] }
 0x141   :  { %v1329_v47 = vpop.xlane.xlu1 %1328  ;;  %v1033_v61 = vpop.xlane.xlu0 %1032  ;;  %v1312_v13 = vmul.f32 %v2635_v45, %v3551_v12 }
 0x142   :  { %v4398_v9 = vadd.f32 %v1329_v47, %v4287_v54  ;;  %v4400_v33 = vadd.f32 %v1033_v61, %v743_v59  ;;  %v2662_v54 = vld [vmem:[%s5482_s0 + $0x2c8] sm:$0xff]  ;;  %v4448_v4 = vand.u32 127, %v5528_v6  ;;  %v2592_v6 = vld [vmem:[%s5482_s0 + $0x5d0] sm:$0xff] }
 0x143   :  { %v1620_v55 = vmul.f32 %v2662_v54, %v3703_v21  ;;  %v1440_v47 = vadd.f32 %v1312_v13, %v1311_v14 }
 0x144   :  { %1352 = vadd.xlane.f32.xlu1 %v1351_v22  ;;  %1077 = vadd.xlane.f32.xlu0 %v1076_v43  ;;  %v722_v22 = vadd.f32 %v3985_v0, %v3533_v50  ;;  %v744_v43 = vadd.f32 %v4212_v23, %v3768_v32  ;;  %v2705_v0 = vld [vmem:[%s5482_s0 + $0x9a0] sm:$0xff]  ;;  %v2706_v50 = vld [vmem:[%s5482_s0 + $0x9a8] sm:$0xff]  ;;  %v2040_v54 = vadd.s32 4294967288, %v4448_v4 }
 0x145   :  { %v4415_v37 = vpop.xlane.xlu1 %671  ;;  %v1397_v38 = vpop.xlane.xlu0 %1396  ;;  %v1715_v59 = vadd.f32 %v1620_v55, %v1619_v15  ;;  %v1663_v61 = vmul.f32 %v2705_v0, %v3697_v62  ;;  %v1664_v36 = vmul.f32 %v2706_v50, %v3703_v21 }
 0x146   :  { %v4421_v26 = vadd.f32 %v1397_v38, %v4309_v46  ;;  %v2452_v46 = vld [vmem:[%s5482_s0 + $0xba0] sm:$0xff] }
 0x147   :  { %v567_v53 = vmul.f32 %v2452_v46, %v3222_v11  ;;  %v1783_v38 = vadd.f32 %v1664_v36, %v1663_v61  ;;  %v2537_v46 = vld [vmem:[%s5482_s0 + $0xb10] sm:$0xff] }
 0x148   :  { %1373 = vadd.xlane.f32.xlu1 %v1372_v24  ;;  %1370 = vadd.xlane.f32.xlu0 %v1369_v52  ;;  %v2508_v24 = vld [vmem:[%s5482_s0 + $0x668] sm:$0xff]  ;;  %v2493_v52 = vld [vmem:[%s5482_s0 + $0x430] sm:$0xff]  ;;  %v933_v36 = vmul.f32 %v2537_v46, %v3463_v28 }
 0x149   :  { %v1036_v57 = vpop.xlane.xlu1 %1035  ;;  %v968_v41 = vpop.xlane.xlu0 %967  ;;  %v694_v49 = vadd.f32 %v568_v16, %v567_v53  ;;  %v904_v45 = vmul.f32 %v2508_v24, %v3466_v29  ;;  %v889_v14 = vmul.f32 %v2493_v52, %v3463_v28  ;;  %v2593_v53 = vld [vmem:[%s5482_s0 + $0x5d8] sm:$0xff] }
 0x14a   :  { %v4443_v32 = vadd.f32 %v1036_v57, %v744_v43  ;;  %v4445_v23 = vadd.f32 %v968_v41, %v722_v22  ;;  %v890_v22 = vmul.f32 %v2494_v18, %v3466_v29  ;;  %v4497_v57 = vsub.s32 %v2040_v54, %v2794_v1  ;;  %v2578_v18 = vld [vmem:[%s5482_s0 + $0x3a0] sm:$0xff]  ;;  %v2579_v54 = vld [vmem:[%s5482_s0 + $0x3a8] sm:$0xff] }
 0x14b   :  { %v4501_v41 = vsub.s32 %v4448_v4, %v2794_v1 }
 0x14c   :  { %1438 = vadd.xlane.f32.xlu1 %v1437_v5  ;;  %1420 = vadd.xlane.f32.xlu0 %v1419_v31  ;;  %v2552_v5 = vld [vmem:[%s5482_s0 + $0xd48] sm:$0xff]  ;;  %v4484_v31 = vstv %s5484_s2  ;;  %v990_v61 = vadd.f32 %v890_v22, %v889_v14  ;;  %v1255_v22 = vmul.f32 %v2578_v18, %v3548_v63  ;;  %s2762_s2 = smov [#allocation3]  }
 0x14d   :  { %v1400_v10 = vpop.xlane.xlu1 %1399  ;;  %v1332_v44 = vpop.xlane.xlu0 %1331  ;;  %s2370_s23 = sshll.u32 %s2762_s2, 4  ;;  %s2371_s23 = int_to_ptr.vmem [resolvable:$true] %s2370_s23 }
 0x14e   :  { %v4461_v11 = vadd.f32 %v1400_v10, %v4332_v51  ;;  %v4464_v19 = vadd.f32 %v1332_v44, %v4307_v48  ;;  %v903_v51 = vmul.f32 %v2507_v40, %v3463_v28  ;;  %v2551_v48 = vld [vmem:[%s5482_s0 + $0xd40] sm:$0xff]  ;;  %v934_v10 = vmul.f32 %v2538_v17, %v3466_v29  ;;  %s2739_s24 = scalar_lea.vmem %s2371_s23, 32  ;;  %p2744_p1 = scmp.lt.s32.totalorder %s2371_s23, %s2371_s23 }
 0x14f   :  { %v947_v0 = vmul.f32 %v2551_v48, %v3463_v28  ;;  %p2740_p0 = scmp.ne.s32.totalorder %s2371_s23, %s2739_s24  ;;  %p2745_p2 = scmp.lt.s32.totalorder %s2739_s24, %s2739_s24 }
 0x150   :  { %1716 = vadd.xlane.f32.xlu1 %v1715_v59  ;;  %1441 = vadd.xlane.f32.xlu0 %v1440_v47  ;;  %v1011_v59 = vadd.f32 %v904_v45, %v903_v51  ;;  %v1269_v51 = vmul.f32 %v2592_v6, %v3548_v63  ;;  %v1270_v45 = vmul.f32 %v2593_v53, %v3551_v12 }
 0x151   :  { %v1696_v15 = vpop.xlane.xlu1 %1695  ;;  %v1693_v55 = vpop.xlane.xlu0 %1692  ;;  %v1058_v14 = vadd.f32 %v934_v10, %v933_v36  ;;  %v745_v6 = vadd.f32 %v4231_v39, %v3790_v3  ;;  %v2708_v3 = vld [vmem:[%s5482_s0 + $0x9f8] sm:$0xff]  ;;  %v2509_v39 = vld [vmem:[%s5482_s0 + $0x6b0] sm:$0x7]  ;;  %p2746_p3 = por %p2745_p2, %p2744_p1 }
 0x152   :  { %v1828_v43 = vadd.f32 %v1696_v15, %v4354_v20  ;;  %v1827_v13 = vadd.f32 %v1693_v55, %v4330_v30  ;;  %v948_v20 = vmul.f32 %v2552_v5, %v3466_v29  ;;  %v2636_v15 = vld [vmem:[%s5482_s0 + $0xcb0] sm:$0xff] }
 0x153   :  { %p2747_p4 = pnand %p2746_p3, %p2740_p0 }
 0x154   :  { %v1874_v30 = vadd.f32 %v4484_v31, %v1828_v43  ;;  %v1873_v50 = vadd.f32 %v4484_v31, %v1827_v13  ;;  %695 = vadd.xlane.f32.xlu1 %v694_v49  ;;  %1784 = vadd.xlane.f32.xlu0 %v1783_v38  ;;  %v723_v49 = vadd.f32 %v4016_v58, %v3561_v8  ;;  %v2637_v8 = vld [vmem:[%s5482_s0 + $0xcb8] sm:$0xff] }
 0x155   :  { %v1764_v16 = vpop.xlane.xlu1 %1763  ;;  %v1761_v47 = vpop.xlane.xlu0 %1760  ;;  %v1079_v38 = vadd.f32 %v948_v20, %v947_v0  ;;  %v1256_v43 = vmul.f32 %v2579_v54, %v3551_v12  ;;  %v2622_v20 = vld [vmem:[%s5482_s0 + $0xa80] sm:$0xff] }
 0x156   :  { %v1918_v44 = vmax.f32 %v1874_v30, 0.0  ;;  %v1917_v40 = vmax.f32 %v1873_v50, 0.0  ;;  %v1850_v24 = vadd.f32 %v1764_v16, %v4377_v7  ;;  %v1849_v52 = vadd.f32 %v1761_v47, %v4351_v35  ;;  %v2623_v30 = vld [vmem:[%s5482_s0 + $0xa88] sm:$0xff] }
 0x157   :  { %v1313_v50 = vmul.f32 %v2636_v15, %v3548_v63  ;;  %v1375_v47 = vadd.f32 %v1270_v45, %v1269_v51  ;;  %v2664_v51 = vld [vmem:[%s5482_s0 + $0x318] sm:$0xff]  ;;  %v2047_v45 = vadd.s32 4294967280, %v4448_v4  ;;  %v2495_v15 = vld [vmem:[%s5482_s0 + $0x480] sm:$0xff] }
 0x158   :  { %v2044_v7 = vrot.slane %v1918_v44, %v4497_v57  ;;  %v2039_v35 = vrot.slane %v1917_v40, %v4501_v41  ;;  %v1896_v48 = vadd.f32 %v4484_v31, %v1850_v24  ;;  %v1895_v5 = vadd.f32 %v4484_v31, %v1849_v52  ;;  %1012 = vadd.xlane.f32.xlu1 %v1011_v59  ;;  %v2510_v52 = vld [vmem:[%s5482_s0 + $0x6b8] sm:$0x7] }
 0x159   :  { %991 = vadd.xlane.f32.xlu0 %v990_v61  ;;  %v971_v58 = vpop.xlane.xlu1 %970  ;;  %v4537_v55 = vpop.xlane.xlu0 %674  ;;  %v1314_v59 = vmul.f32 %v2637_v8, %v3551_v12  ;;  %v2707_v61 = vld [vmem:[%s5482_s0 + $0x9f0] sm:$0xff]  ;;  %v1354_v44 = vadd.f32 %v1256_v43, %v1255_v22  ;;  %v1299_v40 = vmul.f32 %v2622_v20, %v3548_v63  ;;  %v1300_v24 = vmul.f32 %v2623_v30, %v3551_v12  ;;  %v2496_v8 = vld [vmem:[%s5482_s0 + $0x488] sm:$0xff] }
 0x15a   :  { %v4542_v13 = vsel %vm2045_vm1, %v2044_v7, %v2039_v35  ;;  %v1940_v46 = vmax.f32 %v1896_v48, 0.0  ;;  %v1939_v17 = vmax.f32 %v1895_v5, 0.0  ;;  %v4544_v0 = vadd.f32 %v971_v58, %v723_v49  ;;  %v2553_v30 = vld [vmem:[%s5482_s0 + $0xd90] sm:$0x7] }
 0x15b   :  { %v1443_v7 = vadd.f32 %v1314_v59, %v1313_v50  ;;  %v1665_v35 = vmul.f32 %v2707_v61, %v3697_v62  ;;  %v1666_v48 = vmul.f32 %v2708_v3, %v3703_v21  ;;  %v906_v5 = vmul.f32 %v2510_v52, %v3466_v29  ;;  %v2554_v50 = vld [vmem:[%s5482_s0 + $0xd98] sm:$0x7]  ;;  %v2540_v52 = vld [vmem:[%s5482_s0 + $0xb68] sm:$0xff] }
 0x15c   :  { %v2181_v53 = vrot.slane %v1940_v46, %v4497_v57  ;;  %v2177_v16 = vrot.slane %v1939_v17, %v4501_v41  ;;  %1080 = vadd.xlane.f32.xlu1 %v1079_v38  ;;  %v2663_v38 = vld [vmem:[%s5482_s0 + $0x310] sm:$0xff]  ;;  %v1422_v22 = vadd.f32 %v1300_v24, %v1299_v40  ;;  %v1622_v46 = vmul.f32 %v2664_v51, %v3703_v21 }
 0x15d   :  { %1059 = vadd.xlane.f32.xlu0 %v1058_v14  ;;  %v1335_v36 = vpop.xlane.xlu1 %1334  ;;  %v1039_v10 = vpop.xlane.xlu0 %1038  ;;  %v1621_v43 = vmul.f32 %v2663_v38, %v3697_v62  ;;  %v4610_v59 = vsub.s32 %v2047_v45, %v2794_v1  ;;  %v950_v40 = vmul.f32 %v2554_v50, %v3466_v29  ;;  %v724_v45 = vadd.f32 %v4014_v56, %v3559_v25  ;;  %v2594_v25 = vld [vmem:[%s5482_s0 + $0x620] sm:$0xff] }
 0x15e   :  { %v4573_v18 = vsel %vm2045_vm1, %v2181_v53, %v2177_v16  ;;  %v4576_v54 = vadd.f32 %v1335_v36, %v4374_v34  ;;  %v4578_v49 = vadd.f32 %v1039_v10, %v745_v6  ;;  %v905_v34 = vmul.f32 %v2509_v39, %v3463_v28  ;;  %v2539_v39 = vld [vmem:[%s5482_s0 + $0xb60] sm:$0xff] }
 0x15f   :  { %v891_v6 = vmul.f32 %v2495_v15, %v3463_v28  ;;  %v892_v53 = vmul.f32 %v2496_v8, %v3466_v29  ;;  %v1718_v10 = vadd.f32 %v1622_v46, %v1621_v43  ;;  %v1083_v15 = vsel %vm273_vm0, %v950_v40, 0.0  ;;  %v2580_v43 = vld [vmem:[%s5482_s0 + $0x3f0] sm:$0xff]  ;;  %v2581_v46 = vld [vmem:[%s5482_s0 + $0x3f8] sm:$0xff] }
 0x160   :  { %1376 = vadd.xlane.f32.xlu1 %v1375_v47  ;;  %v1014_v16 = vsel %vm273_vm0, %v905_v34, 0.0  ;;  %v1015_v47 = vsel %vm273_vm0, %v906_v5, 0.0  ;;  %v935_v8 = vmul.f32 %v2539_v39, %v3463_v28  ;;  %v2054_v39 = vadd.s32 4294967272, %v4448_v4 }
 0x161   :  { %1355 = vadd.xlane.f32.xlu0 %v1354_v44  ;;  %v1699_v58 = vpop.xlane.xlu1 %1698  ;;  %v1403_v14 = vpop.xlane.xlu0 %1402  ;;  %v949_v44 = vmul.f32 %v2553_v30, %v3463_v28  ;;  %v1016_v38 = vadd.f32 %v1015_v47, %v1014_v16  ;;  %v993_v51 = vadd.f32 %v892_v53, %v891_v6  ;;  %v1258_v16 = vmul.f32 %v2581_v46, %v3551_v12  ;;  %v2638_v47 = vld [vmem:[%s5482_s0 + $0xd00] sm:$0xff] }
 0x162   :  { %v1829_v17 = vadd.f32 %v1699_v58, %v4398_v9  ;;  %v4601_v20 = vadd.f32 %v1403_v14, %v4400_v33  ;;  %v1786_v33 = vadd.f32 %v1666_v48, %v1665_v35  ;;  %v936_v58 = vmul.f32 %v2540_v52, %v3466_v29 }
 0x163   :  { %v1082_v5 = vsel %vm273_vm0, %v949_v44, 0.0 }
 0x164   :  { %v1875_v9 = vadd.f32 %v4484_v31, %v1829_v17  ;;  %1444 = vadd.xlane.f32.xlu1 %v1443_v7  ;;  %v746_v7 = vadd.f32 %v4415_v37, %v3788_v2  ;;  %v2595_v2 = vld [vmem:[%s5482_s0 + $0x628] sm:$0xff]  ;;  %v1084_v30 = vadd.f32 %v1083_v15, %v1082_v5  ;;  %v2665_v5 = vld [vmem:[%s5482_s0 + $0x360] sm:$0xff] }
 0x165   :  { %1423 = vadd.xlane.f32.xlu0 %v1422_v22  ;;  %v4617_v61 = vpop.xlane.xlu1 %677  ;;  %v1767_v36 = vpop.xlane.xlu0 %1766  ;;  %v1272_v50 = vmul.f32 %v2595_v2, %v3551_v12  ;;  %v2666_v15 = vld [vmem:[%s5482_s0 + $0x368] sm:$0xff] }
 0x166   :  { %v1919_v24 = vmax.f32 %v1875_v9, 0.0  ;;  %v1851_v3 = vadd.f32 %v1767_v36, %v4421_v26  ;;  %v1061_v9 = vadd.f32 %v936_v58, %v935_v8  ;;  %v2639_v36 = vld [vmem:[%s5482_s0 + $0xd08] sm:$0xff] }
 0x168   :  { %v2051_v35 = vrot.slane %v1919_v24, %v4610_v59  ;;  %v1897_v26 = vadd.f32 %v4484_v31, %v1851_v3  ;;  %1787 = vadd.xlane.f32.xlu1 %v1786_v33  ;;  %v1257_v33 = vmul.f32 %v2580_v43, %v3548_v63  ;;  %v2624_v24 = vld [vmem:[%s5482_s0 + $0xad0] sm:$0xff]  ;;  %v2625_v3 = vld [vmem:[%s5482_s0 + $0xad8] sm:$0xff] }
 0x169   :  { %1719 = vadd.xlane.f32.xlu0 %v1718_v10  ;;  %v1042_v48 = vpop.xlane.xlu1 %1041  ;;  %v974_v34 = vpop.xlane.xlu0 %973 }
 0x16a   :  { %v4646_v56 = vsel %vm2052_vm2, %v2051_v35, %v4542_v13  ;;  %v1941_v37 = vmax.f32 %v1897_v26, 0.0  ;;  %v4648_v14 = vadd.f32 %v1042_v48, %v746_v7  ;;  %v4650_v22 = vadd.f32 %v974_v34, %v724_v45 }
 0x16b   :  { %v1271_v13 = vmul.f32 %v2594_v25, %v3548_v63  ;;  %v1357_v7 = vadd.f32 %v1258_v16, %v1257_v33  ;;  %v1301_v35 = vmul.f32 %v2624_v24, %v3548_v63  ;;  %v1302_v26 = vmul.f32 %v2625_v3, %v3551_v12  ;;  %v2680_v33 = vld [vmem:[%s5482_s0 + $0x598] sm:$0xff] }
 0x16c   :  { %v2186_v17 = vrot.slane %v1941_v37, %v4610_v59  ;;  %1017 = vadd.xlane.f32.xlu1 %v1016_v38  ;;  %v2678_v38 = vld [vmem:[%s5482_s0 + $0x548] sm:$0xff]  ;;  %v4705_v25 = vsub.s32 %v2054_v39, %v2794_v1  ;;  %v2709_v37 = vld [vmem:[%s5482_s0 + $0xa40] sm:$0xff] }
 0x16d   :  { %994 = vadd.xlane.f32.xlu0 %v993_v51  ;;  %v1406_v6 = vpop.xlane.xlu1 %1405  ;;  %v1338_v53 = vpop.xlane.xlu0 %1337  ;;  %v1378_v52 = vadd.f32 %v1272_v50, %v1271_v13  ;;  %v1636_v58 = vmul.f32 %v2678_v38, %v3703_v21  ;;  %v1624_v13 = vmul.f32 %v2666_v15, %v3703_v21  ;;  %v2710_v50 = vld [vmem:[%s5482_s0 + $0xa48] sm:$0xff]  ;;  %v1638_v38 = vmul.f32 %v2680_v33, %v3703_v21 }
 0x16e   :  { %v2187_v10 = vsel %vm2052_vm2, %v2186_v17, %v4573_v18  ;;  %v4672_v44 = vadd.f32 %v1406_v6, %v4443_v32  ;;  %v4675_v40 = vadd.f32 %v1338_v53, %v4445_v23  ;;  %v1315_v18 = vmul.f32 %v2638_v47, %v3548_v63  ;;  %v2677_v23 = vld [vmem:[%s5482_s0 + $0x540] sm:$0xff] }
 0x16f   :  { %v1316_v32 = vmul.f32 %v2639_v36, %v3551_v12  ;;  %v1635_v8 = vmul.f32 %v2677_v23, %v3697_v62  ;;  %v1425_v17 = vadd.f32 %v1302_v26, %v1301_v35  ;;  %v1667_v47 = vmul.f32 %v2709_v37, %v3697_v62  ;;  %v2721_v35 = vld [vmem:[%s5482_s0 + $0xc20] sm:$0xff]  ;;  %v2722_v26 = vld [vmem:[%s5482_s0 + $0xc28] sm:$0xff]  ;;  %v2497_v37 = vld [vmem:[%s5482_s0 + $0x4d0] sm:$0xff] }
 0x170   :  { %1085 = vadd.xlane.f32.xlu1 %v1084_v30  ;;  %v1623_v30 = vmul.f32 %v2665_v5, %v3697_v62  ;;  %v725_v36 = vadd.f32 %v4027_v60, %v3581_v42  ;;  %v1668_v39 = vmul.f32 %v2710_v50, %v3703_v21  ;;  %v2723_v42 = vld [vmem:[%s5482_s0 + $0xc70] sm:$0xff]  ;;  %v2724_v60 = vld [vmem:[%s5482_s0 + $0xc78] sm:$0xff]  ;;  %v893_v33 = vmul.f32 %v2497_v37, %v3463_v28 }
 0x171   :  { %1062 = vadd.xlane.f32.xlu0 %v1061_v9  ;;  %v1770_v51 = vpop.xlane.xlu1 %1769  ;;  %v1702_v45 = vpop.xlane.xlu0 %1701  ;;  %v2679_v9 = vld [vmem:[%s5482_s0 + $0x590] sm:$0xff]  ;;  %v1739_v16 = vadd.f32 %v1636_v58, %v1635_v8  ;;  %v1679_v58 = vmul.f32 %v2721_v35, %v3697_v62 }
 0x172   :  { %v1852_v48 = vadd.f32 %v1770_v51, %v4461_v11  ;;  %v1830_v34 = vadd.f32 %v1702_v45, %v4464_v19  ;;  %v1446_v19 = vadd.f32 %v1316_v32, %v1315_v18  ;;  %v1721_v32 = vadd.f32 %v1624_v13, %v1623_v30 }
 0x173   :  { %v1637_v23 = vmul.f32 %v2679_v9, %v3697_v62  ;;  %v2061_v30 = vadd.s32 4294967264, %v4448_v4 }
 0x174   :  { %v1898_v2 = vadd.f32 %v4484_v31, %v1852_v48  ;;  %v1876_v11 = vadd.f32 %v4484_v31, %v1830_v34  ;;  %1379 = vadd.xlane.f32.xlu1 %v1378_v52  ;;  %v747_v48 = vadd.f32 %v4537_v55, %v3813_v27  ;;  %v1681_v34 = vmul.f32 %v2723_v42, %v3697_v62  ;;  %v2542_v27 = vld [vmem:[%s5482_s0 + $0xbb8] sm:$0xff] }
 0x175   :  { %1358 = vadd.xlane.f32.xlu0 %v1357_v7  ;;  %v4712_v43 = vpop.xlane.xlu1 %698  ;;  %v4714_v46 = vpop.xlane.xlu0 %680  ;;  %v1742_v8 = vadd.f32 %v1638_v38, %v1637_v23  ;;  %v2640_v23 = vld [vmem:[%s5482_s0 + $0xd50] sm:$0xff]  ;;  %v2641_v38 = vld [vmem:[%s5482_s0 + $0xd58] sm:$0xff] }
 0x176   :  { %v1942_v6 = vmax.f32 %v1898_v2, 0.0  ;;  %v1920_v53 = vmax.f32 %v1876_v11, 0.0  ;;  %v1680_v2 = vmul.f32 %v2722_v26, %v3703_v21  ;;  %v2541_v11 = vld [vmem:[%s5482_s0 + $0xbb0] sm:$0xff] }
 0x177   :  { %v937_v50 = vmul.f32 %v2541_v11, %v3463_v28  ;;  %v2583_v28 = vld [vmem:[%s5482_s0 + $0x448] sm:$0xff] }
 0x178   :  { %v2191_v24 = vrot.slane %v1942_v6, %v4705_v25  ;;  %v2058_v3 = vrot.slane %v1920_v53, %v4705_v25  ;;  %1447 = vadd.xlane.f32.xlu1 %v1446_v19  ;;  %v938_v6 = vmul.f32 %v2542_v27, %v3466_v29  ;;  %v1807_v9 = vadd.f32 %v1680_v2, %v1679_v58  ;;  %v5529_v58 = vld [vmem:[#allocation6_spill] sm:$0xff]  ;;  %v5530_v2 = vld [vmem:[#allocation32_spill] sm:$0xff] }
 0x179   :  { %1426 = vadd.xlane.f32.xlu0 %v1425_v17  ;;  %v977_v52 = vpop.xlane.xlu1 %976  ;;  %v4733_v18 = vpop.xlane.xlu0 %701  ;;  %v2498_v17 = vld [vmem:[%s5482_s0 + $0x4d8] sm:$0xff]  ;;  %v726_v11 = vadd.f32 %v5530_v2, %v5529_v58 }
 0x17a   :  { %v4744_v51 = vsel %vm2059_vm3, %v2191_v24, %v2187_v10  ;;  %v4748_v45 = vsel %vm2059_vm3, %v2058_v3, %v4646_v56  ;;  %v4750_v7 = vadd.f32 %v977_v52, %v725_v36  ;;  %v1789_v10 = vadd.f32 %v1668_v39, %v1667_v47  ;;  %v2596_v47 = vld [vmem:[%s5482_s0 + $0x670] sm:$0xff]  ;;  %v2597_v36 = vld [vmem:[%s5482_s0 + $0x678] sm:$0xff]  ;;  %v2582_v39 = vld [vmem:[%s5482_s0 + $0x440] sm:$0xff] }
 0x17b   :  { %v1682_v56 = vmul.f32 %v2724_v60, %v3703_v21  ;;  %v1259_v26 = vmul.f32 %v2582_v39, %v3548_v63  ;;  %v5531_v39 = vld [vmem:[#allocation19_spill] sm:$0xff] }
 0x17c   :  { %1740 = vadd.xlane.f32.xlu1 %v1739_v16  ;;  %v894_v16 = vmul.f32 %v2498_v17, %v3466_v29  ;;  %v4803_v29 = vsub.s32 %v2061_v30, %v2794_v1 }
 0x17d   :  { %1722 = vadd.xlane.f32.xlu0 %v1721_v32  ;;  %v1341_v5 = vpop.xlane.xlu1 %1340  ;;  %v1045_v15 = vpop.xlane.xlu0 %1044  ;;  %v1810_v13 = vadd.f32 %v1682_v56, %v1681_v34  ;;  %v1064_v32 = vadd.f32 %v938_v6, %v937_v50  ;;  %v2626_v56 = vld [vmem:[%s5482_s0 + $0xb20] sm:$0xff] }
 0x17e   :  { %v4771_v55 = vadd.f32 %v1341_v5, %v4544_v0  ;;  %v4773_v19 = vadd.f32 %v1045_v15, %v747_v48  ;;  %v996_v35 = vadd.f32 %v894_v16, %v893_v33  ;;  %v1260_v48 = vmul.f32 %v2583_v28, %v3551_v12  ;;  %v2627_v5 = vld [vmem:[%s5482_s0 + $0xb28] sm:$0xff]  ;;  %v2667_v16 = vld [vmem:[%s5482_s0 + $0x3b0] sm:$0xff] }
 0x17f   :  { %v1317_v15 = vmul.f32 %v2640_v23, %v3548_v63  ;;  %v1303_v50 = vmul.f32 %v2626_v56, %v3548_v63  ;;  %v1304_v6 = vmul.f32 %v2627_v5, %v3551_v12  ;;  %v748_v28 = vadd.f32 %v4617_v61, %v5531_v39  ;;  %v2598_v56 = vld [vmem:[%s5482_s0 + $0x6c0] sm:$0x7]  ;;  %v2599_v5 = vld [vmem:[%s5482_s0 + $0x6c8] sm:$0x7] }
 0x180   :  { %1790 = vadd.xlane.f32.xlu1 %v1789_v10  ;;  %v1625_v61 = vmul.f32 %v2667_v16, %v3697_v62  ;;  %v2643_v16 = vld [vmem:[%s5482_s0 + $0xda8] sm:$0x7] }
 0x181   :  { %1743 = vadd.xlane.f32.xlu0 %v1742_v8  ;;  %v1705_v0 = vpop.xlane.xlu1 %1704  ;;  %v1409_v53 = vpop.xlane.xlu0 %1408  ;;  %v1318_v8 = vmul.f32 %v2641_v38, %v3551_v12 }
 0x182   :  { %v1831_v24 = vadd.f32 %v1705_v0, %v4576_v54  ;;  %v4794_v3 = vadd.f32 %v1409_v53, %v4578_v49  ;;  %v1273_v54 = vmul.f32 %v2596_v47, %v3548_v63  ;;  %v1274_v49 = vmul.f32 %v2597_v36, %v3551_v12  ;;  %v2681_v0 = vld [vmem:[%s5482_s0 + $0x5e0] sm:$0xff]  ;;  %v2682_v53 = vld [vmem:[%s5482_s0 + $0x5e8] sm:$0xff]  ;;  %v2668_v47 = vld [vmem:[%s5482_s0 + $0x3b8] sm:$0xff] }
 0x184   :  { %v1877_v52 = vadd.f32 %v4484_v31, %v1831_v24  ;;  %1811 = vadd.xlane.f32.xlu1 %v1810_v13  ;;  %v1381_v37 = vadd.f32 %v1274_v49, %v1273_v54  ;;  %v1360_v13 = vadd.f32 %v1260_v48, %v1259_v26  ;;  %v1449_v24 = vadd.f32 %v1318_v8, %v1317_v15  ;;  %v2725_v49 = vld [vmem:[%s5482_s0 + $0xcc0] sm:$0xff]  ;;  %v2711_v26 = vld [vmem:[%s5482_s0 + $0xa90] sm:$0xff]  ;;  %v2712_v48 = vld [vmem:[%s5482_s0 + $0xa98] sm:$0xff] }
 0x185   :  { %1808 = vadd.xlane.f32.xlu0 %v1807_v9  ;;  %v4814_v42 = vpop.xlane.xlu1 %683  ;;  %v1773_v60 = vpop.xlane.xlu0 %1772  ;;  %v1640_v54 = vmul.f32 %v2682_v53, %v3703_v21  ;;  %v2068_v8 = vadd.s32 4294967256, %v4448_v4  ;;  %v1683_v58 = vmul.f32 %v2725_v49, %v3697_v62 }
 0x186   :  { %v1921_v10 = vmax.f32 %v1877_v52, 0.0  ;;  %v1853_v34 = vadd.f32 %v1773_v60, %v4601_v20  ;;  %v1428_v60 = vadd.f32 %v1304_v6, %v1303_v50  ;;  %v2584_v50 = vld [vmem:[%s5482_s0 + $0x490] sm:$0xff]  ;;  %v2585_v6 = vld [vmem:[%s5482_s0 + $0x498] sm:$0xff] }
 0x188   :  { %v2065_v27 = vrot.slane %v1921_v10, %v4803_v29  ;;  %v1899_v20 = vadd.f32 %v4484_v31, %v1853_v34  ;;  %1065 = vadd.xlane.f32.xlu1 %v1064_v32  ;;  %v1639_v32 = vmul.f32 %v2681_v0, %v3697_v62 }
 0x189   :  { %997 = vadd.xlane.f32.xlu0 %v996_v35  ;;  %v980_v17 = vpop.xlane.xlu1 %979  ;;  %v4831_v30 = vpop.xlane.xlu0 %704  ;;  %v1626_v35 = vmul.f32 %v2668_v47, %v3703_v21  ;;  %v4911_v47 = vsub.s32 %v2068_v8, %v2794_v1 }
 0x18a   :  { %v1943_v9 = vmax.f32 %v1899_v20, 0.0  ;;  %v4841_v33 = vadd.f32 %v980_v17, %v726_v11  ;;  %v4851_v36 = vsel %vm2066_vm4, %v2065_v27, %v4748_v45  ;;  %v2726_v45 = vld [vmem:[%s5482_s0 + $0xcc8] sm:$0xff]  ;;  %v1745_v2 = vadd.f32 %v1640_v54, %v1639_v32 }
 0x18b   :  { %v1669_v11 = vmul.f32 %v2711_v26, %v3697_v62  ;;  %v1670_v27 = vmul.f32 %v2712_v48, %v3703_v21  ;;  %v1724_v17 = vadd.f32 %v1626_v35, %v1625_v61  ;;  %v2628_v61 = vld [vmem:[%s5482_s0 + $0xb70] sm:$0xff]  ;;  %v2629_v35 = vld [vmem:[%s5482_s0 + $0xb78] sm:$0xff]  ;;  %v5533_v48 = vld [vmem:[#allocation34_spill] sm:$0xff] }
 0x18c   :  { %v2196_v52 = vrot.slane %v1943_v9, %v4803_v29  ;;  %1382 = vadd.xlane.f32.xlu1 %v1381_v37  ;;  %v2642_v9 = vld [vmem:[%s5482_s0 + $0xda0] sm:$0x7]  ;;  %v5532_v26 = vld [vmem:[#allocation8_spill] sm:$0xff] }
 0x18d   :  { %1361 = vadd.xlane.f32.xlu0 %v1360_v13  ;;  %v1344_v23 = vpop.xlane.xlu1 %1343  ;;  %v1048_v38 = vpop.xlane.xlu0 %1047  ;;  %v1275_v13 = vmul.f32 %v2598_v56, %v3548_v63  ;;  %v727_v56 = vadd.f32 %v5533_v48, %v5532_v26  ;;  %v2728_v26 = vld [vmem:[%s5482_s0 + $0xd18] sm:$0xff] }
 0x18e   :  { %v4873_v10 = vadd.f32 %v1344_v23, %v4650_v22  ;;  %v4875_v34 = vadd.f32 %v1048_v38, %v748_v28  ;;  %v4885_v15 = vsel %vm2066_vm4, %v2196_v52, %v4744_v51  ;;  %v1684_v22 = vmul.f32 %v2726_v45, %v3703_v21 }
 0x18f   :  { %v1276_v51 = vmul.f32 %v2599_v5, %v3551_v12  ;;  %v1792_v28 = vadd.f32 %v1670_v27, %v1669_v11  ;;  %v1384_v54 = vsel %vm273_vm0, %v1275_v13, 0.0  ;;  %v1319_v45 = vmul.f32 %v2642_v9, %v3548_v63 }
 0x190   :  { %1450 = vadd.xlane.f32.xlu1 %v1449_v24  ;;  %v1813_v24 = vadd.f32 %v1684_v22, %v1683_v58  ;;  %v1320_v23 = vmul.f32 %v2643_v16, %v3551_v12  ;;  %v1306_v13 = vmul.f32 %v2629_v35, %v3551_v12  ;;  %v2727_v35 = vld [vmem:[%s5482_s0 + $0xd10] sm:$0xff] }
 0x191   :  { %1429 = vadd.xlane.f32.xlu0 %v1428_v60  ;;  %v1708_v20 = vpop.xlane.xlu1 %1707  ;;  %v1412_v37 = vpop.xlane.xlu0 %1411  ;;  %v1385_v49 = vsel %vm273_vm0, %v1276_v51, 0.0 }
 0x192   :  { %v1832_v0 = vadd.f32 %v1708_v20, %v4675_v40  ;;  %v4902_v53 = vadd.f32 %v1412_v37, %v4648_v14  ;;  %v1261_v40 = vmul.f32 %v2584_v50, %v3548_v63  ;;  %v1262_v14 = vmul.f32 %v2585_v6, %v3551_v12  ;;  %v2669_v6 = vld [vmem:[%s5482_s0 + $0x400] sm:$0xff] }
 0x193   :  { %v1386_v58 = vadd.f32 %v1385_v49, %v1384_v54  ;;  %v1452_v20 = vsel %vm273_vm0, %v1319_v45, 0.0  ;;  %v1453_v37 = vsel %vm273_vm0, %v1320_v23, 0.0 }
 0x194   :  { %v1878_v39 = vadd.f32 %v4484_v31, %v1832_v0  ;;  %1746 = vadd.xlane.f32.xlu1 %v1745_v2  ;;  %v1363_v22 = vadd.f32 %v1262_v14, %v1261_v40  ;;  %v2684_v2 = vld [vmem:[%s5482_s0 + $0x638] sm:$0xff]  ;;  %v2670_v0 = vld [vmem:[%s5482_s0 + $0x408] sm:$0xff]  ;;  %v1454_v45 = vadd.f32 %v1453_v37, %v1452_v20  ;;  %v1685_v37 = vmul.f32 %v2727_v35, %v3697_v62 }
 0x195   :  { %1725 = vadd.xlane.f32.xlu0 %v1724_v17  ;;  %v4916_v52 = vpop.xlane.xlu1 %686  ;;  %v1776_v32 = vpop.xlane.xlu0 %1775  ;;  %v1305_v17 = vmul.f32 %v2628_v61, %v3548_v63  ;;  %v5536_v14 = vld [vmem:[#allocation14_spill] sm:$0xff]  ;;  %v1628_v61 = vmul.f32 %v2670_v0, %v3703_v21 }
 0x196   :  { %v1922_v38 = vmax.f32 %v1878_v39, 0.0  ;;  %v1854_v60 = vadd.f32 %v1776_v32, %v4672_v44  ;;  %v2683_v44 = vld [vmem:[%s5482_s0 + $0x630] sm:$0xff]  ;;  %v5534_v39 = vld [vmem:[#allocation13_spill] sm:$0xff] }
 0x197   :  { %v1641_v16 = vmul.f32 %v2683_v44, %v3697_v62  ;;  %v5537_v32 = vld [vmem:[#allocation40_spill] sm:$0xff]  ;;  %v5538_v44 = vld [vmem:[#allocation27_spill] sm:$0xff] }
 0x198   :  { %v2072_v5 = vrot.slane %v1922_v38, %v4911_v47  ;;  %v1900_v8 = vadd.f32 %v4484_v31, %v1854_v60  ;;  %1814 = vadd.xlane.f32.xlu1 %v1813_v24  ;;  %v1642_v24 = vmul.f32 %v2684_v2, %v3703_v21  ;;  %v733_v54 = vadd.f32 %v5537_v32, %v5536_v14 }
 0x199   :  { %1793 = vadd.xlane.f32.xlu0 %v1792_v28  ;;  %v983_v11 = vpop.xlane.xlu1 %982  ;;  %v4939_v27 = vpop.xlane.xlu0 %707  ;;  %v5535_v28 = vld [vmem:[#allocation39_spill] sm:$0xff]  ;;  %v1431_v60 = vadd.f32 %v1306_v13, %v1305_v17  ;;  %v755_v2 = vadd.f32 %v4712_v43, %v5538_v44  ;;  %v1686_v17 = vmul.f32 %v2728_v26, %v3703_v21  ;;  %v2630_v43 = vld [vmem:[%s5482_s0 + $0xbc0] sm:$0xff] }
 0x19a   :  { %v1944_v51 = vmax.f32 %v1900_v8, 0.0  ;;  %v4945_v50 = vadd.f32 %v983_v11, %v727_v56  ;;  %v4955_v9 = vsel %vm2073_vm5, %v2072_v5, %v4851_v36  ;;  %v734_v40 = vadd.f32 %v5535_v28, %v5534_v39  ;;  %v2713_v5 = vld [vmem:[%s5482_s0 + $0xae0] sm:$0xff]  ;;  %v2714_v8 = vld [vmem:[%s5482_s0 + $0xae8] sm:$0xff] }
 0x19b   :  { %v1627_v36 = vmul.f32 %v2669_v6, %v3697_v62  ;;  %v5539_v11 = vld [vmem:[#allocation21_spill] sm:$0xff]  ;;  %v1671_v0 = vmul.f32 %v2713_v5, %v3697_v62  ;;  %v2587_v28 = vld [vmem:[%s5482_s0 + $0x4e8] sm:$0xff]  ;;  %v1816_v32 = vadd.f32 %v1686_v17, %v1685_v37  ;;  %v2671_v5 = vld [vmem:[%s5482_s0 + $0x450] sm:$0xff] }
 0x19c   :  { %v2201_v49 = vrot.slane %v1944_v51, %v4911_v47  ;;  %1387 = vadd.xlane.f32.xlu1 %v1386_v58  ;;  %v749_v20 = vadd.f32 %v4714_v46, %v5539_v11  ;;  %v2631_v46 = vld [vmem:[%s5482_s0 + $0xbc8] sm:$0xff]  ;;  %v2586_v39 = vld [vmem:[%s5482_s0 + $0x4e0] sm:$0xff]  ;;  %v2687_v11 = vld [vmem:[%s5482_s0 + $0x6d0] sm:$0x7] }
 0x19d   :  { %1364 = vadd.xlane.f32.xlu0 %v1363_v22  ;;  %v1004_v23 = vpop.xlane.xlu1 %1003  ;;  %v1001_v38 = vpop.xlane.xlu0 %1000  ;;  %v1748_v22 = vadd.f32 %v1642_v24, %v1641_v16  ;;  %v1727_v6 = vadd.f32 %v1628_v61, %v1627_v36  ;;  %v1264_v36 = vmul.f32 %v2587_v28, %v3551_v12  ;;  %v2685_v61 = vld [vmem:[%s5482_s0 + $0x680] sm:$0xff]  ;;  %v2716_v28 = vld [vmem:[%s5482_s0 + $0xb38] sm:$0xff] }
 0x19e   :  { %v4972_v48 = vadd.f32 %v1004_v23, %v734_v40  ;;  %v4974_v56 = vadd.f32 %v1001_v38, %v733_v54  ;;  %v4984_v58 = vsel %vm2073_vm5, %v2201_v49, %v4885_v15  ;;  %v1672_v15 = vmul.f32 %v2714_v8, %v3703_v21  ;;  %v5540_v40 = vld [vmem:[#allocation26_spill] sm:$0xff] }
 0x19f   :  { %v756_v14 = vadd.f32 %v4733_v18, %v5540_v40  ;;  %v1307_v54 = vmul.f32 %v2630_v43, %v3548_v63  ;;  %v1308_v49 = vmul.f32 %v2631_v46, %v3551_v12  ;;  %v2686_v18 = vld [vmem:[%s5482_s0 + $0x688] sm:$0xff]  ;;  %v2075_v12 = vadd.s32 4294967248, %v4448_v4 }
 0x1a0   :  { %1455 = vadd.xlane.f32.xlu1 %v1454_v45  ;;  %v1795_v38 = vadd.f32 %v1672_v15, %v1671_v0  ;;  %v1644_v44 = vmul.f32 %v2686_v18, %v3703_v21  ;;  %v2761_v0 = vmov 0.0   ;;  %v1976_v15 = vld [vmem:[%s5485_s3 + $0x78] sm:$0xff] }
 0x1a1   :  { %1432 = vadd.xlane.f32.xlu0 %v1431_v60  ;;  %v1069_v13 = vpop.xlane.xlu1 %1068  ;;  %v1051_v51 = vpop.xlane.xlu0 %1050  ;;  %v1263_v60 = vmul.f32 %v2586_v39, %v3548_v63  ;;  %v2672_v63 = vld [vmem:[%s5482_s0 + $0x458] sm:$0xff]  ;;  %v1434_v8 = vadd.f32 %v1308_v49, %v1307_v54  ;;  %2292 = vmatprep.subr.mxu0 %v2761_v0  ;;  %v2715_v39 = vld [vmem:[%s5482_s0 + $0xb30] sm:$0xff]  ;;  %v2078_v40 = vsub.s32 %v2075_v12, %v2794_v1  ;;  %v1974_v54 = vld [vmem:[%s5485_s3 + $0x68] sm:$0xff] }
 0x1a2   :  { %v5000_v16 = vadd.f32 %v1069_v13, %v755_v2  ;;  %v5002_v24 = vadd.f32 %v1051_v51, %v749_v20  ;;  %v2730_v2 = vld [vmem:[%s5482_s0 + $0xd68] sm:$0xff]  ;;  %v1629_v13 = vmul.f32 %v2671_v5, %v3697_v62  ;;  %v1630_v51 = vmul.f32 %v2672_v63, %v3703_v21  ;;  %2293 = vmatpush1.msra.mxu0 %v1976_v15  ;;  %v2732_v63 = vld [vmem:[%s5482_s0 + $0xdb8] sm:$0x7] }
 0x1a3   :  { %v1366_v17 = vadd.f32 %v1264_v36, %v1263_v60  ;;  %2294 = vmatprep.subr.mxu0 %v2761_v0  ;;  %v1673_v18 = vmul.f32 %v2715_v39, %v3697_v62  ;;  %v1674_v5 = vmul.f32 %v2716_v28, %v3703_v21  ;;  %v5541_v12 = vld [vmem:[#allocation7_spill] sm:$0xff]  ;;  %v1690_v15 = vmul.f32 %v2732_v63, %v3703_v21  ;;  %v5545_v63 = vld [vmem:[#allocation20_spill] sm:$0xff] }
 0x1a4   :  { %1749 = vadd.xlane.f32.xlu1 %v1748_v22  ;;  %v1643_v22 = vmul.f32 %v2685_v61, %v3697_v62  ;;  %v1730_v61 = vadd.f32 %v1630_v51, %v1629_v13 }
 0x1a5   :  { %1728 = vadd.xlane.f32.xlu0 %v1727_v6  ;;  %v1347_v45 = vpop.xlane.xlu1 %1346  ;;  %v1072_v23 = vpop.xlane.xlu0 %1071  ;;  %v2688_v6 = vld [vmem:[%s5482_s0 + $0x6d8] sm:$0x7]  ;;  %v1798_v28 = vadd.f32 %v1674_v5, %v1673_v18  ;;  %v1971_v5 = vld [vmem:[%s5485_s3 + $0x50] sm:$0xff] }
 0x1a6   :  { %v5023_v35 = vadd.f32 %v1347_v45, %v4750_v7  ;;  %v5025_v26 = vadd.f32 %v1072_v23, %v756_v14  ;;  %v2729_v7 = vld [vmem:[%s5482_s0 + $0xd60] sm:$0xff]  ;;  %v1751_v45 = vadd.f32 %v1644_v44, %v1643_v22  ;;  %v1646_v23 = vmul.f32 %v2688_v6, %v3703_v21 }
 0x1a7   :  { %v1687_v14 = vmul.f32 %v2729_v7, %v3697_v62 }
 0x1a8   :  { %1817 = vadd.xlane.f32.xlu1 %v1816_v32  ;;  %v1688_v32 = vmul.f32 %v2730_v2, %v3703_v21  ;;  %v2673_v2 = vld [vmem:[%s5482_s0 + $0x4a0] sm:$0xff]  ;;  %v1755_v6 = vsel %vm273_vm0, %v1646_v23, 0.0 }
 0x1a9   :  { %1796 = vadd.xlane.f32.xlu0 %v1795_v38  ;;  %v1711_v20 = vpop.xlane.xlu1 %1710  ;;  %v1415_v37 = vpop.xlane.xlu0 %1414  ;;  %v2731_v38 = vld [vmem:[%s5482_s0 + $0xdb0] sm:$0x7] }
 0x1aa   :  { %v1833_v43 = vadd.f32 %v1711_v20, %v4771_v55  ;;  %v5056_v46 = vadd.f32 %v1415_v37, %v4773_v19  ;;  %v1645_v55 = vmul.f32 %v2687_v11, %v3697_v62  ;;  %v1975_v19 = vld [vmem:[%s5485_s3 + $0x70] sm:$0xff]  ;;  %v2674_v11 = vld [vmem:[%s5482_s0 + $0x4a8] sm:$0xff]  ;;  %v1819_v20 = vadd.f32 %v1688_v32, %v1687_v14 }
 0x1ab   :  { %2295 = vmatpush1.msra.mxu0 %v1975_v19  ;;  %v1631_v14 = vmul.f32 %v2673_v2, %v3697_v62  ;;  %v1632_v32 = vmul.f32 %v2674_v11, %v3703_v21 }
 0x1ac   :  { %v1879_v49 = vadd.f32 %v4484_v31, %v1833_v43  ;;  %1435 = vadd.xlane.f32.xlu1 %v1434_v8  ;;  %2296 = vmatprep.subr.mxu0 %v2761_v0  ;;  %v5542_v8 = vld [vmem:[#allocation33_spill] sm:$0xff]  ;;  %v1754_v37 = vsel %vm273_vm0, %v1645_v55, 0.0 }
 0x1ad   :  { %1367 = vadd.xlane.f32.xlu0 %v1366_v17  ;;  %v5080_v60 = vpop.xlane.xlu1 %689  ;;  %v1779_v36 = vpop.xlane.xlu0 %1778  ;;  %v728_v22 = vadd.f32 %v5542_v8, %v5541_v12  ;;  %2297 = vmatpush1.msra.mxu0 %v1974_v54  ;;  %v1689_v17 = vmul.f32 %v2731_v38, %v3697_v62  ;;  %v1972_v55 = vld [vmem:[%s5485_s3 + $0x58] sm:$0xff]  ;;  %v1756_v18 = vadd.f32 %v1755_v6, %v1754_v37 }
 0x1ae   :  { %v1923_v44 = vmax.f32 %v1879_v49, 0.0  ;;  %v1855_v7 = vadd.f32 %v1779_v36, %v4794_v3  ;;  %2298 = vmatprep.subr.mxu0 %v2761_v0  ;;  %v1973_v3 = vld [vmem:[%s5485_s3 + $0x60] sm:$0xff]  ;;  %v5543_v38 = vld [vmem:[#allocation16_spill] sm:$0xff]  ;;  %v750_v12 = vadd.f32 %v4814_v42, %v5545_v63  ;;  %v1733_v2 = vadd.f32 %v1632_v32, %v1631_v14 }
 0x1af   :  { %2299 = vmatpush1.msra.mxu0 %v1973_v3  ;;  %v2717_v49 = vld [vmem:[%s5482_s0 + $0xb80] sm:$0xff]  ;;  %v2719_v3 = vld [vmem:[%s5482_s0 + $0xbd0] sm:$0xff]  ;;  %v2720_v42 = vld [vmem:[%s5482_s0 + $0xbd8] sm:$0xff] }
 0x1b0   :  { %v2079_v13 = vrot.slane %v1923_v44, %v2078_v40  ;;  %v1901_v51 = vadd.f32 %v4484_v31, %v1855_v7  ;;  %1752 = vadd.xlane.f32.xlu1 %v1751_v45  ;;  %2300 = vmatprep.subr.mxu0 %v2761_v0  ;;  %v2718_v45 = vld [vmem:[%s5482_s0 + $0xb88] sm:$0xff]  ;;  %v1675_v11 = vmul.f32 %v2717_v49, %v3697_v62 }
 0x1b1   :  { %1731 = vadd.xlane.f32.xlu0 %v1730_v61  ;;  %v986_v43 = vpop.xlane.xlu1 %985  ;;  %v5106_v39 = vpop.xlane.xlu0 %710  ;;  %2301 = vmatpush1.msra.mxu0 %v1972_v55  ;;  %v5544_v36 = vld [vmem:[#allocation42_spill] sm:$0xff]  ;;  %v1676_v37 = vmul.f32 %v2718_v45, %v3703_v21  ;;  %v1677_v32 = vmul.f32 %v2719_v3, %v3697_v62  ;;  %v1678_v55 = vmul.f32 %v2720_v42, %v3703_v21  ;;  %v1963_v3 = vld [vmem:[%s5485_s3 + $0x10] sm:$0xff] }
 0x1b2   :  { %v1945_v19 = vmax.f32 %v1901_v51, 0.0  ;;  %v5114_v54 = vadd.f32 %v986_v43, %v728_v22  ;;  %v5124_v23 = vsel %vm2080_vm6, %v2079_v13, %v4955_v9  ;;  %v735_v61 = vadd.f32 %v5544_v36, %v5543_v38  ;;  %2302 = vmatprep.subr.mxu0 %v2761_v0  ;;  %v2675_v13 = vld [vmem:[%s5482_s0 + $0x4f0] sm:$0xff]  ;;  %v2676_v51 = vld [vmem:[%s5482_s0 + $0x4f8] sm:$0xff]  ;;  %v1969_v43 = vld [vmem:[%s5485_s3 + $0x40] sm:$0xff] }
 0x1b3   :  { %v1822_v22 = vsel %vm273_vm0, %v1689_v17, 0.0  ;;  %v1823_v9 = vsel %vm273_vm0, %v1690_v15, 0.0  ;;  %2303 = vmatpush1.msra.mxu0 %v1971_v5  ;;  %v1801_v49 = vadd.f32 %v1676_v37, %v1675_v11  ;;  %v1633_v45 = vmul.f32 %v2675_v13, %v3697_v62  ;;  %v1967_v62 = vld [vmem:[%s5485_s3 + $0x30] sm:$0xff]  ;;  %v5547_v42 = vld [vmem:[#allocation10_spill] sm:$0xff] }
 0x1b4   :  { %v2206_v8 = vrot.slane %v1945_v19, %v2078_v40  ;;  %1820 = vadd.xlane.f32.xlu1 %v1819_v20  ;;  %2304 = vmatprep.subr.mxu0 %v2761_v0  ;;  %v1970_v40 = vld [vmem:[%s5485_s3 + $0x48] sm:$0xff]  ;;  %v1824_v15 = vadd.f32 %v1823_v9, %v1822_v22  ;;  %v1634_v38 = vmul.f32 %v2676_v51, %v3703_v21  ;;  %v2082_v21 = vadd.s32 4294967240, %v4448_v4  ;;  %v1965_v9 = vld [vmem:[%s5485_s3 + $0x20] sm:$0xff] }
 0x1b5   :  { %1799 = vadd.xlane.f32.xlu0 %v1798_v28  ;;  %v1054_v44 = vpop.xlane.xlu1 %1053  ;;  %v1007_v7 = vpop.xlane.xlu0 %1006  ;;  %2305 = vmatpush1.msra.mxu0 %v1970_v40  ;;  %v5546_v28 = vld [vmem:[#allocation29_spill] sm:$0xff]  ;;  %v5548_v40 = vld [vmem:[#allocation36_spill] sm:$0xff] }
 0x1b6   :  { %v5148_v20 = vadd.f32 %v1054_v44, %v750_v12  ;;  %v5150_v17 = vadd.f32 %v1007_v7, %v735_v61  ;;  %v5160_v6 = vsel %vm2080_vm6, %v2206_v8, %v4984_v58  ;;  %2306 = vmatprep.subr.mxu0 %v2761_v0  ;;  %v757_v14 = vadd.f32 %v4831_v30, %v5546_v28  ;;  %v1968_v30 = vld [vmem:[%s5485_s3 + $0x38] sm:$0xff] }
 0x1b7   :  { %2307 = vmatpush1.msra.mxu0 %v1969_v43  ;;  %v1736_v12 = vadd.f32 %v1634_v38, %v1633_v45  ;;  %v2085_v44 = vsub.s32 %v2082_v21, %v2794_v1  ;;  %v729_v13 = vadd.f32 %v5548_v40, %v5547_v42  ;;  %v5551_v38 = vld [vmem:[#allocation23_spill] sm:$0xff] }
 0x1b8   :  { %1757 = vadd.xlane.f32.xlu1 %v1756_v18  ;;  %2308 = vmatprep.subr.mxu0 %v2761_v0  ;;  %v1804_v18 = vadd.f32 %v1678_v55, %v1677_v32 }
 0x1b9   :  { %1734 = vadd.xlane.f32.xlu0 %v1733_v2  ;;  %v1350_v19 = vpop.xlane.xlu1 %1349  ;;  %v1075_v58 = vpop.xlane.xlu0 %1074  ;;  %2309 = vmatpush1.msra.mxu0 %v1968_v30  ;;  %v751_v30 = vadd.f32 %v4916_v52, %v5551_v38  ;;  %v1981_v52 = vld [vmem:[%s5485_s3 + $0xa0] sm:$0xff]  ;;  %v5554_v38 = vld [vmem:[#allocation44_spill] sm:$0xff] }
 0x1ba   :  { %v5177_v36 = vadd.f32 %v1350_v19, %v4841_v33  ;;  %v5179_v61 = vadd.f32 %v1075_v58, %v757_v14  ;;  %2310 = vmatprep.subr.mxu0 %v2761_v0  ;;  %v1966_v33 = vld [vmem:[%s5485_s3 + $0x28] sm:$0xff]  ;;  %v1961_v19 = vld [vmem:[%s5485_s3] sm:$0xff] }
 0x1bb   :  { %2311 = vmatpush1.msra.mxu0 %v1967_v62  ;;  %v5549_v58 = vld [vmem:[#allocation15_spill] sm:$0xff] }
 0x1bc   :  { %1825 = vadd.xlane.f32.xlu1 %v1824_v15  ;;  %2312 = vmatprep.subr.mxu0 %v2761_v0 }
 0x1bd   :  { %1802 = vadd.xlane.f32.xlu0 %v1801_v49  ;;  %v1714_v5 = vpop.xlane.xlu1 %1713  ;;  %v1418_v63 = vpop.xlane.xlu0 %1417  ;;  %2313 = vmatpush1.msra.mxu0 %v1966_v33  ;;  %v5550_v49 = vld [vmem:[#allocation41_spill] sm:$0xff]  ;;  %v5552_v33 = vld [vmem:[#allocation28_spill] sm:$0xff] }
 0x1be   :  { %v1834_v8 = vadd.f32 %v1714_v5, %v4873_v10  ;;  %v5192_v22 = vadd.f32 %v1418_v63, %v4875_v34  ;;  %2314 = vmatprep.subr.mxu0 %v2761_v0  ;;  %v1964_v34 = vld [vmem:[%s5485_s3 + $0x18] sm:$0xff]  ;;  %v736_v45 = vadd.f32 %v5550_v49, %v5549_v58 }
 0x1bf   :  { %2315 = vmatpush1.msra.mxu0 %v1965_v9 }
 0x1c0   :  { %v1880_v7 = vadd.f32 %v4484_v31, %v1834_v8  ;;  %1805 = vadd.xlane.f32.xlu1 %v1804_v18  ;;  %2316 = vmatprep.subr.mxu0 %v2761_v0  ;;  %v758_v8 = vadd.f32 %v4939_v27, %v5552_v33  ;;  %v1979_v27 = vld [vmem:[%s5485_s3 + $0x90] sm:$0xff] }
 0x1c1   :  { %1737 = vadd.xlane.f32.xlu0 %v1736_v12  ;;  %v5200_v2 = vpop.xlane.xlu1 %692  ;;  %v1782_v10 = vpop.xlane.xlu0 %1781  ;;  %2317 = vmatpush1.msra.mxu0 %v1964_v34 }
 0x1c2   :  { %v1924_v11 = vmax.f32 %v1880_v7, 0.0  ;;  %v1856_v37 = vadd.f32 %v1782_v10, %v4902_v53  ;;  %2318 = vmatprep.subr.mxu0 %v2761_v0  ;;  %v1962_v53 = vld [vmem:[%s5485_s3 + $0x8] sm:$0xff]  ;;  %v1980_v7 = vld [vmem:[%s5485_s3 + $0x98] sm:$0xff] }
 0x1c3   :  { %2319 = vmatpush1.msra.mxu0 %v1963_v3 }
 0x1c4   :  { %v2086_v51 = vrot.slane %v1924_v11, %v2085_v44  ;;  %v1902_v15 = vadd.f32 %v4484_v31, %v1856_v37  ;;  %2320 = vmatprep.subr.mxu0 %v2761_v0  ;;  %v1978_v37 = vld [vmem:[%s5485_s3 + $0x88] sm:$0xff] }
 0x1c5   :  { %v989_v43 = vpop.xlane.xlu1 %988  ;;  %v5214_v28 = vpop.xlane.xlu0 %715  ;;  %2321 = vmatpush1.msra.mxu0 %v1962_v53 }
 0x1c6   :  { %v1946_v14 = vmax.f32 %v1902_v15, 0.0  ;;  %v5220_v32 = vadd.f32 %v989_v43, %v729_v13  ;;  %v5224_v55 = vsel %vm2087_vm7, %v2086_v51, %v5124_v23  ;;  %2322 = vmatprep.subr.mxu0 %v2761_v0  ;;  %v1982_v23 = vld [vmem:[%s5485_s3 + $0xa8] sm:$0x7]  ;;  %v2089_v43 = vadd.s32 4294967232, %v4448_v4 }
 0x1c7   :  { %2323 = vmatpush1.msra.mxu0 %v1961_v19 }
 0x1c8   :  { %v2211_v62 = vrot.slane %v1946_v14, %v2085_v44  ;;  %2344 = vmatprep.subr.mxu0 %v2761_v0 }
 0x1c9   :  { %v1057_v21 = vpop.xlane.xlu1 %1056  ;;  %v1010_v18 = vpop.xlane.xlu0 %1009  ;;  %2735 = vmatpush2.msk.msra.mxu0 %vm273_vm0, %v1982_v23  ;;  %vm2286_vm0 = vcmask 351232  }
 0x1ca   :  { %v5238_v5 = vadd.f32 %v1057_v21, %v751_v30  ;;  %v5240_v63 = vadd.f32 %v1010_v18, %v736_v45  ;;  %v2212_v12 = vsel %vm2087_vm7, %v2211_v62, %v5160_v6  ;;  %2346 = vmatprep.subr.mxu0 %v2761_v0  ;;  %v5553_v45 = vld [vmem:[#allocation18_spill] sm:$0xff]  ;;  %v5555_v21 = vld [vmem:[#allocation9_spill] sm:$0xff] }
 0x1cb   :  { %2347 = vmatpush2.msra.mxu0 %v1981_v52  ;;  %v737_v30 = vadd.f32 %v5554_v38, %v5553_v45  ;;  %v5559_v45 = vld [vmem:[#allocation17_spill] sm:$0xff]  ;;  %v5560_v38 = vld [vmem:[#allocation43_spill] sm:$0xff] }
 0x1cc   :  { %2348 = vmatprep.subr.mxu0 %v2761_v0 }
 0x1cd   :  { %v1353_v9 = vpop.xlane.xlu1 %1352  ;;  %v1078_v44 = vpop.xlane.xlu0 %1077  ;;  %2349 = vmatpush2.msra.mxu0 %v1980_v7 }
 0x1ce   :  { %v5256_v6 = vadd.f32 %v1353_v9, %v4945_v50  ;;  %v5258_v10 = vadd.f32 %v1078_v44, %v758_v8  ;;  %2350 = vmatprep.subr.mxu0 %v2761_v0  ;;  %v1977_v50 = vld [vmem:[%s5485_s3 + $0x80] sm:$0xff] }
 0x1cf   :  { %2351 = vmatpush2.msra.mxu0 %v1979_v27 }
 0x1d0   :  { %2352 = vmatprep.subr.mxu0 %v2761_v0 }
 0x1d1   :  { %v1374_v34 = vpop.xlane.xlu1 %1373  ;;  %v1371_v11 = vpop.xlane.xlu0 %1370  ;;  %2353 = vmatpush2.msra.mxu0 %v1978_v37 }
 0x1d2   :  { %v5272_v3 = vadd.f32 %v1374_v34, %v4972_v48  ;;  %v5275_v42 = vadd.f32 %v1371_v11, %v4974_v56  ;;  %2354 = vmatprep.subr.mxu0 %v2761_v0  ;;  %v2092_v0 = vsub.s32 %v2089_v43, %v2794_v1  ;;  %v5558_v34 = vld [vmem:[#allocation22_spill] sm:$0xff] }
 0x1d3   :  { %2355 = vmatpush2.msra.mxu0 %v1977_v50  ;;  %v752_v11 = vadd.f32 %v5080_v60, %v5558_v34 }
 0x1d5   :  { %v1439_v40 = vpop.xlane.xlu1 %1438  ;;  %v1421_v13 = vpop.xlane.xlu0 %1420 }
 0x1d6   :  { %v5279_v51 = vadd.f32 %v1439_v40, %v5000_v16  ;;  %v5282_v15 = vadd.f32 %v1421_v13, %v5002_v24 }
 0x1d9   :  { %v1717_v53 = vpop.xlane.xlu1 %1716  ;;  %v1442_v48 = vpop.xlane.xlu0 %1441 }
 0x1da   :  { %v1835_v14 = vadd.f32 %v1717_v53, %v5023_v35  ;;  %v5287_v56 = vadd.f32 %v1442_v48, %v5025_v26  ;;  %v5556_v26 = vld [vmem:[#allocation35_spill] sm:$0xff] }
 0x1db   :  { %v730_v18 = vadd.f32 %v5556_v26, %v5555_v21 }
 0x1dc   :  { %v1881_v19 = vadd.f32 %v4484_v31, %v1835_v14 }
 0x1dd   :  { %v5291_v58 = vpop.xlane.xlu1 %695  ;;  %v1785_v16 = vpop.xlane.xlu0 %1784 }
 0x1de   :  { %v1925_v49 = vmax.f32 %v1881_v19, 0.0  ;;  %v1857_v24 = vadd.f32 %v1785_v16, %v5056_v46  ;;  %v5557_v46 = vld [vmem:[#allocation31_spill] sm:$0xff] }
 0x1df   :  { %v759_v7 = vadd.f32 %v5106_v39, %v5557_v46 }
 0x1e0   :  { %v2093_v62 = vrot.slane %v1925_v49, %v2092_v0  ;;  %v1903_v35 = vadd.f32 %v4484_v31, %v1857_v24 }
 0x1e1   :  { %v1013_v23 = vpop.xlane.xlu1 %1012 }
 0x1e2   :  { %v1947_v52 = vmax.f32 %v1903_v35, 0.0  ;;  %v5299_v33 = vadd.f32 %v1013_v23, %v737_v30  ;;  %v992_v8 = vpop.xlane.xlu0 %991  ;;  %v2095_v9 = vsel %vm2094_vm8, %v2093_v62, %v5224_v55  ;;  %v5561_v62 = vld [vmem:[#allocation12_spill] sm:$0xff]  ;;  %v5562_v35 = vld [vmem:[#allocation38_spill] sm:$0xff] }
 0x1e3   :  { %v5303_v44 = vadd.f32 %v992_v8, %v730_v18  ;;  %v731_v21 = vadd.f32 %v5562_v35, %v5561_v62 }
 0x1e4   :  { %v2216_v27 = vrot.slane %v1947_v52, %v2092_v0 }
 0x1e5   :  { %v1081_v37 = vpop.xlane.xlu1 %1080 }
 0x1e6   :  { %v5309_v50 = vadd.f32 %v1081_v37, %v759_v7  ;;  %v1060_v40 = vpop.xlane.xlu0 %1059  ;;  %v2217_v13 = vsel %vm2094_vm8, %v2216_v27, %v2212_v12  ;;  %v2096_v12 = vadd.s32 4294967224, %v4448_v4  ;;  %v5564_v27 = vld [vmem:[#allocation25_spill] sm:$0xff] }
 0x1e7   :  { %v5312_v43 = vadd.f32 %v1060_v40, %v752_v11  ;;  %v753_v34 = vadd.f32 %v5200_v2, %v5564_v27 }
 0x1e8   :  { %v2099_v30 = vsub.s32 %v2096_v12, %v2794_v1 }
 0x1e9   :  { %v1377_v53 = vpop.xlane.xlu1 %1376 }
 0x1ea   :  { %v5315_v55 = vadd.f32 %v1377_v53, %v5150_v17  ;;  %v1356_v48 = vpop.xlane.xlu0 %1355 }
 0x1eb   :  { %v5318_v14 = vadd.f32 %v1356_v48, %v5114_v54  ;;  %v738_v54 = vadd.f32 %v5560_v38, %v5559_v45  ;;  %v2103_v38 = vadd.s32 4294967216, %v4448_v4 }
 0x1ed   :  { %v1445_v39 = vpop.xlane.xlu1 %1444 }
 0x1ee   :  { %v5321_v0 = vadd.f32 %v1445_v39, %v5179_v61  ;;  %v1424_v60 = vpop.xlane.xlu0 %1423 }
 0x1ef   :  { %v5324_v19 = vadd.f32 %v1424_v60, %v5148_v20 }
 0x1f1   :  { %v1788_v16 = vpop.xlane.xlu1 %1787 }
 0x1f2   :  { %v1858_v49 = vadd.f32 %v1788_v16, %v5192_v22  ;;  %v1720_v24 = vpop.xlane.xlu0 %1719 }
 0x1f3   :  { %v1836_v17 = vadd.f32 %v1720_v24, %v5177_v36  ;;  %v5563_v36 = vld [vmem:[#allocation30_spill] sm:$0xff] }
 0x1f4   :  { %v1904_v61 = vadd.f32 %v4484_v31, %v1858_v49  ;;  %v760_v46 = vadd.f32 %v5214_v28, %v5563_v36 }
 0x1f5   :  { %v1882_v20 = vadd.f32 %v4484_v31, %v1836_v17  ;;  %v1018_v26 = vpop.xlane.xlu1 %1017 }
 0x1f6   :  { %v1948_v18 = vmax.f32 %v1904_v61, 0.0  ;;  %v5336_v23 = vadd.f32 %v1018_v26, %v738_v54  ;;  %v995_v22 = vpop.xlane.xlu0 %994 }
 0x1f7   :  { %v1926_v52 = vmax.f32 %v1882_v20, 0.0  ;;  %v5338_v8 = vadd.f32 %v995_v22, %v731_v21 }
 0x1f8   :  { %v2221_v7 = vrot.slane %v1948_v18, %v2099_v30 }
 0x1f9   :  { %v2100_v11 = vrot.slane %v1926_v52, %v2099_v30  ;;  %v1086_v37 = vpop.xlane.xlu1 %1085 }
 0x1fa   :  { %v5344_v40 = vadd.f32 %v1086_v37, %v760_v46  ;;  %v1063_v53 = vpop.xlane.xlu0 %1062  ;;  %v2222_v48 = vsel %vm2101_vm9, %v2221_v7, %v2217_v13 }
 0x1fb   :  { %v5346_v39 = vadd.f32 %v1063_v53, %v753_v34  ;;  %v2102_v60 = vsel %vm2101_vm9, %v2100_v11, %v2095_v9 }
 0x1fd   :  { %v1380_v12 = vpop.xlane.xlu1 %1379 }
 0x1fe   :  { %v5349_v16 = vadd.f32 %v1380_v12, %v5240_v63  ;;  %v1359_v49 = vpop.xlane.xlu0 %1358 }
 0x1ff   :  { %v5352_v28 = vadd.f32 %v1359_v49, %v5220_v32  ;;  %v2106_v32 = vsub.s32 %v2103_v38, %v2794_v1 }
 0x201   :  { %v1448_v24 = vpop.xlane.xlu1 %1447 }
 0x202   :  { %v5355_v2 = vadd.f32 %v1448_v24, %v5258_v10  ;;  %v1427_v17 = vpop.xlane.xlu0 %1426 }
 0x203   :  { %v5358_v45 = vadd.f32 %v1427_v17, %v5238_v5 }
 0x205   :  { %v1741_v13 = vpop.xlane.xlu1 %1740 }
 0x206   :  { %v1843_v9 = vadd.f32 %v1741_v13, %v5275_v42  ;;  %v1723_v54 = vpop.xlane.xlu0 %1722 }
 0x207   :  { %v1837_v63 = vadd.f32 %v1723_v54, %v5256_v6 }
 0x208   :  { %v1889_v30 = vadd.f32 %v4484_v31, %v1843_v9 }
 0x209   :  { %v1883_v61 = vadd.f32 %v4484_v31, %v1837_v63  ;;  %v1791_v10 = vpop.xlane.xlu1 %1790 }
 0x20a   :  { %v1859_v62 = vadd.f32 %v1791_v10, %v5282_v15  ;;  %v1744_v35 = vpop.xlane.xlu0 %1743  ;;  %v1933_v42 = vmax.f32 %v1889_v30, 0.0 }
 0x20b   :  { %v1927_v5 = vmax.f32 %v1883_v61, 0.0  ;;  %v1844_v21 = vadd.f32 %v1744_v35, %v5272_v3 }
 0x20c   :  { %v1905_v20 = vadd.f32 %v4484_v31, %v1859_v62  ;;  %v2148_v34 = vrot.slane %v1933_v42, %v4501_v41 }
 0x20d   :  { %v2107_v26 = vrot.slane %v1927_v5, %v2106_v32  ;;  %v1890_v6 = vadd.f32 %v4484_v31, %v1844_v21  ;;  %v1812_v18 = vpop.xlane.xlu1 %1811 }
 0x20e   :  { %v1949_v22 = vmax.f32 %v1905_v20, 0.0  ;;  %v1866_v52 = vadd.f32 %v1812_v18, %v5287_v56  ;;  %v1809_v36 = vpop.xlane.xlu0 %1808 }
 0x20f   :  { %v1934_v46 = vmax.f32 %v1890_v6, 0.0  ;;  %v1865_v7 = vadd.f32 %v1809_v36, %v5279_v51  ;;  %v2109_v15 = vsel %vm2108_vm10, %v2107_v26, %v2102_v60 }
 0x210   :  { %v2226_v27 = vrot.slane %v1949_v22, %v2106_v32  ;;  %v1912_v3 = vadd.f32 %v4484_v31, %v1866_v52  ;;  %v2110_v32 = vadd.s32 4294967208, %v4448_v4 }
 0x211   :  { %v2152_v11 = vrot.slane %v1934_v46, %v4497_v57  ;;  %v1911_v37 = vadd.f32 %v4484_v31, %v1865_v7  ;;  %v5377_v53 = vpop.xlane.xlu1 %1065 }
 0x212   :  { %v1956_v12 = vmax.f32 %v1912_v3, 0.0  ;;  %v5379_v49 = vpop.xlane.xlu0 %997  ;;  %v2227_v56 = vsel %vm2108_vm10, %v2226_v27, %v2222_v48 }
 0x213   :  { %v2153_v51 = vsel %vm2045_vm1, %v2152_v11, %v2148_v34  ;;  %v1955_v24 = vmax.f32 %v1911_v37, 0.0 }
 0x214   :  { %v2260_v60 = vrot.slane %v1956_v12, %v4497_v57 }
 0x215   :  { %v2256_v17 = vrot.slane %v1955_v24, %v4501_v41  ;;  %v1383_v13 = vpop.xlane.xlu1 %1382  ;;  %v2113_v41 = vsub.s32 %v2110_v32, %v2794_v1  ;;  %v2117_v24 = vadd.s32 4294967200, %v4448_v4 }
 0x216   :  { %v1362_v38 = vpop.xlane.xlu0 %1361 }
 0x217   :  { %v2261_v9 = vsel %vm2045_vm1, %v2260_v60, %v2256_v17  ;;  %vm2143_vm1 = vcmask 1048512  }
 0x219   :  { %v5386_v54 = vpop.xlane.xlu1 %1450 }
 0x21a   :  { %v5388_v63 = vpop.xlane.xlu0 %1429 }
 0x21d   :  { %v1747_v30 = vpop.xlane.xlu1 %1746 }
 0x21e   :  { %v1845_v48 = vadd.f32 %v1747_v30, %v5315_v55  ;;  %v1726_v61 = vpop.xlane.xlu0 %1725 }
 0x21f   :  { %v1838_v10 = vadd.f32 %v1726_v61, %v5318_v14 }
 0x220   :  { %v1891_v57 = vadd.f32 %v4484_v31, %v1845_v48 }
 0x221   :  { %v1884_v62 = vadd.f32 %v4484_v31, %v1838_v10  ;;  %v1815_v35 = vpop.xlane.xlu1 %1814 }
 0x222   :  { %v1935_v5 = vmax.f32 %v1891_v57, 0.0  ;;  %v1867_v21 = vadd.f32 %v1815_v35, %v5321_v0  ;;  %v1794_v20 = vpop.xlane.xlu0 %1793 }
 0x223   :  { %v1928_v42 = vmax.f32 %v1884_v62, 0.0  ;;  %v1860_v26 = vadd.f32 %v1794_v20, %v5324_v19 }
 0x224   :  { %v2157_v6 = vrot.slane %v1935_v5, %v4610_v59  ;;  %v1913_v55 = vadd.f32 %v4484_v31, %v1867_v21 }
 0x225   :  { %v2114_v14 = vrot.slane %v1928_v42, %v2113_v41  ;;  %v1906_v18 = vadd.f32 %v4484_v31, %v1860_v26  ;;  %v1388_v22 = vpop.xlane.xlu1 %1387  ;;  %v1470_v26 = vadd.f32 %v1362_v38, %v5303_v44 }
 0x226   :  { %v1957_v52 = vmax.f32 %v1913_v55, 0.0  ;;  %v1365_v36 = vpop.xlane.xlu0 %1364  ;;  %v2158_v46 = vsel %vm2052_vm2, %v2157_v6, %v2153_v51 }
 0x227   :  { %v1950_v7 = vmax.f32 %v1906_v18, 0.0  ;;  %v2116_v27 = vsel %vm2115_vm11, %v2114_v14, %v2109_v15  ;;  %v2124_v14 = vadd.s32 4294967192, %v4448_v4 }
 0x228   :  { %v2265_v0 = vrot.slane %v1957_v52, %v4610_v59  ;;  %v2120_v59 = vsub.s32 %v2117_v24, %v2794_v1 }
 0x229   :  { %v2231_v3 = vrot.slane %v1950_v7, %v2113_v41  ;;  %v5403_v34 = vpop.xlane.xlu1 %1455  ;;  %v2127_v44 = vsub.s32 %v2124_v14, %v2794_v1 }
 0x22a   :  { %v5405_v19 = vpop.xlane.xlu0 %1432  ;;  %v2266_v11 = vsel %vm2052_vm2, %v2265_v0, %v2261_v9  ;;  %vm2362_vm2 = vcmask 17408  }
 0x22b   :  { %v2232_v37 = vsel %vm2115_vm11, %v2231_v3, %v2227_v56 }
 0x22d   :  { %v1750_v12 = vpop.xlane.xlu1 %1749 }
 0x22e   :  { %v1846_v60 = vadd.f32 %v1750_v12, %v5349_v16  ;;  %v1729_v17 = vpop.xlane.xlu0 %1728 }
 0x22f   :  { %v1839_v51 = vadd.f32 %v1729_v17, %v5352_v28  ;;  %v1478_v17 = vadd.f32 %v1388_v22, %v5336_v23 }
 0x230   :  { %v1892_v15 = vadd.f32 %v4484_v31, %v1846_v60 }
 0x231   :  { %v1885_v30 = vadd.f32 %v4484_v31, %v1839_v51  ;;  %v1818_v32 = vpop.xlane.xlu1 %1817 }
 0x232   :  { %v1936_v48 = vmax.f32 %v1892_v15, 0.0  ;;  %v1868_v61 = vadd.f32 %v1818_v32, %v5355_v2  ;;  %v1797_v9 = vpop.xlane.xlu0 %1796 }
 0x233   :  { %v1929_v56 = vmax.f32 %v1885_v30, 0.0  ;;  %v1861_v10 = vadd.f32 %v1797_v9, %v5358_v45  ;;  %v1477_v45 = vadd.f32 %v1383_v13, %v5299_v33  ;;  %v5566_v30 = vld [vmem:[#allocation37_spill] sm:$0xff] }
 0x234   :  { %v2162_v57 = vrot.slane %v1936_v48, %v4705_v25  ;;  %v1914_v16 = vadd.f32 %v4484_v31, %v1868_v61 }
 0x235   :  { %v2121_v28 = vrot.slane %v1929_v56, %v2120_v59  ;;  %v1907_v41 = vadd.f32 %v4484_v31, %v1861_v10  ;;  %v5419_v62 = vpop.xlane.xlu1 %1435 }
 0x236   :  { %v1958_v35 = vmax.f32 %v1914_v16, 0.0  ;;  %v5421_v5 = vpop.xlane.xlu0 %1367  ;;  %v2163_v21 = vsel %vm2059_vm3, %v2162_v57, %v2158_v46  ;;  %v5567_v16 = vld [vmem:[#allocation24_spill] sm:$0xff] }
 0x237   :  { %v1951_v2 = vmax.f32 %v1907_v41, 0.0  ;;  %v2123_v20 = vsel %vm2122_vm12, %v2121_v28, %v2116_v27  ;;  %v1499_v27 = vadd.f32 %v5386_v54, %v5309_v50 }
 0x238   :  { %v2270_v42 = vrot.slane %v1958_v35, %v4705_v25  ;;  %v1492_v25 = vadd.f32 %v5388_v63, %v5312_v43  ;;  %v1471_v43 = vadd.f32 %v1365_v36, %v5338_v8  ;;  %v754_v8 = vadd.f32 %v5291_v58, %v5567_v16 }
 0x239   :  { %v2236_v6 = vrot.slane %v1951_v2, %v2120_v59  ;;  %v1753_v55 = vpop.xlane.xlu1 %1752  ;;  %v5565_v59 = vld [vmem:[#allocation11_spill] sm:$0xff]  ;;  %v1500_v36 = vadd.f32 %v5403_v34, %v5344_v40  ;;  %v1493_v35 = vadd.f32 %v5405_v19, %v5346_v39 }
 0x23a   :  { %v1847_v18 = vadd.f32 %v1753_v55, %v1477_v45  ;;  %v1732_v52 = vpop.xlane.xlu0 %1731  ;;  %v2271_v7 = vsel %vm2059_vm3, %v2270_v42, %v2266_v11  ;;  %v732_v32 = vadd.f32 %v5566_v30, %v5565_v59 }
 0x23b   :  { %v1840_v0 = vadd.f32 %v1732_v52, %v1470_v26  ;;  %v2237_v46 = vsel %vm2122_vm12, %v2236_v6, %v2232_v37  ;;  %v2131_v37 = vadd.s32 4294967184, %v4448_v4 }
 0x23c   :  { %v1893_v33 = vadd.f32 %v4484_v31, %v1847_v18  ;;  %v1102_v40 = vadd.f32 %v5379_v49, %v732_v32  ;;  %v2138_v18 = vadd.s32 4294967176, %v4448_v4 }
 0x23d   :  { %v1886_v13 = vadd.f32 %v4484_v31, %v1840_v0  ;;  %v1821_v38 = vpop.xlane.xlu1 %1820  ;;  %v2134_v22 = vsub.s32 %v2131_v37, %v2794_v1 }
 0x23e   :  { %v1937_v3 = vmax.f32 %v1893_v33, 0.0  ;;  %v1869_v12 = vadd.f32 %v1821_v38, %v1499_v27  ;;  %v1800_v24 = vpop.xlane.xlu0 %1799  ;;  %v2141_v38 = vsub.s32 %v2138_v18, %v2794_v1 }
 0x23f   :  { %v1930_v11 = vmax.f32 %v1886_v13, 0.0  ;;  %v1862_v60 = vadd.f32 %v1800_v24, %v1492_v25 }
 0x240   :  { %v2167_v50 = vrot.slane %v1937_v3, %v4803_v29  ;;  %v1915_v54 = vadd.f32 %v4484_v31, %v1869_v12 }
 0x241   :  { %v2128_v63 = vrot.slane %v1930_v11, %v2127_v44  ;;  %v1908_v51 = vadd.f32 %v4484_v31, %v1862_v60  ;;  %v1758_v15 = vpop.xlane.xlu1 %1757 }
 0x242   :  { %v1959_v48 = vmax.f32 %v1915_v54, 0.0  ;;  %v1848_v61 = vadd.f32 %v1758_v15, %v1478_v17  ;;  %v1735_v9 = vpop.xlane.xlu0 %1734  ;;  %v2168_v56 = vsel %vm2066_vm4, %v2167_v50, %v2163_v21 }
 0x243   :  { %v1952_v23 = vmax.f32 %v1908_v51, 0.0  ;;  %v1841_v10 = vadd.f32 %v1735_v9, %v1471_v43  ;;  %v2130_v57 = vsel %vm2129_vm13, %v2128_v63, %v2123_v20  ;;  %v1124_v20 = vadd.f32 %v5377_v53, %v754_v8 }
 0x244   :  { %v2275_v28 = vrot.slane %v1959_v48, %v4803_v29  ;;  %v1894_v41 = vadd.f32 %v4484_v31, %v1848_v61  ;;  %v1472_v53 = vadd.f32 %v5421_v5, %v1102_v40 }
 0x245   :  { %v2241_v21 = vrot.slane %v1952_v23, %v2127_v44  ;;  %v1887_v2 = vadd.f32 %v4484_v31, %v1841_v10  ;;  %v1826_v45 = vpop.xlane.xlu1 %1825  ;;  %v1494_v39 = vadd.f32 %v5419_v62, %v1124_v20 }
 0x246   :  { %v1938_v42 = vmax.f32 %v1894_v41, 0.0  ;;  %v1870_v26 = vadd.f32 %v1826_v45, %v1500_v36  ;;  %v1803_v58 = vpop.xlane.xlu0 %1802  ;;  %v2276_v6 = vsel %vm2066_vm4, %v2275_v28, %v2271_v7 }
 0x247   :  { %v1931_v29 = vmax.f32 %v1887_v2, 0.0  ;;  %v1863_v34 = vadd.f32 %v1803_v58, %v1493_v35  ;;  %v2242_v55 = vsel %vm2129_vm13, %v2241_v21, %v2237_v46 }
 0x248   :  { %v2172_v19 = vrot.slane %v1938_v42, %v4911_v47  ;;  %v1916_v14 = vadd.f32 %v4484_v31, %v1870_v26 }
 0x249   :  { %v2135_v52 = vrot.slane %v1931_v29, %v2134_v22  ;;  %v1909_v0 = vadd.f32 %v4484_v31, %v1863_v34  ;;  %v1806_v7 = vpop.xlane.xlu1 %1805 }
 0x24a   :  { %v1960_v27 = vmax.f32 %v1916_v14, 0.0  ;;  %v1864_v49 = vadd.f32 %v1806_v7, %v1494_v39  ;;  %v1738_v33 = vpop.xlane.xlu0 %1737  ;;  %v2173_v25 = vsel %vm2073_vm5, %v2172_v19, %v2168_v56 }
 0x24b   :  { %v1953_v46 = vmax.f32 %v1909_v0, 0.0  ;;  %v1842_v44 = vadd.f32 %v1738_v33, %v1472_v53  ;;  %v2137_v62 = vsel %vm2136_vm14, %v2135_v52, %v2130_v57 }
 0x24c   :  { %v2280_v13 = vrot.slane %v1960_v27, %v4911_v47  ;;  %v1910_v4 = vadd.f32 %v4484_v31, %v1864_v49 }
 0x24d   :  { %v2246_v5 = vrot.slane %v1953_v46, %v2134_v22  ;;  %v1888_v3 = vadd.f32 %v4484_v31, %v1842_v44  ;;  %v2734_v31 = vld [vmem:[%s5486_s4] ss:$0 sm:$0xff] }
 0x24e   :  { %v1954_v12 = vmax.f32 %v1910_v4, 0.0  ;;  %v2281_v24 = vsel %vm2073_vm5, %v2280_v13, %v2276_v6 }
 0x24f   :  { %v1932_v11 = vmax.f32 %v1888_v3, 0.0  ;;  %v2284_v60 = vsel %vm2282_vm15, %v2281_v24, %v2173_v25  ;;  %v2247_v37 = vsel %vm2136_vm14, %v2246_v5, %v2242_v55 }
 0x250   :  { %v2251_v17 = vrot.slane %v1954_v12, %v2141_v38  ;;  %2736 = vmatprep.mubr.msk.f32.mxu0 %vm2286_vm0, %v2284_v60 }
 0x251   :  { %v2142_v47 = vrot.slane %v1932_v11, %v2141_v38 }
 0x252   :  { %v2252_v50 = vsel %vm2143_vm1, %v2251_v17, %v2247_v37 }
 0x253   :  { %v2144_v1 = vsel %vm2143_vm1, %v2142_v47, %v2137_v62 }
 0x254   :  { %v2283_v54 = vsel %vm2282_vm15, %v2252_v50, %v2144_v1 }
 0x255   :  { %2357 = vmatmul.mubr.f32.vlgmr.msra.gmra.mxu0 %v2283_v54 }
 0x315   :  { %v2358_v43 = vpop.f32.mrf.mxu0 }
 0x316   :  { %v2359_v63 = vadd.f32 %v2734_v31, %v2358_v43 }
 0x317   :  { %v2360_v51 = vpop.f32.mrf.mxu0 }
 0x318   :  { %2363 = vst.msk [vmem:[#allocation3] sm:$0x3] %vm2362_vm2, %v2359_v63 }
 0x319   :  { %2750 = shalt.err (!%p2747_p4)
}
 0x31a   :  { %2373 = dma.vmem_to_hbm [thread:$0]  %s2371_s23, 32, %s5487_s5, [#allocation4]  }
 0x31b   :  { %2759 = dma.done.wait [#allocation4], 32  }
 0x31c   :  { %2760 = vsyncadd [#allocation4], 4294967264 }
 0x31d   :  { %2377 = vsyncpa [#allocation4], 1 }

</bundles_post_ra>
